<compile_context>
chip_gen: v5e
topology: v5e:2x2
jax: 0.10.0
libtpu: 0.0.40
codegen_flags: <defaults>
</compile_context>

<pallas_src>
import math
import numpy as np

import jax
import jax.numpy as jnp
from jax import lax
from jax.experimental import pallas as pl
from jax.experimental.pallas import tpu as pltpu

# ----------------------------- configuration -----------------------------
B = 2                      # batch
ENC_IN = 8                 # configs.enc_in == embd_dim == C1
D_MODEL = 32               # configs.d_model
N_HEADS = 4                # configs.n_heads
HEAD_DIM = D_MODEL // N_HEADS
SEQ_LEN = 16               # configs.seq_len
PRED_LEN = 4               # configs.pred_len
E_LAYERS = 2               # configs.e_layers
DP_RANK = 8
FOLD = 8
T_TOTAL = SEQ_LEN + PRED_LEN
N_FREQ = SEQ_LEN // 2 + 1
K_HARM = 1 + 2 * PRED_LEN  # retained fourier modes (<= SEQ_LEN here)
BN_ROWS = B * SEQ_LEN
NEG = -1e30                # additive mask value (exp underflows to exactly 0)


def _full_spec(shape):
    """Full-array BlockSpec for a grid=(1,) call."""
    return pl.BlockSpec(shape, lambda i, _n=len(shape): (0,) * _n)


# =====================  single fused forward kernel  =====================
def _skt_forward_kernel(
        x_ref,        # (B, N, C1)
        posb_ref,     # (B*N, C)      pos-encoding + embedding bias, tiled over batch
        embw_ref,     # (C1, C)
        afold_ref,    # (C, C)        fold-mean + channel-repeat operator
        cf_ref,       # (B*F, B*N)    block-diag rfft cos (ortho)
        sf_ref,       # (B*F, B*N)    block-diag rfft -sin (ortho)
        ci_ref,       # (B*N, B*F)    block-diag irfft cos weights (ortho)
        si_ref,       # (B*N, B*F)    block-diag irfft sin weights (ortho)
        shift_ref,    # (2, B*N, B*N) row-shift matrices (per-batch zero pad baked in)
        wr_ref,       # (L, B*F, C)   weights_fft real, tiled over batch
        wi_ref,       # (L, B*F, C)   weights_fft imag, tiled over batch
        convw_ref,    # (L, 3*2C, C)  conv taps stacked along rows
        convb_ref,    # (L, 1, C)
        bn_ref,       # (L, B*N, 2)   folded eval-mode BatchNorm1d(seq_len) scale/shift
        qkvw_ref,     # (L, C, 3C)
        sell_ref,     # (L, B*dp, B*N) block-diag left (time) selection
        selr_ref,     # (L, C, H*dp)   block-diag right (head-dim) selection
        ln_ref,       # (L, 4, C)
        mask1_ref,    # (B*N, B*dp)   cross-batch -inf mask for branch 1
        mask2_ref,    # (C, C)        cross-head -inf mask for branch 2
        postw_ref,    # (C, C1)
        postb_ref,    # (1, C1)
        mext_ref,     # (T, N)        fused fft->select->cos-sum extrapolation operator
        o_ref,        # (B, T, C1)
):
    f32 = jnp.float32
    C = D_MODEL

    # ---- instance normalization over time (torch.var -> ddof=1; eps is 1.0 per reference) ----
    xn_parts, mu_list, std_list = [], [], []
    for b in range(B):
        xb = x_ref[b]                                              # (N, C1)
        mu_b = jnp.mean(xb, axis=0, keepdims=True)                 # (1, C1)
        xc = xb - mu_b
        var_b = jnp.sum(xc * xc, axis=0, keepdims=True) * (1.0 / (SEQ_LEN - 1))
        std_b = jnp.sqrt(var_b + 1.0)
        xn_parts.append(xc / std_b)
        mu_list.append(mu_b)
        std_list.append(std_b)
    xn = jnp.concatenate(xn_parts, axis=0)                         # (B*N, C1)

    # ---- DataEmbedding: Conv1d(k=1) == per-token linear, + positional encoding ----
    enc = jnp.dot(xn, embw_ref[...], preferred_element_type=f32) + posb_ref[...]   # (B*N, C)

    afold = afold_ref[...]
    cfb, sfb = cf_ref[...], sf_ref[...]
    cib, sib = ci_ref[...], si_ref[...]
    sh_prev, sh_next = shift_ref[0], shift_ref[1]
    mask1, mask2 = mask1_ref[...], mask2_ref[...]
    inv_hd = 1.0 / math.sqrt(HEAD_DIM)
    inv_sl = 1.0 / math.sqrt(SEQ_LEN)

    def layer_norm(z, g, bta):
        m = jnp.mean(z, axis=-1, keepdims=True)
        zc = z - m
        v = jnp.mean(zc * zc, axis=-1, keepdims=True)
        return zc * lax.rsqrt(v + 1e-5) * g + bta

    for l in range(E_LAYERS):
        wr, wi = wr_ref[l], wi_ref[l]                              # (B*F, C)
        cw = convw_ref[l]                                          # (6C, C) rows: [tap0|tap1|tap2]
        conv_b = convb_ref[l]                                      # (1, C)
        bn = bn_ref[l]                                             # (B*N, 2)
        qkv_w = qkvw_ref[l]                                        # (C, 3C)
        selL = sell_ref[l]                                         # (B*dp, B*N)
        selR = selr_ref[l]                                         # (C, H*dp)
        ln = ln_ref[l]                                             # (4, C)

        # ---- Fourier token mixing: rfft -> complex weight -> irfft as DFT matmuls ----
        xa = jnp.dot(enc, afold, preferred_element_type=f32)       # fold-mean + repeat (B*N, C)
        ur = jnp.dot(cfb, xa, preferred_element_type=f32)          # Re(rfft), (B*F, C)
        ui = jnp.dot(sfb, xa, preferred_element_type=f32)          # Im(rfft)
        re_x = ur * wr - ui * wi
        im_x = ur * wi + ui * wr
        m_mix = (jnp.dot(cib, re_x, preferred_element_type=f32)
                 + jnp.dot(sib, im_x, preferred_element_type=f32))  # irfft, (B*N, C)

        # ---- tiny_conv_linear: Conv1d(2C->C, k=3, pad=1) via shifted-row matmuls ----
        ih = jnp.concatenate([m_mix, enc], axis=-1)                 # (B*N, 2C)
        prev = jnp.dot(sh_prev, ih, preferred_element_type=f32)     # row t-1 (zero at t=0)
        nxt = jnp.dot(sh_next, ih, preferred_element_type=f32)      # row t+1 (zero at t=N-1)
        h = (jnp.dot(prev, cw[0:2 * C], preferred_element_type=f32)
             + jnp.dot(ih, cw[2 * C:4 * C], preferred_element_type=f32)
             + jnp.dot(nxt, cw[4 * C:6 * C], preferred_element_type=f32)) + conv_b

        # ---- BatchNorm1d(seq_len) eval (folded per-time scale/shift) + ELU ----
        h = h * bn[:, 0:1] + bn[:, 1:2]
        xh = jnp.where(h > 0.0, h, jnp.exp(jnp.minimum(h, 0.0)) - 1.0)

        # ---- qkv projection (qkv_bias=False) ----
        qkv = jnp.dot(xh, qkv_w, preferred_element_type=f32)        # (B*N, 3C)
        q = qkv[:, 0:C]
        k = qkv[:, C:2 * C]
        v = qkv[:, 2 * C:3 * C]

        # ---- branch 1: softmax(q k1^T / sqrt(hd)) @ v1, k1/v1 = selected time rows ----
        k1 = jnp.dot(selL, k, preferred_element_type=f32)            # (B*dp, C)
        v1 = jnp.dot(selL, v, preferred_element_type=f32)
        o1_heads = []
        for hh in range(N_HEADS):
            lo = hh * HEAD_DIM
            qh = q[:, lo:lo + HEAD_DIM]                              # (B*N, hd)
            k1h = k1[:, lo:lo + HEAD_DIM]                            # (B*dp, hd)
            v1h = v1[:, lo:lo + HEAD_DIM]
            dots = lax.dot_general(qh, k1h, (((1,), (1,)), ((), ())),
                                   preferred_element_type=f32) * inv_hd + mask1  # (B*N, B*dp)
            dots = dots - jnp.max(dots, axis=-1, keepdims=True)
            e = jnp.exp(dots)
            attn = e * pl.reciprocal(jnp.sum(e, axis=-1, keepdims=True), approx=True)
            o1_heads.append(jnp.dot(attn, v1h, preferred_element_type=f32))      # (B*N, hd)
        o1 = jnp.concatenate(o1_heads, axis=-1)                       # (B*N, C)

        # ---- branch 2: v2 @ softmax(q^T k2 / sqrt(N), -1)^T, k2/v2 = selected head-dim cols ----
        k2 = jnp.dot(k, selR, preferred_element_type=f32)             # (B*N, H*dp)
        v2 = jnp.dot(v, selR, preferred_element_type=f32)
        o2_parts = []
        for b in range(B):
            r0 = b * SEQ_LEN
            qb = q[r0:r0 + SEQ_LEN, :]
            k2b = k2[r0:r0 + SEQ_LEN, :]
            v2b = v2[r0:r0 + SEQ_LEN, :]
            dr = lax.dot_general(qb, k2b, (((0,), (0,)), ((), ())),
                                 preferred_element_type=f32) * inv_sl + mask2     # (C, H*dp)
            dr = dr - jnp.max(dr, axis=-1, keepdims=True)
            er = jnp.exp(dr)
            s = er * pl.reciprocal(jnp.sum(er, axis=-1, keepdims=True), approx=True)
            o2_parts.append(lax.dot_general(v2b, s, (((1,), (1,)), ((), ())),
                                            preferred_element_type=f32))          # (N, C)
        o2 = jnp.concatenate(o2_parts, axis=0)                         # (B*N, C)

        # ---- LayerNorm combine (x0.5 each) + residual ----
        out = 0.5 * layer_norm(o1, ln[0:1, :], ln[1:2, :]) \
            + 0.5 * layer_norm(o2, ln[2:3, :], ln[3:4, :])
        enc = out + enc

    # ---- Postmlp (last) + fourierExtrapolation + instance de-normalization ----
    y = jnp.dot(enc, postw_ref[...], preferred_element_type=f32) + postb_ref[...]  # (B*N, C1)
    mext = mext_ref[...]                                                             # (T, N)
    for b in range(B):
        yb = y[b * SEQ_LEN:(b + 1) * SEQ_LEN, :]                                    # (N, C1)
        out_b = jnp.dot(mext, yb, preferred_element_type=f32)                       # (T, C1)
        o_ref[b] = out_b * std_list[b] + mu_list[b]


def skt_linear_forward(params, x_enc, x_mark_enc=None, x_dec=None, x_mark_dec=None):
    args = (
        x_enc,
        params['posb'], params['emb_w'], params['a_fold'],
        params['cf'], params['sf'], params['ci'], params['si'],
        params['shiftm'],
        params['wr'], params['wi'],
        params['conv_w'], params['conv_b'], params['bn'], params['qkv_w'],
        params['sel_l'], params['sel_r'], params['ln'],
        params['mask1'], params['mask2'],
        params['post_w'], params['post_b'], params['mext'],
    )
    out = pl.pallas_call(
        _skt_forward_kernel,
        out_shape=jax.ShapeDtypeStruct((B, T_TOTAL, ENC_IN), jnp.float32),
        grid=(1,),
        in_specs=[_full_spec(a.shape) for a in args],
        out_specs=_full_spec((B, T_TOTAL, ENC_IN)),
        compiler_params=pltpu.CompilerParams(dimension_semantics=("arbitrary",)),
    )(*args)
    return out[:, -PRED_LEN:, :], out[:, :SEQ_LEN, :]


# ------------------------------ parameter init ------------------------------
def positional_encoding_np(seq_len, channels):
    inv_freq = 1.0 / (10000.0 ** (np.arange(0, channels, 2, dtype=np.float64) / channels))
    pos = np.arange(seq_len, dtype=np.float64)
    sin_inp = np.einsum('i,j->ij', pos, inv_freq)
    emb = np.stack([np.sin(sin_inp), np.cos(sin_inp)], axis=-1).reshape(seq_len, channels)
    return emb.astype(np.float32)


def init_params(seed=0):
    rng = np.random.default_rng(seed)
    n = SEQ_LEN

    def u(*shape, scale=0.1):
        return rng.uniform(-scale, scale, size=shape).astype(np.float32)

    # ---- embedding ----
    emb_w = u(ENC_IN, D_MODEL)                                     # Conv1d(k=1) weight as (in, out)
    emb_b = u(D_MODEL)
    pos = positional_encoding_np(n, D_MODEL)                       # (N, C)
    posb = np.tile(pos + emb_b[None, :], (B, 1)).astype(np.float32)  # (B*N, C)

    # ---- static DFT matrices (rfft/irfft with norm='ortho', exact) ----
    t = np.arange(n, dtype=np.float64)
    f = np.arange(N_FREQ, dtype=np.float64)
    ang = 2.0 * np.pi * np.outer(f, t) / n                         # (F, N)
    cf = np.cos(ang) / np.sqrt(n)
    sf = -np.sin(ang) / np.sqrt(n)
    w_c = np.full((N_FREQ,), 2.0); w_c[0] = 1.0; w_c[-1] = 1.0     # irfft cos weights
    w_s = np.full((N_FREQ,), 2.0); w_s[0] = 0.0; w_s[-1] = 0.0     # irfft sin weights (DC/Nyquist imag ignored)
    ci = (np.cos(ang).T * w_c[None, :]) / np.sqrt(n)               # (N, F)
    si = (-np.sin(ang).T * w_s[None, :]) / np.sqrt(n)              # (N, F)
    eye_b = np.eye(B, dtype=np.float64)
    cf_blk = np.kron(eye_b, cf).astype(np.float32)                 # (B*F, B*N)
    sf_blk = np.kron(eye_b, sf).astype(np.float32)
    ci_blk = np.kron(eye_b, ci).astype(np.float32)                 # (B*N, B*F)
    si_blk = np.kron(eye_b, si).astype(np.float32)

    # fold-mean + channel-repeat operator: (x @ a_fold)[:, c] = mean(x[:, 4*(c%8):4*(c%8)+4])
    grp = D_MODEL // FOLD
    a_fold = np.zeros((D_MODEL, D_MODEL), np.float32)
    for c in range(D_MODEL):
        for c2 in range(D_MODEL):
            if (c // grp) == (c2 % FOLD):
                a_fold[c, c2] = 1.0 / grp

    # conv tap-shift matrices (per-batch zero padding baked in)
    shiftm = np.zeros((2, BN_ROWS, BN_ROWS), np.float32)
    for r in range(BN_ROWS):
        if r % n != 0:
            shiftm[0, r, r - 1] = 1.0      # previous time step
        if r % n != n - 1:
            shiftm[1, r, r + 1] = 1.0      # next time step

    # attention masks (cross-batch for branch 1, cross-head for branch 2)
    mask1 = np.full((BN_ROWS, B * DP_RANK), NEG, np.float32)
    for r in range(BN_ROWS):
        b = r // n
        mask1[r, b * DP_RANK:(b + 1) * DP_RANK] = 0.0
    mask2 = np.full((D_MODEL, N_HEADS * DP_RANK), NEG, np.float32)
    for r in range(D_MODEL):
        hh = r // HEAD_DIM
        mask2[r, hh * DP_RANK:(hh + 1) * DP_RANK] = 0.0

    # ---- per-layer parameters (stacked along leading L) ----
    wr_l, wi_l, cw_l, cb_l, bn_l, qkv_l, sl_l, sr_l, ln_l = ([] for _ in range(9))
    for _ in range(E_LAYERS):
        wfft = u(N_FREQ, D_MODEL, 2)
        wr_l.append(np.tile(wfft[..., 0], (B, 1)))                 # (B*F, C)
        wi_l.append(np.tile(wfft[..., 1], (B, 1)))

        cw = u(D_MODEL, 2 * D_MODEL, 3)                            # torch Conv1d weight (out, in, k)
        cw_l.append(np.concatenate([cw[:, :, kk].T for kk in range(3)], axis=0))  # (3*2C, C)
        cb_l.append(u(1, D_MODEL))

        bn_gamma = np.ones(n, np.float32); bn_beta = np.zeros(n, np.float32)
        bn_mean = np.zeros(n, np.float32); bn_var = np.ones(n, np.float32)
        scale = bn_gamma / np.sqrt(bn_var + 1e-5)
        shift = bn_beta - bn_mean * scale
        bn_l.append(np.tile(np.stack([scale, shift], axis=-1), (B, 1)))           # (B*N, 2)

        qkv_l.append(u(D_MODEL, 3 * D_MODEL))                      # (in, out) == torch W.T, no bias

        idx_left = rng.permutation(n)[:DP_RANK]
        sl = np.zeros((DP_RANK, n), np.float32)
        sl[np.arange(DP_RANK), idx_left] = 1.0                     # k1[i] = k[idx_left[i]]
        sl_l.append(np.kron(np.eye(B, dtype=np.float32), sl))      # (B*dp, B*N)

        idx_right = rng.permutation(HEAD_DIM)[:DP_RANK]
        sr = np.zeros((HEAD_DIM, DP_RANK), np.float32)
        sr[idx_right, np.arange(DP_RANK)] = 1.0                    # k2[:, j] = k[:, idx_right[j]]
        sr_l.append(np.kron(np.eye(N_HEADS, dtype=np.float32), sr))  # (C, H*dp)

        ln_l.append(np.stack([np.ones(D_MODEL), np.zeros(D_MODEL),
                              np.ones(D_MODEL), np.zeros(D_MODEL)], axis=0).astype(np.float32))

    # Postmlp (only the last one is used by the reference forward)
    post_w = u(D_MODEL, ENC_IN)
    post_b = u(1, ENC_IN)

    # ---- fourierExtrapolation fused operator: (cos-sum o select o fft)/n as one (T, N) matrix ----
    ff = np.fft.fftfreq(n)
    idx = np.argsort(np.abs(ff), kind='stable')[:K_HARM]           # stable sort by |freq|
    tt = np.arange(T_TOTAL, dtype=np.float64)
    g = ff[idx]
    # NOTE: the reference hard-codes 2 * 3.1415 (not 2*pi); kept for fidelity.
    phase_init = 2.0 * 3.1415 * np.outer(tt, g)                    # (T, K)
    fc = np.cos(2.0 * np.pi * np.outer(idx.astype(np.float64), t) / n)   # Re(fft) operator (K, N)
    fs = -np.sin(2.0 * np.pi * np.outer(idx.astype(np.float64), t) / n)  # Im(fft) operator (K, N)
    mext = ((np.cos(phase_init) @ fc - np.sin(phase_init) @ fs) / n).astype(np.float32)  # (T, N)

    to_j = lambda a: jnp.asarray(np.asarray(a, dtype=np.float32))
    return dict(
        posb=to_j(posb), emb_w=to_j(emb_w), a_fold=to_j(a_fold),
        cf=to_j(cf_blk), sf=to_j(sf_blk), ci=to_j(ci_blk), si=to_j(si_blk),
        shiftm=to_j(shiftm),
        wr=to_j(np.stack(wr_l)), wi=to_j(np.stack(wi_l)),
        conv_w=to_j(np.stack(cw_l)), conv_b=to_j(np.stack(cb_l)),
        bn=to_j(np.stack(bn_l)), qkv_w=to_j(np.stack(qkv_l)),
        sel_l=to_j(np.stack(sl_l)), sel_r=to_j(np.stack(sr_l)),
        ln=to_j(np.stack(ln_l)),
        mask1=to_j(mask1), mask2=to_j(mask2),
        post_w=to_j(post_w), post_b=to_j(post_b), mext=to_j(mext),
    )


# ----------------------------------- main -----------------------------------
if __name__ == "__main__":
    key = jax.random.PRNGKey(0)
    k1_, k2_, k3_, k4_ = jax.random.split(key, 4)
    x_enc = jax.random.normal(k1_, (B, SEQ_LEN, ENC_IN), dtype=jnp.float32)
    x_mark_enc = jax.random.normal(k2_, (B, SEQ_LEN, 4), dtype=jnp.float32)   # unused by forward
    x_dec = jax.random.normal(k3_, (B, PRED_LEN, ENC_IN), dtype=jnp.float32)  # unused by forward
    x_mark_dec = jax.random.normal(k4_, (B, PRED_LEN, 4), dtype=jnp.float32)  # unused by forward

    params = init_params(0)
    fwd = jax.jit(lambda xe: skt_linear_forward(params, xe))
    pred, recon = fwd(x_enc)
    jax.block_until_ready((pred, recon))
    assert pred.shape == (B, PRED_LEN, ENC_IN)
    assert recon.shape == (B, SEQ_LEN, ENC_IN)
    assert bool(jnp.all(jnp.isfinite(pred))) and bool(jnp.all(jnp.isfinite(recon)))
    print("KERNEL_OK")
</pallas_src>

<mosaic_0001>
module attributes {stable_mosaic.version = 11 : i64} {
  func.func @_skt_forward_kernel(%arg0: i32, %arg1: memref<2x16x8xf32, #tpu.memory_space<vmem>>, %arg2: memref<32x32xf32, #tpu.memory_space<vmem>>, %arg3: memref<8x32xf32, #tpu.memory_space<vmem>>, %arg4: memref<32x32xf32, #tpu.memory_space<vmem>>, %arg5: memref<18x32xf32, #tpu.memory_space<vmem>>, %arg6: memref<18x32xf32, #tpu.memory_space<vmem>>, %arg7: memref<32x18xf32, #tpu.memory_space<vmem>>, %arg8: memref<32x18xf32, #tpu.memory_space<vmem>>, %arg9: memref<2x32x32xf32, #tpu.memory_space<vmem>>, %arg10: memref<2x18x32xf32, #tpu.memory_space<vmem>>, %arg11: memref<2x18x32xf32, #tpu.memory_space<vmem>>, %arg12: memref<2x192x32xf32, #tpu.memory_space<vmem>>, %arg13: memref<2x1x32xf32, #tpu.memory_space<vmem>>, %arg14: memref<2x32x2xf32, #tpu.memory_space<vmem>>, %arg15: memref<2x32x96xf32, #tpu.memory_space<vmem>>, %arg16: memref<2x16x32xf32, #tpu.memory_space<vmem>>, %arg17: memref<2x32x32xf32, #tpu.memory_space<vmem>>, %arg18: memref<2x4x32xf32, #tpu.memory_space<vmem>>, %arg19: memref<32x16xf32, #tpu.memory_space<vmem>>, %arg20: memref<32x32xf32, #tpu.memory_space<vmem>>, %arg21: memref<32x8xf32, #tpu.memory_space<vmem>>, %arg22: memref<1x8xf32, #tpu.memory_space<vmem>>, %arg23: memref<20x16xf32, #tpu.memory_space<vmem>>, %arg24: memref<2x20x8xf32, #tpu.memory_space<vmem>>) attributes {dimension_semantics = [#tpu.dimension_semantics<arbitrary>], iteration_bounds = array<i64: 1>, scalar_prefetch = 0 : i64, scratch_operands = 0 : i64, tpu.core_type = #tpu.core_type<tc>, window_params = [{pipeline_mode = #tpu.pipeline_mode<synchronous>, transform_indices = @transform_0, window_bounds = array<i64: 2, 16, 8>}, {pipeline_mode = #tpu.pipeline_mode<synchronous>, transform_indices = @transform_1, window_bounds = array<i64: 32, 32>}, {pipeline_mode = #tpu.pipeline_mode<synchronous>, transform_indices = @transform_2, window_bounds = array<i64: 8, 32>}, {pipeline_mode = #tpu.pipeline_mode<synchronous>, transform_indices = @transform_3, window_bounds = array<i64: 32, 32>}, {pipeline_mode = #tpu.pipeline_mode<synchronous>, transform_indices = @transform_4, window_bounds = array<i64: 18, 32>}, {pipeline_mode = #tpu.pipeline_mode<synchronous>, transform_indices = @transform_5, window_bounds = array<i64: 18, 32>}, {pipeline_mode = #tpu.pipeline_mode<synchronous>, transform_indices = @transform_6, window_bounds = array<i64: 32, 18>}, {pipeline_mode = #tpu.pipeline_mode<synchronous>, transform_indices = @transform_7, window_bounds = array<i64: 32, 18>}, {pipeline_mode = #tpu.pipeline_mode<synchronous>, transform_indices = @transform_8, window_bounds = array<i64: 2, 32, 32>}, {pipeline_mode = #tpu.pipeline_mode<synchronous>, transform_indices = @transform_9, window_bounds = array<i64: 2, 18, 32>}, {pipeline_mode = #tpu.pipeline_mode<synchronous>, transform_indices = @transform_10, window_bounds = array<i64: 2, 18, 32>}, {pipeline_mode = #tpu.pipeline_mode<synchronous>, transform_indices = @transform_11, window_bounds = array<i64: 2, 192, 32>}, {pipeline_mode = #tpu.pipeline_mode<synchronous>, transform_indices = @transform_12, window_bounds = array<i64: 2, 1, 32>}, {pipeline_mode = #tpu.pipeline_mode<synchronous>, transform_indices = @transform_13, window_bounds = array<i64: 2, 32, 2>}, {pipeline_mode = #tpu.pipeline_mode<synchronous>, transform_indices = @transform_14, window_bounds = array<i64: 2, 32, 96>}, {pipeline_mode = #tpu.pipeline_mode<synchronous>, transform_indices = @transform_15, window_bounds = array<i64: 2, 16, 32>}, {pipeline_mode = #tpu.pipeline_mode<synchronous>, transform_indices = @transform_16, window_bounds = array<i64: 2, 32, 32>}, {pipeline_mode = #tpu.pipeline_mode<synchronous>, transform_indices = @transform_17, window_bounds = array<i64: 2, 4, 32>}, {pipeline_mode = #tpu.pipeline_mode<synchronous>, transform_indices = @transform_18, window_bounds = array<i64: 32, 16>}, {pipeline_mode = #tpu.pipeline_mode<synchronous>, transform_indices = @transform_19, window_bounds = array<i64: 32, 32>}, {pipeline_mode = #tpu.pipeline_mode<synchronous>, transform_indices = @transform_20, window_bounds = array<i64: 32, 8>}, {pipeline_mode = #tpu.pipeline_mode<synchronous>, transform_indices = @transform_21, window_bounds = array<i64: 1, 8>}, {pipeline_mode = #tpu.pipeline_mode<synchronous>, transform_indices = @transform_22, window_bounds = array<i64: 20, 16>}, {pipeline_mode = #tpu.pipeline_mode<synchronous>, transform_indices = @transform_23, window_bounds = array<i64: 2, 20, 8>}]} {
    %c0 = arith.constant 0 : index
    %c0_0 = arith.constant 0 : index
    %c0_1 = arith.constant 0 : index
    %0 = vector.load %arg1[%c0, %c0_0, %c0_1] : memref<2x16x8xf32, #tpu.memory_space<vmem>>, vector<1x16x8xf32>
    %1 = vector.shape_cast %0 : vector<1x16x8xf32> to vector<16x8xf32>
    %cst = arith.constant dense<0.000000e+00> : vector<8xf32>
    %2 = vector.multi_reduction <add>, %1, %cst [0] : vector<16x8xf32> to vector<8xf32>
    %3 = vector.shape_cast %2 : vector<8xf32> to vector<1x8xf32>
    %cst_2 = arith.constant 1.600000e+01 : f32
    %4 = vector.broadcast %cst_2 : f32 to vector<1x8xf32>
    %5 = arith.divf %3, %4 : vector<1x8xf32>
    %6 = vector.broadcast %5 : vector<1x8xf32> to vector<16x8xf32>
    %7 = arith.subf %1, %6 : vector<16x8xf32>
    %8 = arith.mulf %7, %7 : vector<16x8xf32>
    %cst_3 = arith.constant dense<0.000000e+00> : vector<8xf32>
    %9 = vector.multi_reduction <add>, %8, %cst_3 [0] : vector<16x8xf32> to vector<8xf32>
    %10 = vector.shape_cast %9 : vector<8xf32> to vector<1x8xf32>
    %cst_4 = arith.constant 0.0666666701 : f32
    %11 = vector.broadcast %cst_4 : f32 to vector<1x8xf32>
    %12 = arith.mulf %10, %11 : vector<1x8xf32>
    %cst_5 = arith.constant 1.000000e+00 : f32
    %13 = vector.broadcast %cst_5 : f32 to vector<1x8xf32>
    %14 = arith.addf %12, %13 : vector<1x8xf32>
    %15 = math.sqrt %14 : vector<1x8xf32>
    %16 = vector.broadcast %15 : vector<1x8xf32> to vector<16x8xf32>
    %17 = arith.divf %7, %16 : vector<16x8xf32>
    %c1 = arith.constant 1 : index
    %c0_6 = arith.constant 0 : index
    %c0_7 = arith.constant 0 : index
    %18 = vector.load %arg1[%c1, %c0_6, %c0_7] : memref<2x16x8xf32, #tpu.memory_space<vmem>>, vector<1x16x8xf32>
    %19 = vector.shape_cast %18 : vector<1x16x8xf32> to vector<16x8xf32>
    %cst_8 = arith.constant dense<0.000000e+00> : vector<8xf32>
    %20 = vector.multi_reduction <add>, %19, %cst_8 [0] : vector<16x8xf32> to vector<8xf32>
    %21 = vector.shape_cast %20 : vector<8xf32> to vector<1x8xf32>
    %cst_9 = arith.constant 1.600000e+01 : f32
    %22 = vector.broadcast %cst_9 : f32 to vector<1x8xf32>
    %23 = arith.divf %21, %22 : vector<1x8xf32>
    %24 = vector.broadcast %23 : vector<1x8xf32> to vector<16x8xf32>
    %25 = arith.subf %19, %24 : vector<16x8xf32>
    %26 = arith.mulf %25, %25 : vector<16x8xf32>
    %cst_10 = arith.constant dense<0.000000e+00> : vector<8xf32>
    %27 = vector.multi_reduction <add>, %26, %cst_10 [0] : vector<16x8xf32> to vector<8xf32>
    %28 = vector.shape_cast %27 : vector<8xf32> to vector<1x8xf32>
    %cst_11 = arith.constant 0.0666666701 : f32
    %29 = vector.broadcast %cst_11 : f32 to vector<1x8xf32>
    %30 = arith.mulf %28, %29 : vector<1x8xf32>
    %cst_12 = arith.constant 1.000000e+00 : f32
    %31 = vector.broadcast %cst_12 : f32 to vector<1x8xf32>
    %32 = arith.addf %30, %31 : vector<1x8xf32>
    %33 = math.sqrt %32 : vector<1x8xf32>
    %34 = vector.broadcast %33 : vector<1x8xf32> to vector<16x8xf32>
    %35 = arith.divf %25, %34 : vector<16x8xf32>
    %36 = tpu.concatenate %17, %35 in 0 : vector<16x8xf32>, vector<16x8xf32> -> vector<32x8xf32>
    %c0_13 = arith.constant 0 : index
    %c0_14 = arith.constant 0 : index
    %37 = vector.load %arg3[%c0_13, %c0_14] : memref<8x32xf32, #tpu.memory_space<vmem>>, vector<8x32xf32>
    %cst_15 = arith.constant dense<0.000000e+00> : vector<32x32xf32>
    %38 = tpu.matmul %36, %37, %cst_15 {dimension_numbers = #tpu.dot_dimension_numbers<[1], [0], [0], [1], [0, 0, 1, 1], [], []>} : vector<32x8xf32>, vector<8x32xf32>, vector<32x32xf32> -> vector<32x32xf32>
    %c0_16 = arith.constant 0 : index
    %c0_17 = arith.constant 0 : index
    %39 = vector.load %arg2[%c0_16, %c0_17] : memref<32x32xf32, #tpu.memory_space<vmem>>, vector<32x32xf32>
    %40 = arith.addf %38, %39 : vector<32x32xf32>
    %c0_18 = arith.constant 0 : index
    %c0_19 = arith.constant 0 : index
    %41 = vector.load %arg4[%c0_18, %c0_19] : memref<32x32xf32, #tpu.memory_space<vmem>>, vector<32x32xf32>
    %c0_20 = arith.constant 0 : index
    %c0_21 = arith.constant 0 : index
    %42 = vector.load %arg5[%c0_20, %c0_21] : memref<18x32xf32, #tpu.memory_space<vmem>>, vector<18x32xf32>
    %c0_22 = arith.constant 0 : index
    %c0_23 = arith.constant 0 : index
    %43 = vector.load %arg6[%c0_22, %c0_23] : memref<18x32xf32, #tpu.memory_space<vmem>>, vector<18x32xf32>
    %c0_24 = arith.constant 0 : index
    %c0_25 = arith.constant 0 : index
    %44 = vector.load %arg7[%c0_24, %c0_25] : memref<32x18xf32, #tpu.memory_space<vmem>>, vector<32x18xf32>
    %c0_26 = arith.constant 0 : index
    %c0_27 = arith.constant 0 : index
    %45 = vector.load %arg8[%c0_26, %c0_27] : memref<32x18xf32, #tpu.memory_space<vmem>>, vector<32x18xf32>
    %c0_28 = arith.constant 0 : index
    %c0_29 = arith.constant 0 : index
    %c0_30 = arith.constant 0 : index
    %46 = vector.load %arg9[%c0_28, %c0_29, %c0_30] : memref<2x32x32xf32, #tpu.memory_space<vmem>>, vector<1x32x32xf32>
    %47 = vector.shape_cast %46 : vector<1x32x32xf32> to vector<32x32xf32>
    %c1_31 = arith.constant 1 : index
    %c0_32 = arith.constant 0 : index
    %c0_33 = arith.constant 0 : index
    %48 = vector.load %arg9[%c1_31, %c0_32, %c0_33] : memref<2x32x32xf32, #tpu.memory_space<vmem>>, vector<1x32x32xf32>
    %49 = vector.shape_cast %48 : vector<1x32x32xf32> to vector<32x32xf32>
    %c0_34 = arith.constant 0 : index
    %c0_35 = arith.constant 0 : index
    %50 = vector.load %arg19[%c0_34, %c0_35] : memref<32x16xf32, #tpu.memory_space<vmem>>, vector<32x16xf32>
    %c0_36 = arith.constant 0 : index
    %c0_37 = arith.constant 0 : index
    %51 = vector.load %arg20[%c0_36, %c0_37] : memref<32x32xf32, #tpu.memory_space<vmem>>, vector<32x32xf32>
    %c0_38 = arith.constant 0 : index
    %c0_39 = arith.constant 0 : index
    %c0_40 = arith.constant 0 : index
    %52 = vector.load %arg10[%c0_38, %c0_39, %c0_40] : memref<2x18x32xf32, #tpu.memory_space<vmem>>, vector<1x18x32xf32>
    %53 = vector.shape_cast %52 : vector<1x18x32xf32> to vector<18x32xf32>
    %c0_41 = arith.constant 0 : index
    %c0_42 = arith.constant 0 : index
    %c0_43 = arith.constant 0 : index
    %54 = vector.load %arg11[%c0_41, %c0_42, %c0_43] : memref<2x18x32xf32, #tpu.memory_space<vmem>>, vector<1x18x32xf32>
    %55 = vector.shape_cast %54 : vector<1x18x32xf32> to vector<18x32xf32>
    %c0_44 = arith.constant 0 : index
    %c0_45 = arith.constant 0 : index
    %c0_46 = arith.constant 0 : index
    %56 = vector.load %arg12[%c0_44, %c0_45, %c0_46] : memref<2x192x32xf32, #tpu.memory_space<vmem>>, vector<1x192x32xf32>
    %57 = vector.shape_cast %56 : vector<1x192x32xf32> to vector<192x32xf32>
    %c0_47 = arith.constant 0 : index
    %c0_48 = arith.constant 0 : index
    %c0_49 = arith.constant 0 : index
    %58 = vector.load %arg13[%c0_47, %c0_48, %c0_49] : memref<2x1x32xf32, #tpu.memory_space<vmem>>, vector<1x1x32xf32>
    %59 = vector.shape_cast %58 : vector<1x1x32xf32> to vector<1x32xf32>
    %c0_50 = arith.constant 0 : index
    %c0_51 = arith.constant 0 : index
    %c0_52 = arith.constant 0 : index
    %60 = vector.load %arg14[%c0_50, %c0_51, %c0_52] : memref<2x32x2xf32, #tpu.memory_space<vmem>>, vector<1x32x2xf32>
    %61 = vector.shape_cast %60 : vector<1x32x2xf32> to vector<32x2xf32>
    %c0_53 = arith.constant 0 : index
    %c0_54 = arith.constant 0 : index
    %c0_55 = arith.constant 0 : index
    %62 = vector.load %arg15[%c0_53, %c0_54, %c0_55] : memref<2x32x96xf32, #tpu.memory_space<vmem>>, vector<1x32x96xf32>
    %63 = vector.shape_cast %62 : vector<1x32x96xf32> to vector<32x96xf32>
    %c0_56 = arith.constant 0 : index
    %c0_57 = arith.constant 0 : index
    %c0_58 = arith.constant 0 : index
    %64 = vector.load %arg16[%c0_56, %c0_57, %c0_58] : memref<2x16x32xf32, #tpu.memory_space<vmem>>, vector<1x16x32xf32>
    %65 = vector.shape_cast %64 : vector<1x16x32xf32> to vector<16x32xf32>
    %c0_59 = arith.constant 0 : index
    %c0_60 = arith.constant 0 : index
    %c0_61 = arith.constant 0 : index
    %66 = vector.load %arg17[%c0_59, %c0_60, %c0_61] : memref<2x32x32xf32, #tpu.memory_space<vmem>>, vector<1x32x32xf32>
    %67 = vector.shape_cast %66 : vector<1x32x32xf32> to vector<32x32xf32>
    %c0_62 = arith.constant 0 : index
    %c0_63 = arith.constant 0 : index
    %c0_64 = arith.constant 0 : index
    %68 = vector.load %arg18[%c0_62, %c0_63, %c0_64] : memref<2x4x32xf32, #tpu.memory_space<vmem>>, vector<1x4x32xf32>
    %69 = vector.shape_cast %68 : vector<1x4x32xf32> to vector<4x32xf32>
    %cst_65 = arith.constant dense<0.000000e+00> : vector<32x32xf32>
    %70 = tpu.matmul %40, %41, %cst_65 {dimension_numbers = #tpu.dot_dimension_numbers<[1], [0], [0], [1], [0, 0, 1, 1], [], []>} : vector<32x32xf32>, vector<32x32xf32>, vector<32x32xf32> -> vector<32x32xf32>
    %cst_66 = arith.constant dense<0.000000e+00> : vector<18x32xf32>
    %71 = tpu.matmul %42, %70, %cst_66 {dimension_numbers = #tpu.dot_dimension_numbers<[1], [0], [0], [1], [0, 0, 1, 1], [], []>} : vector<18x32xf32>, vector<32x32xf32>, vector<18x32xf32> -> vector<18x32xf32>
    %cst_67 = arith.constant dense<0.000000e+00> : vector<18x32xf32>
    %72 = tpu.matmul %43, %70, %cst_67 {dimension_numbers = #tpu.dot_dimension_numbers<[1], [0], [0], [1], [0, 0, 1, 1], [], []>} : vector<18x32xf32>, vector<32x32xf32>, vector<18x32xf32> -> vector<18x32xf32>
    %73 = arith.mulf %71, %53 : vector<18x32xf32>
    %74 = arith.mulf %72, %55 : vector<18x32xf32>
    %75 = arith.subf %73, %74 : vector<18x32xf32>
    %76 = arith.mulf %71, %55 : vector<18x32xf32>
    %77 = arith.mulf %72, %53 : vector<18x32xf32>
    %78 = arith.addf %76, %77 : vector<18x32xf32>
    %cst_68 = arith.constant dense<0.000000e+00> : vector<32x32xf32>
    %79 = tpu.matmul %44, %75, %cst_68 {dimension_numbers = #tpu.dot_dimension_numbers<[1], [0], [0], [1], [0, 0, 1, 1], [], []>} : vector<32x18xf32>, vector<18x32xf32>, vector<32x32xf32> -> vector<32x32xf32>
    %cst_69 = arith.constant dense<0.000000e+00> : vector<32x32xf32>
    %80 = tpu.matmul %45, %78, %cst_69 {dimension_numbers = #tpu.dot_dimension_numbers<[1], [0], [0], [1], [0, 0, 1, 1], [], []>} : vector<32x18xf32>, vector<18x32xf32>, vector<32x32xf32> -> vector<32x32xf32>
    %81 = arith.addf %79, %80 : vector<32x32xf32>
    %82 = tpu.concatenate %81, %40 in 1 : vector<32x32xf32>, vector<32x32xf32> -> vector<32x64xf32>
    %cst_70 = arith.constant dense<0.000000e+00> : vector<32x64xf32>
    %83 = tpu.matmul %47, %82, %cst_70 {dimension_numbers = #tpu.dot_dimension_numbers<[1], [0], [0], [1], [0, 0, 1, 1], [], []>} : vector<32x32xf32>, vector<32x64xf32>, vector<32x64xf32> -> vector<32x64xf32>
    %cst_71 = arith.constant dense<0.000000e+00> : vector<32x64xf32>
    %84 = tpu.matmul %49, %82, %cst_71 {dimension_numbers = #tpu.dot_dimension_numbers<[1], [0], [0], [1], [0, 0, 1, 1], [], []>} : vector<32x32xf32>, vector<32x64xf32>, vector<32x64xf32> -> vector<32x64xf32>
    %85 = vector.extract_strided_slice %57 {offsets = [0, 0], sizes = [64, 32], strides = [1, 1]} : vector<192x32xf32> to vector<64x32xf32>
    %cst_72 = arith.constant dense<0.000000e+00> : vector<32x32xf32>
    %86 = tpu.matmul %83, %85, %cst_72 {dimension_numbers = #tpu.dot_dimension_numbers<[1], [0], [0], [1], [0, 0, 1, 1], [], []>} : vector<32x64xf32>, vector<64x32xf32>, vector<32x32xf32> -> vector<32x32xf32>
    %87 = vector.extract_strided_slice %57 {offsets = [64, 0], sizes = [64, 32], strides = [1, 1]} : vector<192x32xf32> to vector<64x32xf32>
    %cst_73 = arith.constant dense<0.000000e+00> : vector<32x32xf32>
    %88 = tpu.matmul %82, %87, %cst_73 {dimension_numbers = #tpu.dot_dimension_numbers<[1], [0], [0], [1], [0, 0, 1, 1], [], []>} : vector<32x64xf32>, vector<64x32xf32>, vector<32x32xf32> -> vector<32x32xf32>
    %89 = arith.addf %86, %88 : vector<32x32xf32>
    %90 = vector.extract_strided_slice %57 {offsets = [128, 0], sizes = [64, 32], strides = [1, 1]} : vector<192x32xf32> to vector<64x32xf32>
    %cst_74 = arith.constant dense<0.000000e+00> : vector<32x32xf32>
    %91 = tpu.matmul %84, %90, %cst_74 {dimension_numbers = #tpu.dot_dimension_numbers<[1], [0], [0], [1], [0, 0, 1, 1], [], []>} : vector<32x64xf32>, vector<64x32xf32>, vector<32x32xf32> -> vector<32x32xf32>
    %92 = arith.addf %89, %91 : vector<32x32xf32>
    %93 = vector.broadcast %59 : vector<1x32xf32> to vector<32x32xf32>
    %94 = arith.addf %92, %93 : vector<32x32xf32>
    %95 = vector.extract_strided_slice %61 {offsets = [0, 0], sizes = [32, 1], strides = [1, 1]} : vector<32x2xf32> to vector<32x1xf32>
    %96 = vector.broadcast %95 : vector<32x1xf32> to vector<32x32xf32>
    %97 = arith.mulf %94, %96 : vector<32x32xf32>
    %98 = vector.extract_strided_slice %61 {offsets = [0, 1], sizes = [32, 1], strides = [1, 1]} : vector<32x2xf32> to vector<32x1xf32>
    %99 = vector.broadcast %98 : vector<32x1xf32> to vector<32x32xf32>
    %100 = arith.addf %97, %99 : vector<32x32xf32>
    %cst_75 = arith.constant 0.000000e+00 : f32
    %101 = vector.broadcast %cst_75 : f32 to vector<32x32xf32>
    %102 = arith.cmpf ogt, %100, %101 : vector<32x32xf32>
    %cst_76 = arith.constant 0.000000e+00 : f32
    %103 = vector.broadcast %cst_76 : f32 to vector<32x32xf32>
    %104 = arith.minimumf %100, %103 : vector<32x32xf32>
    %105 = math.exp %104 : vector<32x32xf32>
    %cst_77 = arith.constant 1.000000e+00 : f32
    %106 = vector.broadcast %cst_77 : f32 to vector<32x32xf32>
    %107 = arith.subf %105, %106 : vector<32x32xf32>
    %108 = arith.select %102, %100, %107 : vector<32x32xi1>, vector<32x32xf32>
    %cst_78 = arith.constant dense<0.000000e+00> : vector<32x96xf32>
    %109 = tpu.matmul %108, %63, %cst_78 {dimension_numbers = #tpu.dot_dimension_numbers<[1], [0], [0], [1], [0, 0, 1, 1], [], []>} : vector<32x32xf32>, vector<32x96xf32>, vector<32x96xf32> -> vector<32x96xf32>
    %110 = vector.extract_strided_slice %109 {offsets = [0, 0], sizes = [32, 32], strides = [1, 1]} : vector<32x96xf32> to vector<32x32xf32>
    %111 = vector.extract_strided_slice %109 {offsets = [0, 32], sizes = [32, 32], strides = [1, 1]} : vector<32x96xf32> to vector<32x32xf32>
    %112 = vector.extract_strided_slice %109 {offsets = [0, 64], sizes = [32, 32], strides = [1, 1]} : vector<32x96xf32> to vector<32x32xf32>
    %cst_79 = arith.constant dense<0.000000e+00> : vector<16x32xf32>
    %113 = tpu.matmul %65, %111, %cst_79 {dimension_numbers = #tpu.dot_dimension_numbers<[1], [0], [0], [1], [0, 0, 1, 1], [], []>} : vector<16x32xf32>, vector<32x32xf32>, vector<16x32xf32> -> vector<16x32xf32>
    %cst_80 = arith.constant dense<0.000000e+00> : vector<16x32xf32>
    %114 = tpu.matmul %65, %112, %cst_80 {dimension_numbers = #tpu.dot_dimension_numbers<[1], [0], [0], [1], [0, 0, 1, 1], [], []>} : vector<16x32xf32>, vector<32x32xf32>, vector<16x32xf32> -> vector<16x32xf32>
    %115 = vector.extract_strided_slice %110 {offsets = [0, 0], sizes = [32, 8], strides = [1, 1]} : vector<32x32xf32> to vector<32x8xf32>
    %116 = vector.extract_strided_slice %113 {offsets = [0, 0], sizes = [16, 8], strides = [1, 1]} : vector<16x32xf32> to vector<16x8xf32>
    %117 = vector.extract_strided_slice %114 {offsets = [0, 0], sizes = [16, 8], strides = [1, 1]} : vector<16x32xf32> to vector<16x8xf32>
    %cst_81 = arith.constant dense<0.000000e+00> : vector<32x16xf32>
    %118 = tpu.matmul %115, %116, %cst_81 {dimension_numbers = #tpu.dot_dimension_numbers<[1], [1], [0], [0], [0, 0, 1, 0], [], []>} : vector<32x8xf32>, vector<16x8xf32>, vector<32x16xf32> -> vector<32x16xf32>
    %cst_82 = arith.constant 0.353553385 : f32
    %119 = vector.broadcast %cst_82 : f32 to vector<32x16xf32>
    %120 = arith.mulf %118, %119 : vector<32x16xf32>
    %121 = arith.addf %120, %50 : vector<32x16xf32>
    %cst_83 = arith.constant dense<0xFF800000> : vector<32xf32>
    %122 = vector.multi_reduction <maximumf>, %121, %cst_83 [1] : vector<32x16xf32> to vector<32xf32>
    %123 = vector.shape_cast %122 : vector<32xf32> to vector<32x1xf32>
    %124 = vector.broadcast %123 : vector<32x1xf32> to vector<32x16xf32>
    %125 = arith.subf %121, %124 : vector<32x16xf32>
    %126 = math.exp %125 : vector<32x16xf32>
    %cst_84 = arith.constant dense<0.000000e+00> : vector<32xf32>
    %127 = vector.multi_reduction <add>, %126, %cst_84 [1] : vector<32x16xf32> to vector<32xf32>
    %128 = vector.shape_cast %127 : vector<32xf32> to vector<32x1xf32>
    %129 = tpu.reciprocal %128 {approx = true} : vector<32x1xf32> -> vector<32x1xf32>
    %130 = vector.broadcast %129 : vector<32x1xf32> to vector<32x16xf32>
    %131 = arith.mulf %126, %130 : vector<32x16xf32>
    %cst_85 = arith.constant dense<0.000000e+00> : vector<32x8xf32>
    %132 = tpu.matmul %131, %117, %cst_85 {dimension_numbers = #tpu.dot_dimension_numbers<[1], [0], [0], [1], [0, 0, 1, 1], [], []>} : vector<32x16xf32>, vector<16x8xf32>, vector<32x8xf32> -> vector<32x8xf32>
    %133 = vector.extract_strided_slice %110 {offsets = [0, 8], sizes = [32, 8], strides = [1, 1]} : vector<32x32xf32> to vector<32x8xf32>
    %134 = vector.extract_strided_slice %113 {offsets = [0, 8], sizes = [16, 8], strides = [1, 1]} : vector<16x32xf32> to vector<16x8xf32>
    %135 = vector.extract_strided_slice %114 {offsets = [0, 8], sizes = [16, 8], strides = [1, 1]} : vector<16x32xf32> to vector<16x8xf32>
    %cst_86 = arith.constant dense<0.000000e+00> : vector<32x16xf32>
    %136 = tpu.matmul %133, %134, %cst_86 {dimension_numbers = #tpu.dot_dimension_numbers<[1], [1], [0], [0], [0, 0, 1, 0], [], []>} : vector<32x8xf32>, vector<16x8xf32>, vector<32x16xf32> -> vector<32x16xf32>
    %cst_87 = arith.constant 0.353553385 : f32
    %137 = vector.broadcast %cst_87 : f32 to vector<32x16xf32>
    %138 = arith.mulf %136, %137 : vector<32x16xf32>
    %139 = arith.addf %138, %50 : vector<32x16xf32>
    %cst_88 = arith.constant dense<0xFF800000> : vector<32xf32>
    %140 = vector.multi_reduction <maximumf>, %139, %cst_88 [1] : vector<32x16xf32> to vector<32xf32>
    %141 = vector.shape_cast %140 : vector<32xf32> to vector<32x1xf32>
    %142 = vector.broadcast %141 : vector<32x1xf32> to vector<32x16xf32>
    %143 = arith.subf %139, %142 : vector<32x16xf32>
    %144 = math.exp %143 : vector<32x16xf32>
    %cst_89 = arith.constant dense<0.000000e+00> : vector<32xf32>
    %145 = vector.multi_reduction <add>, %144, %cst_89 [1] : vector<32x16xf32> to vector<32xf32>
    %146 = vector.shape_cast %145 : vector<32xf32> to vector<32x1xf32>
    %147 = tpu.reciprocal %146 {approx = true} : vector<32x1xf32> -> vector<32x1xf32>
    %148 = vector.broadcast %147 : vector<32x1xf32> to vector<32x16xf32>
    %149 = arith.mulf %144, %148 : vector<32x16xf32>
    %cst_90 = arith.constant dense<0.000000e+00> : vector<32x8xf32>
    %150 = tpu.matmul %149, %135, %cst_90 {dimension_numbers = #tpu.dot_dimension_numbers<[1], [0], [0], [1], [0, 0, 1, 1], [], []>} : vector<32x16xf32>, vector<16x8xf32>, vector<32x8xf32> -> vector<32x8xf32>
    %151 = vector.extract_strided_slice %110 {offsets = [0, 16], sizes = [32, 8], strides = [1, 1]} : vector<32x32xf32> to vector<32x8xf32>
    %152 = vector.extract_strided_slice %113 {offsets = [0, 16], sizes = [16, 8], strides = [1, 1]} : vector<16x32xf32> to vector<16x8xf32>
    %153 = vector.extract_strided_slice %114 {offsets = [0, 16], sizes = [16, 8], strides = [1, 1]} : vector<16x32xf32> to vector<16x8xf32>
    %cst_91 = arith.constant dense<0.000000e+00> : vector<32x16xf32>
    %154 = tpu.matmul %151, %152, %cst_91 {dimension_numbers = #tpu.dot_dimension_numbers<[1], [1], [0], [0], [0, 0, 1, 0], [], []>} : vector<32x8xf32>, vector<16x8xf32>, vector<32x16xf32> -> vector<32x16xf32>
    %cst_92 = arith.constant 0.353553385 : f32
    %155 = vector.broadcast %cst_92 : f32 to vector<32x16xf32>
    %156 = arith.mulf %154, %155 : vector<32x16xf32>
    %157 = arith.addf %156, %50 : vector<32x16xf32>
    %cst_93 = arith.constant dense<0xFF800000> : vector<32xf32>
    %158 = vector.multi_reduction <maximumf>, %157, %cst_93 [1] : vector<32x16xf32> to vector<32xf32>
    %159 = vector.shape_cast %158 : vector<32xf32> to vector<32x1xf32>
    %160 = vector.broadcast %159 : vector<32x1xf32> to vector<32x16xf32>
    %161 = arith.subf %157, %160 : vector<32x16xf32>
    %162 = math.exp %161 : vector<32x16xf32>
    %cst_94 = arith.constant dense<0.000000e+00> : vector<32xf32>
    %163 = vector.multi_reduction <add>, %162, %cst_94 [1] : vector<32x16xf32> to vector<32xf32>
    %164 = vector.shape_cast %163 : vector<32xf32> to vector<32x1xf32>
    %165 = tpu.reciprocal %164 {approx = true} : vector<32x1xf32> -> vector<32x1xf32>
    %166 = vector.broadcast %165 : vector<32x1xf32> to vector<32x16xf32>
    %167 = arith.mulf %162, %166 : vector<32x16xf32>
    %cst_95 = arith.constant dense<0.000000e+00> : vector<32x8xf32>
    %168 = tpu.matmul %167, %153, %cst_95 {dimension_numbers = #tpu.dot_dimension_numbers<[1], [0], [0], [1], [0, 0, 1, 1], [], []>} : vector<32x16xf32>, vector<16x8xf32>, vector<32x8xf32> -> vector<32x8xf32>
    %169 = vector.extract_strided_slice %110 {offsets = [0, 24], sizes = [32, 8], strides = [1, 1]} : vector<32x32xf32> to vector<32x8xf32>
    %170 = vector.extract_strided_slice %113 {offsets = [0, 24], sizes = [16, 8], strides = [1, 1]} : vector<16x32xf32> to vector<16x8xf32>
    %171 = vector.extract_strided_slice %114 {offsets = [0, 24], sizes = [16, 8], strides = [1, 1]} : vector<16x32xf32> to vector<16x8xf32>
    %cst_96 = arith.constant dense<0.000000e+00> : vector<32x16xf32>
    %172 = tpu.matmul %169, %170, %cst_96 {dimension_numbers = #tpu.dot_dimension_numbers<[1], [1], [0], [0], [0, 0, 1, 0], [], []>} : vector<32x8xf32>, vector<16x8xf32>, vector<32x16xf32> -> vector<32x16xf32>
    %cst_97 = arith.constant 0.353553385 : f32
    %173 = vector.broadcast %cst_97 : f32 to vector<32x16xf32>
    %174 = arith.mulf %172, %173 : vector<32x16xf32>
    %175 = arith.addf %174, %50 : vector<32x16xf32>
    %cst_98 = arith.constant dense<0xFF800000> : vector<32xf32>
    %176 = vector.multi_reduction <maximumf>, %175, %cst_98 [1] : vector<32x16xf32> to vector<32xf32>
    %177 = vector.shape_cast %176 : vector<32xf32> to vector<32x1xf32>
    %178 = vector.broadcast %177 : vector<32x1xf32> to vector<32x16xf32>
    %179 = arith.subf %175, %178 : vector<32x16xf32>
    %180 = math.exp %179 : vector<32x16xf32>
    %cst_99 = arith.constant dense<0.000000e+00> : vector<32xf32>
    %181 = vector.multi_reduction <add>, %180, %cst_99 [1] : vector<32x16xf32> to vector<32xf32>
    %182 = vector.shape_cast %181 : vector<32xf32> to vector<32x1xf32>
    %183 = tpu.reciprocal %182 {approx = true} : vector<32x1xf32> -> vector<32x1xf32>
    %184 = vector.broadcast %183 : vector<32x1xf32> to vector<32x16xf32>
    %185 = arith.mulf %180, %184 : vector<32x16xf32>
    %cst_100 = arith.constant dense<0.000000e+00> : vector<32x8xf32>
    %186 = tpu.matmul %185, %171, %cst_100 {dimension_numbers = #tpu.dot_dimension_numbers<[1], [0], [0], [1], [0, 0, 1, 1], [], []>} : vector<32x16xf32>, vector<16x8xf32>, vector<32x8xf32> -> vector<32x8xf32>
    %187 = tpu.concatenate %132, %150, %168, %186 in 1 : vector<32x8xf32>, vector<32x8xf32>, vector<32x8xf32>, vector<32x8xf32> -> vector<32x32xf32>
    %cst_101 = arith.constant dense<0.000000e+00> : vector<32x32xf32>
    %188 = tpu.matmul %111, %67, %cst_101 {dimension_numbers = #tpu.dot_dimension_numbers<[1], [0], [0], [1], [0, 0, 1, 1], [], []>} : vector<32x32xf32>, vector<32x32xf32>, vector<32x32xf32> -> vector<32x32xf32>
    %cst_102 = arith.constant dense<0.000000e+00> : vector<32x32xf32>
    %189 = tpu.matmul %112, %67, %cst_102 {dimension_numbers = #tpu.dot_dimension_numbers<[1], [0], [0], [1], [0, 0, 1, 1], [], []>} : vector<32x32xf32>, vector<32x32xf32>, vector<32x32xf32> -> vector<32x32xf32>
    %190 = vector.extract_strided_slice %110 {offsets = [0, 0], sizes = [16, 32], strides = [1, 1]} : vector<32x32xf32> to vector<16x32xf32>
    %191 = vector.extract_strided_slice %188 {offsets = [0, 0], sizes = [16, 32], strides = [1, 1]} : vector<32x32xf32> to vector<16x32xf32>
    %192 = vector.extract_strided_slice %189 {offsets = [0, 0], sizes = [16, 32], strides = [1, 1]} : vector<32x32xf32> to vector<16x32xf32>
    %cst_103 = arith.constant dense<0.000000e+00> : vector<32x32xf32>
    %193 = tpu.matmul %190, %191, %cst_103 {dimension_numbers = #tpu.dot_dimension_numbers<[0], [0], [1], [1], [0, 1, 1, 1], [], []>} : vector<16x32xf32>, vector<16x32xf32>, vector<32x32xf32> -> vector<32x32xf32>
    %cst_104 = arith.constant 2.500000e-01 : f32
    %194 = vector.broadcast %cst_104 : f32 to vector<32x32xf32>
    %195 = arith.mulf %193, %194 : vector<32x32xf32>
    %196 = arith.addf %195, %51 : vector<32x32xf32>
    %cst_105 = arith.constant dense<0xFF800000> : vector<32xf32>
    %197 = vector.multi_reduction <maximumf>, %196, %cst_105 [1] : vector<32x32xf32> to vector<32xf32>
    %198 = vector.shape_cast %197 : vector<32xf32> to vector<32x1xf32>
    %199 = vector.broadcast %198 : vector<32x1xf32> to vector<32x32xf32>
    %200 = arith.subf %196, %199 : vector<32x32xf32>
    %201 = math.exp %200 : vector<32x32xf32>
    %cst_106 = arith.constant dense<0.000000e+00> : vector<32xf32>
    %202 = vector.multi_reduction <add>, %201, %cst_106 [1] : vector<32x32xf32> to vector<32xf32>
    %203 = vector.shape_cast %202 : vector<32xf32> to vector<32x1xf32>
    %204 = tpu.reciprocal %203 {approx = true} : vector<32x1xf32> -> vector<32x1xf32>
    %205 = vector.broadcast %204 : vector<32x1xf32> to vector<32x32xf32>
    %206 = arith.mulf %201, %205 : vector<32x32xf32>
    %cst_107 = arith.constant dense<0.000000e+00> : vector<16x32xf32>
    %207 = tpu.matmul %192, %206, %cst_107 {dimension_numbers = #tpu.dot_dimension_numbers<[1], [1], [0], [0], [0, 0, 1, 0], [], []>} : vector<16x32xf32>, vector<32x32xf32>, vector<16x32xf32> -> vector<16x32xf32>
    %208 = vector.extract_strided_slice %110 {offsets = [16, 0], sizes = [16, 32], strides = [1, 1]} : vector<32x32xf32> to vector<16x32xf32>
    %209 = vector.extract_strided_slice %188 {offsets = [16, 0], sizes = [16, 32], strides = [1, 1]} : vector<32x32xf32> to vector<16x32xf32>
    %210 = vector.extract_strided_slice %189 {offsets = [16, 0], sizes = [16, 32], strides = [1, 1]} : vector<32x32xf32> to vector<16x32xf32>
    %cst_108 = arith.constant dense<0.000000e+00> : vector<32x32xf32>
    %211 = tpu.matmul %208, %209, %cst_108 {dimension_numbers = #tpu.dot_dimension_numbers<[0], [0], [1], [1], [0, 1, 1, 1], [], []>} : vector<16x32xf32>, vector<16x32xf32>, vector<32x32xf32> -> vector<32x32xf32>
    %cst_109 = arith.constant 2.500000e-01 : f32
    %212 = vector.broadcast %cst_109 : f32 to vector<32x32xf32>
    %213 = arith.mulf %211, %212 : vector<32x32xf32>
    %214 = arith.addf %213, %51 : vector<32x32xf32>
    %cst_110 = arith.constant dense<0xFF800000> : vector<32xf32>
    %215 = vector.multi_reduction <maximumf>, %214, %cst_110 [1] : vector<32x32xf32> to vector<32xf32>
    %216 = vector.shape_cast %215 : vector<32xf32> to vector<32x1xf32>
    %217 = vector.broadcast %216 : vector<32x1xf32> to vector<32x32xf32>
    %218 = arith.subf %214, %217 : vector<32x32xf32>
    %219 = math.exp %218 : vector<32x32xf32>
    %cst_111 = arith.constant dense<0.000000e+00> : vector<32xf32>
    %220 = vector.multi_reduction <add>, %219, %cst_111 [1] : vector<32x32xf32> to vector<32xf32>
    %221 = vector.shape_cast %220 : vector<32xf32> to vector<32x1xf32>
    %222 = tpu.reciprocal %221 {approx = true} : vector<32x1xf32> -> vector<32x1xf32>
    %223 = vector.broadcast %222 : vector<32x1xf32> to vector<32x32xf32>
    %224 = arith.mulf %219, %223 : vector<32x32xf32>
    %cst_112 = arith.constant dense<0.000000e+00> : vector<16x32xf32>
    %225 = tpu.matmul %210, %224, %cst_112 {dimension_numbers = #tpu.dot_dimension_numbers<[1], [1], [0], [0], [0, 0, 1, 0], [], []>} : vector<16x32xf32>, vector<32x32xf32>, vector<16x32xf32> -> vector<16x32xf32>
    %226 = tpu.concatenate %207, %225 in 0 : vector<16x32xf32>, vector<16x32xf32> -> vector<32x32xf32>
    %227 = vector.extract_strided_slice %69 {offsets = [0, 0], sizes = [1, 32], strides = [1, 1]} : vector<4x32xf32> to vector<1x32xf32>
    %228 = vector.extract_strided_slice %69 {offsets = [1, 0], sizes = [1, 32], strides = [1, 1]} : vector<4x32xf32> to vector<1x32xf32>
    %cst_113 = arith.constant dense<0.000000e+00> : vector<32xf32>
    %229 = vector.multi_reduction <add>, %187, %cst_113 [1] : vector<32x32xf32> to vector<32xf32>
    %230 = vector.shape_cast %229 : vector<32xf32> to vector<32x1xf32>
    %cst_114 = arith.constant 3.200000e+01 : f32
    %231 = vector.broadcast %cst_114 : f32 to vector<32x1xf32>
    %232 = arith.divf %230, %231 : vector<32x1xf32>
    %233 = vector.broadcast %232 : vector<32x1xf32> to vector<32x32xf32>
    %234 = arith.subf %187, %233 : vector<32x32xf32>
    %235 = arith.mulf %234, %234 : vector<32x32xf32>
    %cst_115 = arith.constant dense<0.000000e+00> : vector<32xf32>
    %236 = vector.multi_reduction <add>, %235, %cst_115 [1] : vector<32x32xf32> to vector<32xf32>
    %237 = vector.shape_cast %236 : vector<32xf32> to vector<32x1xf32>
    %cst_116 = arith.constant 3.200000e+01 : f32
    %238 = vector.broadcast %cst_116 : f32 to vector<32x1xf32>
    %239 = arith.divf %237, %238 : vector<32x1xf32>
    %cst_117 = arith.constant 9.99999974E-6 : f32
    %240 = vector.broadcast %cst_117 : f32 to vector<32x1xf32>
    %241 = arith.addf %239, %240 : vector<32x1xf32>
    %242 = math.rsqrt %241 : vector<32x1xf32>
    %243 = vector.broadcast %242 : vector<32x1xf32> to vector<32x32xf32>
    %244 = arith.mulf %234, %243 : vector<32x32xf32>
    %245 = vector.broadcast %227 : vector<1x32xf32> to vector<32x32xf32>
    %246 = arith.mulf %244, %245 : vector<32x32xf32>
    %247 = vector.broadcast %228 : vector<1x32xf32> to vector<32x32xf32>
    %248 = arith.addf %246, %247 : vector<32x32xf32>
    %cst_118 = arith.constant 5.000000e-01 : f32
    %249 = vector.broadcast %cst_118 : f32 to vector<32x32xf32>
    %250 = arith.mulf %249, %248 : vector<32x32xf32>
    %251 = vector.extract_strided_slice %69 {offsets = [2, 0], sizes = [1, 32], strides = [1, 1]} : vector<4x32xf32> to vector<1x32xf32>
    %252 = vector.extract_strided_slice %69 {offsets = [3, 0], sizes = [1, 32], strides = [1, 1]} : vector<4x32xf32> to vector<1x32xf32>
    %cst_119 = arith.constant dense<0.000000e+00> : vector<32xf32>
    %253 = vector.multi_reduction <add>, %226, %cst_119 [1] : vector<32x32xf32> to vector<32xf32>
    %254 = vector.shape_cast %253 : vector<32xf32> to vector<32x1xf32>
    %cst_120 = arith.constant 3.200000e+01 : f32
    %255 = vector.broadcast %cst_120 : f32 to vector<32x1xf32>
    %256 = arith.divf %254, %255 : vector<32x1xf32>
    %257 = vector.broadcast %256 : vector<32x1xf32> to vector<32x32xf32>
    %258 = arith.subf %226, %257 : vector<32x32xf32>
    %259 = arith.mulf %258, %258 : vector<32x32xf32>
    %cst_121 = arith.constant dense<0.000000e+00> : vector<32xf32>
    %260 = vector.multi_reduction <add>, %259, %cst_121 [1] : vector<32x32xf32> to vector<32xf32>
    %261 = vector.shape_cast %260 : vector<32xf32> to vector<32x1xf32>
    %cst_122 = arith.constant 3.200000e+01 : f32
    %262 = vector.broadcast %cst_122 : f32 to vector<32x1xf32>
    %263 = arith.divf %261, %262 : vector<32x1xf32>
    %cst_123 = arith.constant 9.99999974E-6 : f32
    %264 = vector.broadcast %cst_123 : f32 to vector<32x1xf32>
    %265 = arith.addf %263, %264 : vector<32x1xf32>
    %266 = math.rsqrt %265 : vector<32x1xf32>
    %267 = vector.broadcast %266 : vector<32x1xf32> to vector<32x32xf32>
    %268 = arith.mulf %258, %267 : vector<32x32xf32>
    %269 = vector.broadcast %251 : vector<1x32xf32> to vector<32x32xf32>
    %270 = arith.mulf %268, %269 : vector<32x32xf32>
    %271 = vector.broadcast %252 : vector<1x32xf32> to vector<32x32xf32>
    %272 = arith.addf %270, %271 : vector<32x32xf32>
    %cst_124 = arith.constant 5.000000e-01 : f32
    %273 = vector.broadcast %cst_124 : f32 to vector<32x32xf32>
    %274 = arith.mulf %273, %272 : vector<32x32xf32>
    %275 = arith.addf %250, %274 : vector<32x32xf32>
    %276 = arith.addf %275, %40 : vector<32x32xf32>
    %c1_125 = arith.constant 1 : index
    %c0_126 = arith.constant 0 : index
    %c0_127 = arith.constant 0 : index
    %277 = vector.load %arg10[%c1_125, %c0_126, %c0_127] : memref<2x18x32xf32, #tpu.memory_space<vmem>>, vector<1x18x32xf32>
    %278 = vector.shape_cast %277 : vector<1x18x32xf32> to vector<18x32xf32>
    %c1_128 = arith.constant 1 : index
    %c0_129 = arith.constant 0 : index
    %c0_130 = arith.constant 0 : index
    %279 = vector.load %arg11[%c1_128, %c0_129, %c0_130] : memref<2x18x32xf32, #tpu.memory_space<vmem>>, vector<1x18x32xf32>
    %280 = vector.shape_cast %279 : vector<1x18x32xf32> to vector<18x32xf32>
    %c1_131 = arith.constant 1 : index
    %c0_132 = arith.constant 0 : index
    %c0_133 = arith.constant 0 : index
    %281 = vector.load %arg12[%c1_131, %c0_132, %c0_133] : memref<2x192x32xf32, #tpu.memory_space<vmem>>, vector<1x192x32xf32>
    %282 = vector.shape_cast %281 : vector<1x192x32xf32> to vector<192x32xf32>
    %c1_134 = arith.constant 1 : index
    %c0_135 = arith.constant 0 : index
    %c0_136 = arith.constant 0 : index
    %283 = vector.load %arg13[%c1_134, %c0_135, %c0_136] : memref<2x1x32xf32, #tpu.memory_space<vmem>>, vector<1x1x32xf32>
    %284 = vector.shape_cast %283 : vector<1x1x32xf32> to vector<1x32xf32>
    %c1_137 = arith.constant 1 : index
    %c0_138 = arith.constant 0 : index
    %c0_139 = arith.constant 0 : index
    %285 = vector.load %arg14[%c1_137, %c0_138, %c0_139] : memref<2x32x2xf32, #tpu.memory_space<vmem>>, vector<1x32x2xf32>
    %286 = vector.shape_cast %285 : vector<1x32x2xf32> to vector<32x2xf32>
    %c1_140 = arith.constant 1 : index
    %c0_141 = arith.constant 0 : index
    %c0_142 = arith.constant 0 : index
    %287 = vector.load %arg15[%c1_140, %c0_141, %c0_142] : memref<2x32x96xf32, #tpu.memory_space<vmem>>, vector<1x32x96xf32>
    %288 = vector.shape_cast %287 : vector<1x32x96xf32> to vector<32x96xf32>
    %c1_143 = arith.constant 1 : index
    %c0_144 = arith.constant 0 : index
    %c0_145 = arith.constant 0 : index
    %289 = vector.load %arg16[%c1_143, %c0_144, %c0_145] : memref<2x16x32xf32, #tpu.memory_space<vmem>>, vector<1x16x32xf32>
    %290 = vector.shape_cast %289 : vector<1x16x32xf32> to vector<16x32xf32>
    %c1_146 = arith.constant 1 : index
    %c0_147 = arith.constant 0 : index
    %c0_148 = arith.constant 0 : index
    %291 = vector.load %arg17[%c1_146, %c0_147, %c0_148] : memref<2x32x32xf32, #tpu.memory_space<vmem>>, vector<1x32x32xf32>
    %292 = vector.shape_cast %291 : vector<1x32x32xf32> to vector<32x32xf32>
    %c1_149 = arith.constant 1 : index
    %c0_150 = arith.constant 0 : index
    %c0_151 = arith.constant 0 : index
    %293 = vector.load %arg18[%c1_149, %c0_150, %c0_151] : memref<2x4x32xf32, #tpu.memory_space<vmem>>, vector<1x4x32xf32>
    %294 = vector.shape_cast %293 : vector<1x4x32xf32> to vector<4x32xf32>
    %cst_152 = arith.constant dense<0.000000e+00> : vector<32x32xf32>
    %295 = tpu.matmul %276, %41, %cst_152 {dimension_numbers = #tpu.dot_dimension_numbers<[1], [0], [0], [1], [0, 0, 1, 1], [], []>} : vector<32x32xf32>, vector<32x32xf32>, vector<32x32xf32> -> vector<32x32xf32>
    %cst_153 = arith.constant dense<0.000000e+00> : vector<18x32xf32>
    %296 = tpu.matmul %42, %295, %cst_153 {dimension_numbers = #tpu.dot_dimension_numbers<[1], [0], [0], [1], [0, 0, 1, 1], [], []>} : vector<18x32xf32>, vector<32x32xf32>, vector<18x32xf32> -> vector<18x32xf32>
    %cst_154 = arith.constant dense<0.000000e+00> : vector<18x32xf32>
    %297 = tpu.matmul %43, %295, %cst_154 {dimension_numbers = #tpu.dot_dimension_numbers<[1], [0], [0], [1], [0, 0, 1, 1], [], []>} : vector<18x32xf32>, vector<32x32xf32>, vector<18x32xf32> -> vector<18x32xf32>
    %298 = arith.mulf %296, %278 : vector<18x32xf32>
    %299 = arith.mulf %297, %280 : vector<18x32xf32>
    %300 = arith.subf %298, %299 : vector<18x32xf32>
    %301 = arith.mulf %296, %280 : vector<18x32xf32>
    %302 = arith.mulf %297, %278 : vector<18x32xf32>
    %303 = arith.addf %301, %302 : vector<18x32xf32>
    %cst_155 = arith.constant dense<0.000000e+00> : vector<32x32xf32>
    %304 = tpu.matmul %44, %300, %cst_155 {dimension_numbers = #tpu.dot_dimension_numbers<[1], [0], [0], [1], [0, 0, 1, 1], [], []>} : vector<32x18xf32>, vector<18x32xf32>, vector<32x32xf32> -> vector<32x32xf32>
    %cst_156 = arith.constant dense<0.000000e+00> : vector<32x32xf32>
    %305 = tpu.matmul %45, %303, %cst_156 {dimension_numbers = #tpu.dot_dimension_numbers<[1], [0], [0], [1], [0, 0, 1, 1], [], []>} : vector<32x18xf32>, vector<18x32xf32>, vector<32x32xf32> -> vector<32x32xf32>
    %306 = arith.addf %304, %305 : vector<32x32xf32>
    %307 = tpu.concatenate %306, %276 in 1 : vector<32x32xf32>, vector<32x32xf32> -> vector<32x64xf32>
    %cst_157 = arith.constant dense<0.000000e+00> : vector<32x64xf32>
    %308 = tpu.matmul %47, %307, %cst_157 {dimension_numbers = #tpu.dot_dimension_numbers<[1], [0], [0], [1], [0, 0, 1, 1], [], []>} : vector<32x32xf32>, vector<32x64xf32>, vector<32x64xf32> -> vector<32x64xf32>
    %cst_158 = arith.constant dense<0.000000e+00> : vector<32x64xf32>
    %309 = tpu.matmul %49, %307, %cst_158 {dimension_numbers = #tpu.dot_dimension_numbers<[1], [0], [0], [1], [0, 0, 1, 1], [], []>} : vector<32x32xf32>, vector<32x64xf32>, vector<32x64xf32> -> vector<32x64xf32>
    %310 = vector.extract_strided_slice %282 {offsets = [0, 0], sizes = [64, 32], strides = [1, 1]} : vector<192x32xf32> to vector<64x32xf32>
    %cst_159 = arith.constant dense<0.000000e+00> : vector<32x32xf32>
    %311 = tpu.matmul %308, %310, %cst_159 {dimension_numbers = #tpu.dot_dimension_numbers<[1], [0], [0], [1], [0, 0, 1, 1], [], []>} : vector<32x64xf32>, vector<64x32xf32>, vector<32x32xf32> -> vector<32x32xf32>
    %312 = vector.extract_strided_slice %282 {offsets = [64, 0], sizes = [64, 32], strides = [1, 1]} : vector<192x32xf32> to vector<64x32xf32>
    %cst_160 = arith.constant dense<0.000000e+00> : vector<32x32xf32>
    %313 = tpu.matmul %307, %312, %cst_160 {dimension_numbers = #tpu.dot_dimension_numbers<[1], [0], [0], [1], [0, 0, 1, 1], [], []>} : vector<32x64xf32>, vector<64x32xf32>, vector<32x32xf32> -> vector<32x32xf32>
    %314 = arith.addf %311, %313 : vector<32x32xf32>
    %315 = vector.extract_strided_slice %282 {offsets = [128, 0], sizes = [64, 32], strides = [1, 1]} : vector<192x32xf32> to vector<64x32xf32>
    %cst_161 = arith.constant dense<0.000000e+00> : vector<32x32xf32>
    %316 = tpu.matmul %309, %315, %cst_161 {dimension_numbers = #tpu.dot_dimension_numbers<[1], [0], [0], [1], [0, 0, 1, 1], [], []>} : vector<32x64xf32>, vector<64x32xf32>, vector<32x32xf32> -> vector<32x32xf32>
    %317 = arith.addf %314, %316 : vector<32x32xf32>
    %318 = vector.broadcast %284 : vector<1x32xf32> to vector<32x32xf32>
    %319 = arith.addf %317, %318 : vector<32x32xf32>
    %320 = vector.extract_strided_slice %286 {offsets = [0, 0], sizes = [32, 1], strides = [1, 1]} : vector<32x2xf32> to vector<32x1xf32>
    %321 = vector.broadcast %320 : vector<32x1xf32> to vector<32x32xf32>
    %322 = arith.mulf %319, %321 : vector<32x32xf32>
    %323 = vector.extract_strided_slice %286 {offsets = [0, 1], sizes = [32, 1], strides = [1, 1]} : vector<32x2xf32> to vector<32x1xf32>
    %324 = vector.broadcast %323 : vector<32x1xf32> to vector<32x32xf32>
    %325 = arith.addf %322, %324 : vector<32x32xf32>
    %cst_162 = arith.constant 0.000000e+00 : f32
    %326 = vector.broadcast %cst_162 : f32 to vector<32x32xf32>
    %327 = arith.cmpf ogt, %325, %326 : vector<32x32xf32>
    %cst_163 = arith.constant 0.000000e+00 : f32
    %328 = vector.broadcast %cst_163 : f32 to vector<32x32xf32>
    %329 = arith.minimumf %325, %328 : vector<32x32xf32>
    %330 = math.exp %329 : vector<32x32xf32>
    %cst_164 = arith.constant 1.000000e+00 : f32
    %331 = vector.broadcast %cst_164 : f32 to vector<32x32xf32>
    %332 = arith.subf %330, %331 : vector<32x32xf32>
    %333 = arith.select %327, %325, %332 : vector<32x32xi1>, vector<32x32xf32>
    %cst_165 = arith.constant dense<0.000000e+00> : vector<32x96xf32>
    %334 = tpu.matmul %333, %288, %cst_165 {dimension_numbers = #tpu.dot_dimension_numbers<[1], [0], [0], [1], [0, 0, 1, 1], [], []>} : vector<32x32xf32>, vector<32x96xf32>, vector<32x96xf32> -> vector<32x96xf32>
    %335 = vector.extract_strided_slice %334 {offsets = [0, 0], sizes = [32, 32], strides = [1, 1]} : vector<32x96xf32> to vector<32x32xf32>
    %336 = vector.extract_strided_slice %334 {offsets = [0, 32], sizes = [32, 32], strides = [1, 1]} : vector<32x96xf32> to vector<32x32xf32>
    %337 = vector.extract_strided_slice %334 {offsets = [0, 64], sizes = [32, 32], strides = [1, 1]} : vector<32x96xf32> to vector<32x32xf32>
    %cst_166 = arith.constant dense<0.000000e+00> : vector<16x32xf32>
    %338 = tpu.matmul %290, %336, %cst_166 {dimension_numbers = #tpu.dot_dimension_numbers<[1], [0], [0], [1], [0, 0, 1, 1], [], []>} : vector<16x32xf32>, vector<32x32xf32>, vector<16x32xf32> -> vector<16x32xf32>
    %cst_167 = arith.constant dense<0.000000e+00> : vector<16x32xf32>
    %339 = tpu.matmul %290, %337, %cst_167 {dimension_numbers = #tpu.dot_dimension_numbers<[1], [0], [0], [1], [0, 0, 1, 1], [], []>} : vector<16x32xf32>, vector<32x32xf32>, vector<16x32xf32> -> vector<16x32xf32>
    %340 = vector.extract_strided_slice %335 {offsets = [0, 0], sizes = [32, 8], strides = [1, 1]} : vector<32x32xf32> to vector<32x8xf32>
    %341 = vector.extract_strided_slice %338 {offsets = [0, 0], sizes = [16, 8], strides = [1, 1]} : vector<16x32xf32> to vector<16x8xf32>
    %342 = vector.extract_strided_slice %339 {offsets = [0, 0], sizes = [16, 8], strides = [1, 1]} : vector<16x32xf32> to vector<16x8xf32>
    %cst_168 = arith.constant dense<0.000000e+00> : vector<32x16xf32>
    %343 = tpu.matmul %340, %341, %cst_168 {dimension_numbers = #tpu.dot_dimension_numbers<[1], [1], [0], [0], [0, 0, 1, 0], [], []>} : vector<32x8xf32>, vector<16x8xf32>, vector<32x16xf32> -> vector<32x16xf32>
    %cst_169 = arith.constant 0.353553385 : f32
    %344 = vector.broadcast %cst_169 : f32 to vector<32x16xf32>
    %345 = arith.mulf %343, %344 : vector<32x16xf32>
    %346 = arith.addf %345, %50 : vector<32x16xf32>
    %cst_170 = arith.constant dense<0xFF800000> : vector<32xf32>
    %347 = vector.multi_reduction <maximumf>, %346, %cst_170 [1] : vector<32x16xf32> to vector<32xf32>
    %348 = vector.shape_cast %347 : vector<32xf32> to vector<32x1xf32>
    %349 = vector.broadcast %348 : vector<32x1xf32> to vector<32x16xf32>
    %350 = arith.subf %346, %349 : vector<32x16xf32>
    %351 = math.exp %350 : vector<32x16xf32>
    %cst_171 = arith.constant dense<0.000000e+00> : vector<32xf32>
    %352 = vector.multi_reduction <add>, %351, %cst_171 [1] : vector<32x16xf32> to vector<32xf32>
    %353 = vector.shape_cast %352 : vector<32xf32> to vector<32x1xf32>
    %354 = tpu.reciprocal %353 {approx = true} : vector<32x1xf32> -> vector<32x1xf32>
    %355 = vector.broadcast %354 : vector<32x1xf32> to vector<32x16xf32>
    %356 = arith.mulf %351, %355 : vector<32x16xf32>
    %cst_172 = arith.constant dense<0.000000e+00> : vector<32x8xf32>
    %357 = tpu.matmul %356, %342, %cst_172 {dimension_numbers = #tpu.dot_dimension_numbers<[1], [0], [0], [1], [0, 0, 1, 1], [], []>} : vector<32x16xf32>, vector<16x8xf32>, vector<32x8xf32> -> vector<32x8xf32>
    %358 = vector.extract_strided_slice %335 {offsets = [0, 8], sizes = [32, 8], strides = [1, 1]} : vector<32x32xf32> to vector<32x8xf32>
    %359 = vector.extract_strided_slice %338 {offsets = [0, 8], sizes = [16, 8], strides = [1, 1]} : vector<16x32xf32> to vector<16x8xf32>
    %360 = vector.extract_strided_slice %339 {offsets = [0, 8], sizes = [16, 8], strides = [1, 1]} : vector<16x32xf32> to vector<16x8xf32>
    %cst_173 = arith.constant dense<0.000000e+00> : vector<32x16xf32>
    %361 = tpu.matmul %358, %359, %cst_173 {dimension_numbers = #tpu.dot_dimension_numbers<[1], [1], [0], [0], [0, 0, 1, 0], [], []>} : vector<32x8xf32>, vector<16x8xf32>, vector<32x16xf32> -> vector<32x16xf32>
    %cst_174 = arith.constant 0.353553385 : f32
    %362 = vector.broadcast %cst_174 : f32 to vector<32x16xf32>
    %363 = arith.mulf %361, %362 : vector<32x16xf32>
    %364 = arith.addf %363, %50 : vector<32x16xf32>
    %cst_175 = arith.constant dense<0xFF800000> : vector<32xf32>
    %365 = vector.multi_reduction <maximumf>, %364, %cst_175 [1] : vector<32x16xf32> to vector<32xf32>
    %366 = vector.shape_cast %365 : vector<32xf32> to vector<32x1xf32>
    %367 = vector.broadcast %366 : vector<32x1xf32> to vector<32x16xf32>
    %368 = arith.subf %364, %367 : vector<32x16xf32>
    %369 = math.exp %368 : vector<32x16xf32>
    %cst_176 = arith.constant dense<0.000000e+00> : vector<32xf32>
    %370 = vector.multi_reduction <add>, %369, %cst_176 [1] : vector<32x16xf32> to vector<32xf32>
    %371 = vector.shape_cast %370 : vector<32xf32> to vector<32x1xf32>
    %372 = tpu.reciprocal %371 {approx = true} : vector<32x1xf32> -> vector<32x1xf32>
    %373 = vector.broadcast %372 : vector<32x1xf32> to vector<32x16xf32>
    %374 = arith.mulf %369, %373 : vector<32x16xf32>
    %cst_177 = arith.constant dense<0.000000e+00> : vector<32x8xf32>
    %375 = tpu.matmul %374, %360, %cst_177 {dimension_numbers = #tpu.dot_dimension_numbers<[1], [0], [0], [1], [0, 0, 1, 1], [], []>} : vector<32x16xf32>, vector<16x8xf32>, vector<32x8xf32> -> vector<32x8xf32>
    %376 = vector.extract_strided_slice %335 {offsets = [0, 16], sizes = [32, 8], strides = [1, 1]} : vector<32x32xf32> to vector<32x8xf32>
    %377 = vector.extract_strided_slice %338 {offsets = [0, 16], sizes = [16, 8], strides = [1, 1]} : vector<16x32xf32> to vector<16x8xf32>
    %378 = vector.extract_strided_slice %339 {offsets = [0, 16], sizes = [16, 8], strides = [1, 1]} : vector<16x32xf32> to vector<16x8xf32>
    %cst_178 = arith.constant dense<0.000000e+00> : vector<32x16xf32>
    %379 = tpu.matmul %376, %377, %cst_178 {dimension_numbers = #tpu.dot_dimension_numbers<[1], [1], [0], [0], [0, 0, 1, 0], [], []>} : vector<32x8xf32>, vector<16x8xf32>, vector<32x16xf32> -> vector<32x16xf32>
    %cst_179 = arith.constant 0.353553385 : f32
    %380 = vector.broadcast %cst_179 : f32 to vector<32x16xf32>
    %381 = arith.mulf %379, %380 : vector<32x16xf32>
    %382 = arith.addf %381, %50 : vector<32x16xf32>
    %cst_180 = arith.constant dense<0xFF800000> : vector<32xf32>
    %383 = vector.multi_reduction <maximumf>, %382, %cst_180 [1] : vector<32x16xf32> to vector<32xf32>
    %384 = vector.shape_cast %383 : vector<32xf32> to vector<32x1xf32>
    %385 = vector.broadcast %384 : vector<32x1xf32> to vector<32x16xf32>
    %386 = arith.subf %382, %385 : vector<32x16xf32>
    %387 = math.exp %386 : vector<32x16xf32>
    %cst_181 = arith.constant dense<0.000000e+00> : vector<32xf32>
    %388 = vector.multi_reduction <add>, %387, %cst_181 [1] : vector<32x16xf32> to vector<32xf32>
    %389 = vector.shape_cast %388 : vector<32xf32> to vector<32x1xf32>
    %390 = tpu.reciprocal %389 {approx = true} : vector<32x1xf32> -> vector<32x1xf32>
    %391 = vector.broadcast %390 : vector<32x1xf32> to vector<32x16xf32>
    %392 = arith.mulf %387, %391 : vector<32x16xf32>
    %cst_182 = arith.constant dense<0.000000e+00> : vector<32x8xf32>
    %393 = tpu.matmul %392, %378, %cst_182 {dimension_numbers = #tpu.dot_dimension_numbers<[1], [0], [0], [1], [0, 0, 1, 1], [], []>} : vector<32x16xf32>, vector<16x8xf32>, vector<32x8xf32> -> vector<32x8xf32>
    %394 = vector.extract_strided_slice %335 {offsets = [0, 24], sizes = [32, 8], strides = [1, 1]} : vector<32x32xf32> to vector<32x8xf32>
    %395 = vector.extract_strided_slice %338 {offsets = [0, 24], sizes = [16, 8], strides = [1, 1]} : vector<16x32xf32> to vector<16x8xf32>
    %396 = vector.extract_strided_slice %339 {offsets = [0, 24], sizes = [16, 8], strides = [1, 1]} : vector<16x32xf32> to vector<16x8xf32>
    %cst_183 = arith.constant dense<0.000000e+00> : vector<32x16xf32>
    %397 = tpu.matmul %394, %395, %cst_183 {dimension_numbers = #tpu.dot_dimension_numbers<[1], [1], [0], [0], [0, 0, 1, 0], [], []>} : vector<32x8xf32>, vector<16x8xf32>, vector<32x16xf32> -> vector<32x16xf32>
    %cst_184 = arith.constant 0.353553385 : f32
    %398 = vector.broadcast %cst_184 : f32 to vector<32x16xf32>
    %399 = arith.mulf %397, %398 : vector<32x16xf32>
    %400 = arith.addf %399, %50 : vector<32x16xf32>
    %cst_185 = arith.constant dense<0xFF800000> : vector<32xf32>
    %401 = vector.multi_reduction <maximumf>, %400, %cst_185 [1] : vector<32x16xf32> to vector<32xf32>
    %402 = vector.shape_cast %401 : vector<32xf32> to vector<32x1xf32>
    %403 = vector.broadcast %402 : vector<32x1xf32> to vector<32x16xf32>
    %404 = arith.subf %400, %403 : vector<32x16xf32>
    %405 = math.exp %404 : vector<32x16xf32>
    %cst_186 = arith.constant dense<0.000000e+00> : vector<32xf32>
    %406 = vector.multi_reduction <add>, %405, %cst_186 [1] : vector<32x16xf32> to vector<32xf32>
    %407 = vector.shape_cast %406 : vector<32xf32> to vector<32x1xf32>
    %408 = tpu.reciprocal %407 {approx = true} : vector<32x1xf32> -> vector<32x1xf32>
    %409 = vector.broadcast %408 : vector<32x1xf32> to vector<32x16xf32>
    %410 = arith.mulf %405, %409 : vector<32x16xf32>
    %cst_187 = arith.constant dense<0.000000e+00> : vector<32x8xf32>
    %411 = tpu.matmul %410, %396, %cst_187 {dimension_numbers = #tpu.dot_dimension_numbers<[1], [0], [0], [1], [0, 0, 1, 1], [], []>} : vector<32x16xf32>, vector<16x8xf32>, vector<32x8xf32> -> vector<32x8xf32>
    %412 = tpu.concatenate %357, %375, %393, %411 in 1 : vector<32x8xf32>, vector<32x8xf32>, vector<32x8xf32>, vector<32x8xf32> -> vector<32x32xf32>
    %cst_188 = arith.constant dense<0.000000e+00> : vector<32x32xf32>
    %413 = tpu.matmul %336, %292, %cst_188 {dimension_numbers = #tpu.dot_dimension_numbers<[1], [0], [0], [1], [0, 0, 1, 1], [], []>} : vector<32x32xf32>, vector<32x32xf32>, vector<32x32xf32> -> vector<32x32xf32>
    %cst_189 = arith.constant dense<0.000000e+00> : vector<32x32xf32>
    %414 = tpu.matmul %337, %292, %cst_189 {dimension_numbers = #tpu.dot_dimension_numbers<[1], [0], [0], [1], [0, 0, 1, 1], [], []>} : vector<32x32xf32>, vector<32x32xf32>, vector<32x32xf32> -> vector<32x32xf32>
    %415 = vector.extract_strided_slice %335 {offsets = [0, 0], sizes = [16, 32], strides = [1, 1]} : vector<32x32xf32> to vector<16x32xf32>
    %416 = vector.extract_strided_slice %413 {offsets = [0, 0], sizes = [16, 32], strides = [1, 1]} : vector<32x32xf32> to vector<16x32xf32>
    %417 = vector.extract_strided_slice %414 {offsets = [0, 0], sizes = [16, 32], strides = [1, 1]} : vector<32x32xf32> to vector<16x32xf32>
    %cst_190 = arith.constant dense<0.000000e+00> : vector<32x32xf32>
    %418 = tpu.matmul %415, %416, %cst_190 {dimension_numbers = #tpu.dot_dimension_numbers<[0], [0], [1], [1], [0, 1, 1, 1], [], []>} : vector<16x32xf32>, vector<16x32xf32>, vector<32x32xf32> -> vector<32x32xf32>
    %cst_191 = arith.constant 2.500000e-01 : f32
    %419 = vector.broadcast %cst_191 : f32 to vector<32x32xf32>
    %420 = arith.mulf %418, %419 : vector<32x32xf32>
    %421 = arith.addf %420, %51 : vector<32x32xf32>
    %cst_192 = arith.constant dense<0xFF800000> : vector<32xf32>
    %422 = vector.multi_reduction <maximumf>, %421, %cst_192 [1] : vector<32x32xf32> to vector<32xf32>
    %423 = vector.shape_cast %422 : vector<32xf32> to vector<32x1xf32>
    %424 = vector.broadcast %423 : vector<32x1xf32> to vector<32x32xf32>
    %425 = arith.subf %421, %424 : vector<32x32xf32>
    %426 = math.exp %425 : vector<32x32xf32>
    %cst_193 = arith.constant dense<0.000000e+00> : vector<32xf32>
    %427 = vector.multi_reduction <add>, %426, %cst_193 [1] : vector<32x32xf32> to vector<32xf32>
    %428 = vector.shape_cast %427 : vector<32xf32> to vector<32x1xf32>
    %429 = tpu.reciprocal %428 {approx = true} : vector<32x1xf32> -> vector<32x1xf32>
    %430 = vector.broadcast %429 : vector<32x1xf32> to vector<32x32xf32>
    %431 = arith.mulf %426, %430 : vector<32x32xf32>
    %cst_194 = arith.constant dense<0.000000e+00> : vector<16x32xf32>
    %432 = tpu.matmul %417, %431, %cst_194 {dimension_numbers = #tpu.dot_dimension_numbers<[1], [1], [0], [0], [0, 0, 1, 0], [], []>} : vector<16x32xf32>, vector<32x32xf32>, vector<16x32xf32> -> vector<16x32xf32>
    %433 = vector.extract_strided_slice %335 {offsets = [16, 0], sizes = [16, 32], strides = [1, 1]} : vector<32x32xf32> to vector<16x32xf32>
    %434 = vector.extract_strided_slice %413 {offsets = [16, 0], sizes = [16, 32], strides = [1, 1]} : vector<32x32xf32> to vector<16x32xf32>
    %435 = vector.extract_strided_slice %414 {offsets = [16, 0], sizes = [16, 32], strides = [1, 1]} : vector<32x32xf32> to vector<16x32xf32>
    %cst_195 = arith.constant dense<0.000000e+00> : vector<32x32xf32>
    %436 = tpu.matmul %433, %434, %cst_195 {dimension_numbers = #tpu.dot_dimension_numbers<[0], [0], [1], [1], [0, 1, 1, 1], [], []>} : vector<16x32xf32>, vector<16x32xf32>, vector<32x32xf32> -> vector<32x32xf32>
    %cst_196 = arith.constant 2.500000e-01 : f32
    %437 = vector.broadcast %cst_196 : f32 to vector<32x32xf32>
    %438 = arith.mulf %436, %437 : vector<32x32xf32>
    %439 = arith.addf %438, %51 : vector<32x32xf32>
    %cst_197 = arith.constant dense<0xFF800000> : vector<32xf32>
    %440 = vector.multi_reduction <maximumf>, %439, %cst_197 [1] : vector<32x32xf32> to vector<32xf32>
    %441 = vector.shape_cast %440 : vector<32xf32> to vector<32x1xf32>
    %442 = vector.broadcast %441 : vector<32x1xf32> to vector<32x32xf32>
    %443 = arith.subf %439, %442 : vector<32x32xf32>
    %444 = math.exp %443 : vector<32x32xf32>
    %cst_198 = arith.constant dense<0.000000e+00> : vector<32xf32>
    %445 = vector.multi_reduction <add>, %444, %cst_198 [1] : vector<32x32xf32> to vector<32xf32>
    %446 = vector.shape_cast %445 : vector<32xf32> to vector<32x1xf32>
    %447 = tpu.reciprocal %446 {approx = true} : vector<32x1xf32> -> vector<32x1xf32>
    %448 = vector.broadcast %447 : vector<32x1xf32> to vector<32x32xf32>
    %449 = arith.mulf %444, %448 : vector<32x32xf32>
    %cst_199 = arith.constant dense<0.000000e+00> : vector<16x32xf32>
    %450 = tpu.matmul %435, %449, %cst_199 {dimension_numbers = #tpu.dot_dimension_numbers<[1], [1], [0], [0], [0, 0, 1, 0], [], []>} : vector<16x32xf32>, vector<32x32xf32>, vector<16x32xf32> -> vector<16x32xf32>
    %451 = tpu.concatenate %432, %450 in 0 : vector<16x32xf32>, vector<16x32xf32> -> vector<32x32xf32>
    %452 = vector.extract_strided_slice %294 {offsets = [0, 0], sizes = [1, 32], strides = [1, 1]} : vector<4x32xf32> to vector<1x32xf32>
    %453 = vector.extract_strided_slice %294 {offsets = [1, 0], sizes = [1, 32], strides = [1, 1]} : vector<4x32xf32> to vector<1x32xf32>
    %cst_200 = arith.constant dense<0.000000e+00> : vector<32xf32>
    %454 = vector.multi_reduction <add>, %412, %cst_200 [1] : vector<32x32xf32> to vector<32xf32>
    %455 = vector.shape_cast %454 : vector<32xf32> to vector<32x1xf32>
    %cst_201 = arith.constant 3.200000e+01 : f32
    %456 = vector.broadcast %cst_201 : f32 to vector<32x1xf32>
    %457 = arith.divf %455, %456 : vector<32x1xf32>
    %458 = vector.broadcast %457 : vector<32x1xf32> to vector<32x32xf32>
    %459 = arith.subf %412, %458 : vector<32x32xf32>
    %460 = arith.mulf %459, %459 : vector<32x32xf32>
    %cst_202 = arith.constant dense<0.000000e+00> : vector<32xf32>
    %461 = vector.multi_reduction <add>, %460, %cst_202 [1] : vector<32x32xf32> to vector<32xf32>
    %462 = vector.shape_cast %461 : vector<32xf32> to vector<32x1xf32>
    %cst_203 = arith.constant 3.200000e+01 : f32
    %463 = vector.broadcast %cst_203 : f32 to vector<32x1xf32>
    %464 = arith.divf %462, %463 : vector<32x1xf32>
    %cst_204 = arith.constant 9.99999974E-6 : f32
    %465 = vector.broadcast %cst_204 : f32 to vector<32x1xf32>
    %466 = arith.addf %464, %465 : vector<32x1xf32>
    %467 = math.rsqrt %466 : vector<32x1xf32>
    %468 = vector.broadcast %467 : vector<32x1xf32> to vector<32x32xf32>
    %469 = arith.mulf %459, %468 : vector<32x32xf32>
    %470 = vector.broadcast %452 : vector<1x32xf32> to vector<32x32xf32>
    %471 = arith.mulf %469, %470 : vector<32x32xf32>
    %472 = vector.broadcast %453 : vector<1x32xf32> to vector<32x32xf32>
    %473 = arith.addf %471, %472 : vector<32x32xf32>
    %cst_205 = arith.constant 5.000000e-01 : f32
    %474 = vector.broadcast %cst_205 : f32 to vector<32x32xf32>
    %475 = arith.mulf %474, %473 : vector<32x32xf32>
    %476 = vector.extract_strided_slice %294 {offsets = [2, 0], sizes = [1, 32], strides = [1, 1]} : vector<4x32xf32> to vector<1x32xf32>
    %477 = vector.extract_strided_slice %294 {offsets = [3, 0], sizes = [1, 32], strides = [1, 1]} : vector<4x32xf32> to vector<1x32xf32>
    %cst_206 = arith.constant dense<0.000000e+00> : vector<32xf32>
    %478 = vector.multi_reduction <add>, %451, %cst_206 [1] : vector<32x32xf32> to vector<32xf32>
    %479 = vector.shape_cast %478 : vector<32xf32> to vector<32x1xf32>
    %cst_207 = arith.constant 3.200000e+01 : f32
    %480 = vector.broadcast %cst_207 : f32 to vector<32x1xf32>
    %481 = arith.divf %479, %480 : vector<32x1xf32>
    %482 = vector.broadcast %481 : vector<32x1xf32> to vector<32x32xf32>
    %483 = arith.subf %451, %482 : vector<32x32xf32>
    %484 = arith.mulf %483, %483 : vector<32x32xf32>
    %cst_208 = arith.constant dense<0.000000e+00> : vector<32xf32>
    %485 = vector.multi_reduction <add>, %484, %cst_208 [1] : vector<32x32xf32> to vector<32xf32>
    %486 = vector.shape_cast %485 : vector<32xf32> to vector<32x1xf32>
    %cst_209 = arith.constant 3.200000e+01 : f32
    %487 = vector.broadcast %cst_209 : f32 to vector<32x1xf32>
    %488 = arith.divf %486, %487 : vector<32x1xf32>
    %cst_210 = arith.constant 9.99999974E-6 : f32
    %489 = vector.broadcast %cst_210 : f32 to vector<32x1xf32>
    %490 = arith.addf %488, %489 : vector<32x1xf32>
    %491 = math.rsqrt %490 : vector<32x1xf32>
    %492 = vector.broadcast %491 : vector<32x1xf32> to vector<32x32xf32>
    %493 = arith.mulf %483, %492 : vector<32x32xf32>
    %494 = vector.broadcast %476 : vector<1x32xf32> to vector<32x32xf32>
    %495 = arith.mulf %493, %494 : vector<32x32xf32>
    %496 = vector.broadcast %477 : vector<1x32xf32> to vector<32x32xf32>
    %497 = arith.addf %495, %496 : vector<32x32xf32>
    %cst_211 = arith.constant 5.000000e-01 : f32
    %498 = vector.broadcast %cst_211 : f32 to vector<32x32xf32>
    %499 = arith.mulf %498, %497 : vector<32x32xf32>
    %500 = arith.addf %475, %499 : vector<32x32xf32>
    %501 = arith.addf %500, %276 : vector<32x32xf32>
    %c0_212 = arith.constant 0 : index
    %c0_213 = arith.constant 0 : index
    %502 = vector.load %arg21[%c0_212, %c0_213] : memref<32x8xf32, #tpu.memory_space<vmem>>, vector<32x8xf32>
    %cst_214 = arith.constant dense<0.000000e+00> : vector<32x8xf32>
    %503 = tpu.matmul %501, %502, %cst_214 {dimension_numbers = #tpu.dot_dimension_numbers<[1], [0], [0], [1], [0, 0, 1, 1], [], []>} : vector<32x32xf32>, vector<32x8xf32>, vector<32x8xf32> -> vector<32x8xf32>
    %c0_215 = arith.constant 0 : index
    %c0_216 = arith.constant 0 : index
    %504 = vector.load %arg22[%c0_215, %c0_216] : memref<1x8xf32, #tpu.memory_space<vmem>>, vector<1x8xf32>
    %505 = vector.broadcast %504 : vector<1x8xf32> to vector<32x8xf32>
    %506 = arith.addf %503, %505 : vector<32x8xf32>
    %c0_217 = arith.constant 0 : index
    %c0_218 = arith.constant 0 : index
    %507 = vector.load %arg23[%c0_217, %c0_218] : memref<20x16xf32, #tpu.memory_space<vmem>>, vector<20x16xf32>
    %508 = vector.extract_strided_slice %506 {offsets = [0, 0], sizes = [16, 8], strides = [1, 1]} : vector<32x8xf32> to vector<16x8xf32>
    %cst_219 = arith.constant dense<0.000000e+00> : vector<20x8xf32>
    %509 = tpu.matmul %507, %508, %cst_219 {dimension_numbers = #tpu.dot_dimension_numbers<[1], [0], [0], [1], [0, 0, 1, 1], [], []>} : vector<20x16xf32>, vector<16x8xf32>, vector<20x8xf32> -> vector<20x8xf32>
    %510 = vector.broadcast %15 : vector<1x8xf32> to vector<20x8xf32>
    %511 = arith.mulf %509, %510 : vector<20x8xf32>
    %512 = vector.broadcast %5 : vector<1x8xf32> to vector<20x8xf32>
    %513 = arith.addf %511, %512 : vector<20x8xf32>
    %c0_220 = arith.constant 0 : index
    %c0_221 = arith.constant 0 : index
    %c0_222 = arith.constant 0 : index
    %514 = vector.load %arg24[%c0_220, %c0_221, %c0_222] : memref<2x20x8xf32, #tpu.memory_space<vmem>>, vector<1x20x8xf32>
    %515 = vector.shape_cast %514 : vector<1x20x8xf32> to vector<20x8xf32>
    %516 = vector.shape_cast %513 : vector<20x8xf32> to vector<1x20x8xf32>
    tpu.vector_store %arg24[%c0_220, %c0_221, %c0_222], %516 {strides = array<i32>} : memref<2x20x8xf32, #tpu.memory_space<vmem>>, vector<1x20x8xf32>,
    %517 = vector.extract_strided_slice %506 {offsets = [16, 0], sizes = [16, 8], strides = [1, 1]} : vector<32x8xf32> to vector<16x8xf32>
    %cst_223 = arith.constant dense<0.000000e+00> : vector<20x8xf32>
    %518 = tpu.matmul %507, %517, %cst_223 {dimension_numbers = #tpu.dot_dimension_numbers<[1], [0], [0], [1], [0, 0, 1, 1], [], []>} : vector<20x16xf32>, vector<16x8xf32>, vector<20x8xf32> -> vector<20x8xf32>
    %519 = vector.broadcast %33 : vector<1x8xf32> to vector<20x8xf32>
    %520 = arith.mulf %518, %519 : vector<20x8xf32>
    %521 = vector.broadcast %23 : vector<1x8xf32> to vector<20x8xf32>
    %522 = arith.addf %520, %521 : vector<20x8xf32>
    %c1_224 = arith.constant 1 : index
    %c0_225 = arith.constant 0 : index
    %c0_226 = arith.constant 0 : index
    %523 = vector.load %arg24[%c1_224, %c0_225, %c0_226] : memref<2x20x8xf32, #tpu.memory_space<vmem>>, vector<1x20x8xf32>
    %524 = vector.shape_cast %523 : vector<1x20x8xf32> to vector<20x8xf32>
    %525 = vector.shape_cast %522 : vector<20x8xf32> to vector<1x20x8xf32>
    tpu.vector_store %arg24[%c1_224, %c0_225, %c0_226], %525 {strides = array<i32>} : memref<2x20x8xf32, #tpu.memory_space<vmem>>, vector<1x20x8xf32>,
    return
  }
  func.func @transform_0(%arg0: i32) -> (i32, i32, i32) {
    %c0_i32 = arith.constant 0 : i32
    %c0_i32_0 = arith.constant 0 : i32
    %c0_i32_1 = arith.constant 0 : i32
    %c0_i32_2 = arith.constant 0 : i32
    return %c0_i32, %c0_i32_0, %c0_i32_1 : i32, i32, i32
  }
  func.func @transform_1(%arg0: i32) -> (i32, i32) {
    %c0_i32 = arith.constant 0 : i32
    %c0_i32_0 = arith.constant 0 : i32
    %c0_i32_1 = arith.constant 0 : i32
    return %c0_i32, %c0_i32_0 : i32, i32
  }
  func.func @transform_2(%arg0: i32) -> (i32, i32) {
    %c0_i32 = arith.constant 0 : i32
    %c0_i32_0 = arith.constant 0 : i32
    %c0_i32_1 = arith.constant 0 : i32
    return %c0_i32, %c0_i32_0 : i32, i32
  }
  func.func @transform_3(%arg0: i32) -> (i32, i32) {
    %c0_i32 = arith.constant 0 : i32
    %c0_i32_0 = arith.constant 0 : i32
    %c0_i32_1 = arith.constant 0 : i32
    return %c0_i32, %c0_i32_0 : i32, i32
  }
  func.func @transform_4(%arg0: i32) -> (i32, i32) {
    %c0_i32 = arith.constant 0 : i32
    %c0_i32_0 = arith.constant 0 : i32
    %c0_i32_1 = arith.constant 0 : i32
    return %c0_i32, %c0_i32_0 : i32, i32
  }
  func.func @transform_5(%arg0: i32) -> (i32, i32) {
    %c0_i32 = arith.constant 0 : i32
    %c0_i32_0 = arith.constant 0 : i32
    %c0_i32_1 = arith.constant 0 : i32
    return %c0_i32, %c0_i32_0 : i32, i32
  }
  func.func @transform_6(%arg0: i32) -> (i32, i32) {
    %c0_i32 = arith.constant 0 : i32
    %c0_i32_0 = arith.constant 0 : i32
    %c0_i32_1 = arith.constant 0 : i32
    return %c0_i32, %c0_i32_0 : i32, i32
  }
  func.func @transform_7(%arg0: i32) -> (i32, i32) {
    %c0_i32 = arith.constant 0 : i32
    %c0_i32_0 = arith.constant 0 : i32
    %c0_i32_1 = arith.constant 0 : i32
    return %c0_i32, %c0_i32_0 : i32, i32
  }
  func.func @transform_8(%arg0: i32) -> (i32, i32, i32) {
    %c0_i32 = arith.constant 0 : i32
    %c0_i32_0 = arith.constant 0 : i32
    %c0_i32_1 = arith.constant 0 : i32
    %c0_i32_2 = arith.constant 0 : i32
    return %c0_i32, %c0_i32_0, %c0_i32_1 : i32, i32, i32
  }
  func.func @transform_9(%arg0: i32) -> (i32, i32, i32) {
    %c0_i32 = arith.constant 0 : i32
    %c0_i32_0 = arith.constant 0 : i32
    %c0_i32_1 = arith.constant 0 : i32
    %c0_i32_2 = arith.constant 0 : i32
    return %c0_i32, %c0_i32_0, %c0_i32_1 : i32, i32, i32
  }
  func.func @transform_10(%arg0: i32) -> (i32, i32, i32) {
    %c0_i32 = arith.constant 0 : i32
    %c0_i32_0 = arith.constant 0 : i32
    %c0_i32_1 = arith.constant 0 : i32
    %c0_i32_2 = arith.constant 0 : i32
    return %c0_i32, %c0_i32_0, %c0_i32_1 : i32, i32, i32
  }
  func.func @transform_11(%arg0: i32) -> (i32, i32, i32) {
    %c0_i32 = arith.constant 0 : i32
    %c0_i32_0 = arith.constant 0 : i32
    %c0_i32_1 = arith.constant 0 : i32
    %c0_i32_2 = arith.constant 0 : i32
    return %c0_i32, %c0_i32_0, %c0_i32_1 : i32, i32, i32
  }
  func.func @transform_12(%arg0: i32) -> (i32, i32, i32) {
    %c0_i32 = arith.constant 0 : i32
    %c0_i32_0 = arith.constant 0 : i32
    %c0_i32_1 = arith.constant 0 : i32
    %c0_i32_2 = arith.constant 0 : i32
    return %c0_i32, %c0_i32_0, %c0_i32_1 : i32, i32, i32
  }
  func.func @transform_13(%arg0: i32) -> (i32, i32, i32) {
    %c0_i32 = arith.constant 0 : i32
    %c0_i32_0 = arith.constant 0 : i32
    %c0_i32_1 = arith.constant 0 : i32
    %c0_i32_2 = arith.constant 0 : i32
    return %c0_i32, %c0_i32_0, %c0_i32_1 : i32, i32, i32
  }
  func.func @transform_14(%arg0: i32) -> (i32, i32, i32) {
    %c0_i32 = arith.constant 0 : i32
    %c0_i32_0 = arith.constant 0 : i32
    %c0_i32_1 = arith.constant 0 : i32
    %c0_i32_2 = arith.constant 0 : i32
    return %c0_i32, %c0_i32_0, %c0_i32_1 : i32, i32, i32
  }
  func.func @transform_15(%arg0: i32) -> (i32, i32, i32) {
    %c0_i32 = arith.constant 0 : i32
    %c0_i32_0 = arith.constant 0 : i32
    %c0_i32_1 = arith.constant 0 : i32
    %c0_i32_2 = arith.constant 0 : i32
    return %c0_i32, %c0_i32_0, %c0_i32_1 : i32, i32, i32
  }
  func.func @transform_16(%arg0: i32) -> (i32, i32, i32) {
    %c0_i32 = arith.constant 0 : i32
    %c0_i32_0 = arith.constant 0 : i32
    %c0_i32_1 = arith.constant 0 : i32
    %c0_i32_2 = arith.constant 0 : i32
    return %c0_i32, %c0_i32_0, %c0_i32_1 : i32, i32, i32
  }
  func.func @transform_17(%arg0: i32) -> (i32, i32, i32) {
    %c0_i32 = arith.constant 0 : i32
    %c0_i32_0 = arith.constant 0 : i32
    %c0_i32_1 = arith.constant 0 : i32
    %c0_i32_2 = arith.constant 0 : i32
    return %c0_i32, %c0_i32_0, %c0_i32_1 : i32, i32, i32
  }
  func.func @transform_18(%arg0: i32) -> (i32, i32) {
    %c0_i32 = arith.constant 0 : i32
    %c0_i32_0 = arith.constant 0 : i32
    %c0_i32_1 = arith.constant 0 : i32
    return %c0_i32, %c0_i32_0 : i32, i32
  }
  func.func @transform_19(%arg0: i32) -> (i32, i32) {
    %c0_i32 = arith.constant 0 : i32
    %c0_i32_0 = arith.constant 0 : i32
    %c0_i32_1 = arith.constant 0 : i32
    return %c0_i32, %c0_i32_0 : i32, i32
  }
  func.func @transform_20(%arg0: i32) -> (i32, i32) {
    %c0_i32 = arith.constant 0 : i32
    %c0_i32_0 = arith.constant 0 : i32
    %c0_i32_1 = arith.constant 0 : i32
    return %c0_i32, %c0_i32_0 : i32, i32
  }
  func.func @transform_21(%arg0: i32) -> (i32, i32) {
    %c0_i32 = arith.constant 0 : i32
    %c0_i32_0 = arith.constant 0 : i32
    %c0_i32_1 = arith.constant 0 : i32
    return %c0_i32, %c0_i32_0 : i32, i32
  }
  func.func @transform_22(%arg0: i32) -> (i32, i32) {
    %c0_i32 = arith.constant 0 : i32
    %c0_i32_0 = arith.constant 0 : i32
    %c0_i32_1 = arith.constant 0 : i32
    return %c0_i32, %c0_i32_0 : i32, i32
  }
  func.func @transform_23(%arg0: i32) -> (i32, i32, i32) {
    %c0_i32 = arith.constant 0 : i32
    %c0_i32_0 = arith.constant 0 : i32
    %c0_i32_1 = arith.constant 0 : i32
    %c0_i32_2 = arith.constant 0 : i32
    return %c0_i32, %c0_i32_0, %c0_i32_1 : i32, i32, i32
  }
}

</mosaic_0001>

<bundles_post_ra>
// kernel: _lambda_.1
= control target key start
LH: loop header
LB: loop body
LE: loop exit
PB: predicated region body
PF: predicated region fallthrough
CT: control target
= control target key end

     0   :  { %s7317_s0 = inlined_call_operand.vmem [shape: f32[2,16,8], index: 0, kind: input, shape index: {}]   ;;  %s7318_s1 = inlined_call_operand.hbm [shape: f32[32,32], index: 1, kind: input, shape index: {}]   ;;  %s7319_s2 = inlined_call_operand.hbm [shape: f32[8,32], index: 2, kind: input, shape index: {}]   ;;  %s7320_s3 = inlined_call_operand.hbm [shape: f32[32,32], index: 3, kind: input, shape index: {}]   ;;  %s7321_s4 = inlined_call_operand.hbm [shape: f32[18,32], index: 4, kind: input, shape index: {}]   ;;  %s7322_s5 = inlined_call_operand.hbm [shape: f32[18,32], index: 5, kind: input, shape index: {}]   ;;  %s7323_s6 = inlined_call_operand.hbm [shape: f32[32,18], index: 6, kind: input, shape index: {}]   ;;  %s7324_s7 = inlined_call_operand.hbm [shape: f32[32,18], index: 7, kind: input, shape index: {}]   ;;  %s7325_s8 = inlined_call_operand.hbm [shape: f32[2,32,32], index: 8, kind: input, shape index: {}]   ;;  %s7326_s9 = inlined_call_operand.hbm [shape: f32[2,18,32], index: 9, kind: input, shape index: {}]   ;;  %s7327_s10 = inlined_call_operand.vmem [shape: f32[2,18,32], index: 10, kind: input, shape index: {}]   ;;  %s7328_s11 = inlined_call_operand.hbm [shape: f32[2,192,32], index: 11, kind: input, shape index: {}]   ;;  %s7329_s12 = inlined_call_operand.vmem [shape: f32[2,1,32], index: 12, kind: input, shape index: {}]   ;;  %s7330_s13 = inlined_call_operand.hbm [shape: f32[2,32,2], index: 13, kind: input, shape index: {}]   ;;  %s7331_s14 = inlined_call_operand.hbm [shape: f32[2,32,96], index: 14, kind: input, shape index: {}]   ;;  %s7332_s15 = inlined_call_operand.hbm [shape: f32[2,16,32], index: 15, kind: input, shape index: {}]   ;;  %s7333_s16 = inlined_call_operand.hbm [shape: f32[2,32,32], index: 16, kind: input, shape index: {}]   ;;  %s7334_s17 = inlined_call_operand.vmem [shape: f32[2,4,32], index: 17, kind: input, shape index: {}]   ;;  %s7335_s18 = inlined_call_operand.hbm [shape: f32[32,16], index: 18, kind: input, shape index: {}]   ;;  %s7336_s19 = inlined_call_operand.hbm [shape: f32[32,32], index: 19, kind: input, shape index: {}]   ;;  %s7337_s20 = inlined_call_operand.hbm [shape: f32[32,8], index: 20, kind: input, shape index: {}]   ;;  %s7338_s21 = inlined_call_operand.vmem [shape: f32[1,8], index: 21, kind: input, shape index: {}]   ;;  %s7339_s22 = inlined_call_operand.hbm [shape: f32[20,16], index: 22, kind: input, shape index: {}]   ;;  %s7340_s23 = inlined_call_operand.vmem [shape: f32[2,20,8], index: 23, kind: output, shape index: {}]  }
   0x1   :  { %7343 = sst [smem:[#allocation40_spill]] %s7317_s0 }
   0x2   :  { %7344 = sst [smem:[#allocation41_spill]] %s7318_s1 }
   0x3   :  { %7345 = sst [smem:[#allocation42_spill]] %s7319_s2 }
   0x4   :  { %7346 = sst [smem:[#allocation43_spill]] %s7320_s3 }
   0x5   :  { %7347 = sst [smem:[#allocation44_spill]] %s7321_s4 }
   0x6   :  { %7348 = sst [smem:[#allocation45_spill]] %s7322_s5 }
   0x7   :  { %7349 = sst [smem:[#allocation46_spill]] %s7323_s6 }
   0x8   :  { %7350 = sst [smem:[#allocation47_spill]] %s7324_s7 }
   0x9   :  { %7351 = sst [smem:[#allocation48_spill]] %s7340_s23 }
   0xa   :  { %28 = vsyncpa [#allocation3], 0 }
   0xb   :  { %29 = vsyncpa [#allocation5], 0 }
   0xc   :  { %30 = vsyncpa [#allocation8], 0 }
   0xd   :  { %31 = vsyncpa [#allocation11], 0 }
   0xe   :  { %32 = vsyncpa [#allocation14], 0 }
   0xf   :  { %33 = vsyncpa [#allocation17], 0 }
  0x10   :  { %34 = vsyncpa [#allocation20], 0 }
  0x11   :  { %35 = vsyncpa [#allocation23], 0 }
  0x12   :  { %36 = vsyncpa [#allocation26], 0  ;;  %s7352_s24 = sld [smem:[#allocation42_spill]] }
  0x18   :  { %s58_s25 = sshll.u32 %s7352_s24, 4  ;;  %s59_s25 = int_to_ptr.hbm [resolvable:$true] %s58_s25 }
  0x19   :  { %37 = vsyncpa [#allocation29], 0  ;;  %s5647_s5 = smov [#allocation4]   ;;  %s7353_s6 = sld [smem:[#allocation44_spill]] }
  0x1a   :  { %s60_s1 = sshll.u32 %s5647_s5, 4  ;;  %s5648_s7 = smov [#allocation7]   ;;  %s61_s1 = int_to_ptr.vmem [resolvable:$true] %s60_s1 }
  0x1b   :  { %63 = dma.hbm_to_vmem [thread:$0]  %s59_s25, 128, %s61_s1, [#allocation5]  }
  0x1c   :  { %s83_s28 = sshll.u32 %s5648_s7, 4  ;;  %s7354_s0 = sld [smem:[#allocation46_spill]]  ;;  %s84_s28 = int_to_ptr.vmem [resolvable:$true] %s83_s28 }
  0x1d   :  { %s5649_s4 = smov 128   ;;  %s5650_s30 = smov 8  }
  0x1e   :  { %s133_s5 = sshll.u32 %s7325_s8, 4  ;;  %s5651_s1 = smov [#allocation10]   ;;  %s134_s5 = int_to_ptr.hbm [resolvable:$true] %s133_s5 }
  0x1f   :  { %s81_s27 = sshll.u32 %s7353_s6, 4  ;;  %s109_s26 = sshll.u32 %s5651_s1, 4  ;;  %s82_s27 = int_to_ptr.hbm [resolvable:$true] %s81_s27  ;;  %s110_s26 = int_to_ptr.vmem [resolvable:$true] %s109_s26 }
  0x20   :  { %89 = dma.hbm_to_vmem [thread:$0]  %s82_s27, 384, %s84_s28, [#allocation8], %s5649_s4, %s5649_s4, %s5650_s30  }
  0x21   :  { %s5652_s2 = smov [#allocation13]   ;;  %s161_s3 = sshll.u32 %s7328_s11, 4  ;;  %s162_s3 = int_to_ptr.hbm [resolvable:$true] %s161_s3 }
  0x22   :  { %s107_s23 = sshll.u32 %s7354_s0, 4  ;;  %s135_s6 = sshll.u32 %s5652_s2, 4  ;;  %s108_s23 = int_to_ptr.hbm [resolvable:$true] %s107_s23  ;;  %s136_s6 = int_to_ptr.vmem [resolvable:$true] %s135_s6 }
  0x23   :  { %115 = dma.hbm_to_vmem [thread:$0]  %s108_s23, 512, %s110_s26, [#allocation11], %s5649_s4, %s5649_s4, %s5650_s30  }
  0x24   :  { %141 = dma.hbm_to_vmem [thread:$0]  %s134_s5, 1024, %s136_s6, [#allocation14], %s5649_s4, %s5649_s4, %s5650_s30  }
  0x25   :  { %s189_s28 = sshll.u32 %s7331_s14, 4  ;;  %s5653_s0 = smov [#allocation16]   ;;  %s190_s28 = int_to_ptr.hbm [resolvable:$true] %s189_s28 }
  0x26   :  { %s163_s24 = sshll.u32 %s5653_s0, 4  ;;  %s5654_s23 = smov [#allocation19]   ;;  %s164_s24 = int_to_ptr.vmem [resolvable:$true] %s163_s24 }
  0x27   :  { %169 = dma.hbm_to_vmem [thread:$0]  %s162_s3, 6144, %s164_s24, [#allocation17], %s5649_s4, %s5649_s4, %s5650_s30  }
  0x28   :  { %s191_s11 = sshll.u32 %s5654_s23, 4  ;;  %s215_s26 = sshll.u32 %s7333_s16, 4  ;;  %s192_s11 = int_to_ptr.vmem [resolvable:$true] %s191_s11  ;;  %s216_s26 = int_to_ptr.hbm [resolvable:$true] %s215_s26 }
  0x29   :  { %197 = dma.hbm_to_vmem [thread:$0]  %s190_s28, 1024, %s192_s11, [#allocation20], %s5649_s4, %s5649_s4, %s5650_s30  }
  0x2a   :  { %s243_s2 = sshll.u32 %s7336_s19, 4  ;;  %s5655_s6 = smov [#allocation22]   ;;  %s244_s2 = int_to_ptr.hbm [resolvable:$true] %s243_s2 }
  0x2b   :  { %s217_s7 = sshll.u32 %s5655_s6, 4  ;;  %s5656_s29 = smov [#allocation25]   ;;  %s218_s7 = int_to_ptr.vmem [resolvable:$true] %s217_s7 }
  0x2c   :  { %223 = dma.hbm_to_vmem [thread:$0]  %s216_s26, 1024, %s218_s7, [#allocation23], %s5649_s4, %s5649_s4, %s5650_s30  }
  0x2d   :  { %s245_s16 = sshll.u32 %s5656_s29, 4  ;;  %s7355_s27 = sld [smem:[#allocation41_spill]]  ;;  %s246_s16 = int_to_ptr.vmem [resolvable:$true] %s245_s16 }
  0x2e   :  { %251 = dma.hbm_to_vmem [thread:$0]  %s244_s2, 512, %s246_s16, [#allocation26], %s5649_s4, %s5649_s4, %s5650_s30  }
  0x2f   :  { %s7356_s24 = sld [smem:[#allocation43_spill]]  ;;  %s5657_s11 = smov [#allocation2]  }
  0x30   :  { %s46_s25 = sshll.u32 %s5657_s11, 4  ;;  %s5658_s1 = smov [#allocation6]   ;;  %s47_s25 = int_to_ptr.vmem [resolvable:$true] %s46_s25 }
  0x31   :  { %s70_s26 = sshll.u32 %s5658_s1, 4  ;;  %s7357_s6 = sld [smem:[#allocation45_spill]]  ;;  %s71_s26 = int_to_ptr.vmem [resolvable:$true] %s70_s26 }
  0x32   :  { %s7358_s16 = sld [smem:[#allocation47_spill]]  ;;  %s5659_s8 = smov [#allocation9]  }
  0x33   :  { %s44_s0 = sshll.u32 %s7355_s27, 4  ;;  %s96_s27 = sshll.u32 %s5659_s8, 4  ;;  %s45_s0 = int_to_ptr.hbm [resolvable:$true] %s44_s0  ;;  %s97_s27 = int_to_ptr.vmem [resolvable:$true] %s96_s27 }
  0x34   :  { %52 = dma.hbm_to_vmem [thread:$0]  %s45_s0, 512, %s47_s25, [#allocation3], %s5649_s4, %s5649_s4, %s5650_s30  }
  0x35   :  { %s68_s23 = sshll.u32 %s7356_s24, 4  ;;  %s5660_s0 = smov [#allocation12]   ;;  %s69_s23 = int_to_ptr.hbm [resolvable:$true] %s68_s23 }
  0x36   :  { %76 = dma.hbm_to_vmem [thread:$0]  %s69_s23, 512, %s71_s26, [#allocation5], %s5649_s4, %s5649_s4, %s5650_s30  }
  0x37   :  { %s94_s7 = sshll.u32 %s7357_s6, 4  ;;  %s122_s19 = sshll.u32 %s5660_s0, 4  ;;  %s95_s7 = int_to_ptr.hbm [resolvable:$true] %s94_s7  ;;  %s123_s19 = int_to_ptr.vmem [resolvable:$true] %s122_s19 }
  0x38   :  { %s120_s3 = sshll.u32 %s7358_s16, 4  ;;  %s146_s11 = sshll.u32 %s7326_s9, 4  ;;  %s121_s3 = int_to_ptr.hbm [resolvable:$true] %s120_s3  ;;  %s147_s11 = int_to_ptr.hbm [resolvable:$true] %s146_s11 }
  0x39   :  { %102 = dma.hbm_to_vmem [thread:$0]  %s95_s7, 384, %s97_s27, [#allocation8], %s5649_s4, %s5649_s4, %s5650_s30  }
  0x3a   :  { %128 = dma.hbm_to_vmem [thread:$0]  %s121_s3, 512, %s123_s19, [#allocation11], %s5649_s4, %s5649_s4, %s5650_s30  }
  0x3b   :  { %s176_s1 = sshll.u32 %s7330_s13, 4  ;;  %s5661_s26 = smov [#allocation15]   ;;  %s177_s1 = int_to_ptr.hbm [resolvable:$true] %s176_s1 }
  0x3c   :  { %s148_s14 = sshll.u32 %s5661_s26, 4  ;;  %s5662_s5 = smov [#allocation18]   ;;  %s149_s14 = int_to_ptr.vmem [resolvable:$true] %s148_s14 }
  0x3d   :  { %154 = dma.hbm_to_vmem [thread:$0]  %s147_s11, 768, %s149_s14, [#allocation14], %s5649_s4, %s5649_s4, %s5650_s30  }
  0x3e   :  { %s178_s9 = sshll.u32 %s5662_s5, 4  ;;  %s202_s2 = sshll.u32 %s7332_s15, 4  ;;  %s179_s9 = int_to_ptr.vmem [resolvable:$true] %s178_s9  ;;  %s203_s2 = int_to_ptr.hbm [resolvable:$true] %s202_s2 }
  0x3f   :  { %184 = dma.hbm_to_vmem [thread:$0]  %s177_s1, 1024, %s179_s9, [#allocation17], %s5649_s4, %s5649_s4, %s5650_s30  }
  0x40   :  { %s230_s16 = sshll.u32 %s7335_s18, 4  ;;  %s5663_s3 = smov [#allocation21]   ;;  %s231_s16 = int_to_ptr.hbm [resolvable:$true] %s230_s16 }
  0x41   :  { %s204_s8 = sshll.u32 %s5663_s3, 4  ;;  %s5664_s27 = smov [#allocation24]   ;;  %s205_s8 = int_to_ptr.vmem [resolvable:$true] %s204_s8 }
  0x42   :  { %210 = dma.hbm_to_vmem [thread:$0]  %s203_s2, 512, %s205_s8, [#allocation20], %s5649_s4, %s5649_s4, %s5650_s30  }
  0x43   :  { %s232_s15 = sshll.u32 %s5664_s27, 4  ;;  %s256_s28 = sshll.u32 %s7337_s20, 4  ;;  %s233_s15 = int_to_ptr.vmem [resolvable:$true] %s232_s15  ;;  %s257_s28 = int_to_ptr.hbm [resolvable:$true] %s256_s28 }
  0x44   :  { %238 = dma.hbm_to_vmem [thread:$0]  %s231_s16, 512, %s233_s15, [#allocation23], %s5649_s4, %s5649_s4, %s5650_s30  }
  0x45   :  { %s271_s11 = sshll.u32 %s7339_s22, 4  ;;  %s5665_s23 = smov [#allocation27]   ;;  %s272_s11 = int_to_ptr.hbm [resolvable:$true] %s271_s11 }
  0x46   :  { %s258_s25 = sshll.u32 %s5665_s23, 4  ;;  %s5666_s1 = smov [#allocation28]   ;;  %s259_s25 = int_to_ptr.vmem [resolvable:$true] %s258_s25 }
  0x47   :  { %264 = dma.hbm_to_vmem [thread:$0]  %s257_s28, 512, %s259_s25, [#allocation26], %s5649_s4, %s5649_s4, %s5650_s30  }
  0x48   :  { %s273_s20 = sshll.u32 %s5666_s1, 4  ;;  %s274_s20 = int_to_ptr.vmem [resolvable:$true] %s273_s20 }
  0x49   :  { %279 = dma.hbm_to_vmem [thread:$0]  %s272_s11, 384, %s274_s20, [#allocation29], %s5649_s4, %s5649_s4, %s5650_s30  }
  0x4a   :  { %5627 = dma.done.wait [#allocation3], 512  }
  0x4b   :  { %5628 = vsyncadd [#allocation3], 4294966784 }
  0x4c   :  { %5629 = dma.done.wait [#allocation5], 640  }
  0x4d   :  { %5630 = vsyncadd [#allocation5], 4294966656 }
  0x4e   :  { %5631 = dma.done.wait [#allocation8], 768  }
  0x4f   :  { %5632 = vsyncadd [#allocation8], 4294966528 }
  0x50   :  { %5633 = dma.done.wait [#allocation11], 1024  }
  0x51   :  { %5634 = vsyncadd [#allocation11], 4294966272 }
  0x52   :  { %5635 = dma.done.wait [#allocation14], 1792  }
  0x53   :  { %5636 = vsyncadd [#allocation14], 4294965504 }
  0x54   :  { %5637 = dma.done.wait [#allocation17], 7168  }
  0x55   :  { %5638 = vsyncadd [#allocation17], 4294960128 }
  0x56   :  { %5639 = dma.done.wait [#allocation20], 1536  }
  0x57   :  { %5640 = vsyncadd [#allocation20], 4294965760 }
  0x58   :  { %5641 = dma.done.wait [#allocation23], 1536  }
  0x59   :  { %5642 = vsyncadd [#allocation23], 4294965760 }
  0x5a   :  { %5643 = dma.done.wait [#allocation26], 1024  }
  0x5b   :  { %5644 = vsyncadd [#allocation26], 4294966272 }
  0x5c   :  { %5645 = dma.done.wait [#allocation29], 384  }
  0x5d   :  { %5646 = vsyncadd [#allocation29], 4294966912  ;;  %v5667_v0 = vmov 16.0   ;;  %vm354_vm0 = vcmask 64512   ;;  %v471_v2 = vld [vmem:[#allocation4] sm:$0xff]  ;;  %s7359_s26 = sld [smem:[#allocation40_spill]] }
  0x5e   :  { %4909 = vrcp.f32 %v5667_v0  ;;  %503 = vmatpush.msra.mxu0 %v471_v2  ;;  %vm598_vm14 = vcmask 261120   ;;  %s5668_s13 = smov 32   ;;  %vm741_vm15 = vcmask 1041408   ;;  %s5671_s28 = smov 96  }
  0x5f   :  { %s5672_s18 = smov 112   ;;  %s5673_s24 = smov 64  }
  0x60   :  { %s5674_s11 = smov 120   ;;  %s5675_s23 = smov 104  }
  0x61   :  { %s5676_s25 = smov 24   ;;  %s5677_s1 = smov 16  }
  0x62   :  { %s7360_s29 = sld [smem:[#allocation48_spill]] }
  0x63   :  { %v352_v3 = vld [vmem:[%s7359_s26] sm:$0xff]  ;;  %v353_v4 = vld [vmem:[%s7359_s26 + $0x8] sm:$0xff]  ;;  %v4567_v8 = vld [vmem:[%s7359_s26 + $0x10] sm:$0xff] }
  0x64   :  { %v4910_v1 = vpop.eup %4909  ;;  %v355_v5 = vsel %vm354_vm0, %v352_v3, 0.0  ;;  %v356_v6 = vsel %vm354_vm0, %v353_v4, 0.0  ;;  %v4568_v9 = vld [vmem:[%s7359_s26 + $0x18] sm:$0xff]  ;;  %v418_v11 = vsel %vm354_vm0, %v4567_v8, 0.0 }
  0x65   :  { %v365_v7 = vmul.f32 16.0, %v4910_v1  ;;  %v357_v10 = vadd.f32 %v356_v6, %v355_v5  ;;  %v419_v12 = vsel %vm354_vm0, %v4568_v9, 0.0  ;;  %vm369_vm1 = vweird.f32 %v4910_v1 }
  0x66   :  { %v420_v14 = vadd.f32 %v419_v12, %v418_v11 }
  0x67   :  { %v366_v13 = vsub.f32 1.0, %v365_v7  ;;  %v358_v15 = vrot.slane %v357_v10, 4 }
  0x68   :  { %v421_v17 = vrot.slane %v420_v14, 4 }
  0x69   :  { %v367_v16 = vmul.f32 %v4910_v1, %v366_v13  ;;  %v359_v18 = vadd.f32 %v358_v15, %v357_v10 }
  0x6a   :  { %v422_v19 = vadd.f32 %v421_v17, %v420_v14 }
  0x6b   :  { %v360_v20 = vrot.slane %v359_v18, 2  ;;  %v368_v21 = vadd.f32 %v4910_v1, %v367_v16 }
  0x6c   :  { %v423_v22 = vrot.slane %v422_v19, 2 }
  0x6d   :  { %v361_v23 = vadd.f32 %v360_v20, %v359_v18  ;;  %v370_v26 = vsel %vm369_vm1, %v4910_v1, %v368_v21  ;;  %vm728_vm1 = vcmask 146432  }
  0x6e   :  { %v424_v24 = vadd.f32 %v423_v22, %v422_v19 }
  0x6f   :  { %v362_v25 = vrot.slane %v361_v23, 1 }
  0x70   :  { %v425_v27 = vrot.slane %v424_v24, 1 }
  0x71   :  { %v363_v28 = vadd.f32 %v362_v25, %v361_v23 }
  0x72   :  { %v426_v29 = vadd.f32 %v425_v27, %v424_v24  ;;  %v519_v27 = vld [vmem:[#allocation6 + $0x10] sm:$0xff] }
  0x73   :  { %v5920_v30 = vmul.f32 %v370_v26, %v363_v28 }
  0x74   :  { %v5922_v31 = vmul.f32 %v426_v29, %v370_v26  ;;  %v520_v26 = vld [vmem:[#allocation6 + $0x18] sm:$0xff] }
  0x75   :  { %v5925_v32 = vsub.f32 %v352_v3, %v5920_v30  ;;  %v5928_v33 = vsub.f32 %v353_v4, %v5920_v30  ;;  %623 = vmatpush.msra.mxu1 %v520_v26 }
  0x76   :  { %v5931_v34 = vsub.f32 %v4567_v8, %v5922_v31  ;;  %v5934_v35 = vsub.f32 %v4568_v9, %v5922_v31 }
  0x77   :  { %v374_v36 = vmul.f32 %v5925_v32, %v5925_v32  ;;  %v375_v37 = vmul.f32 %v5928_v33, %v5928_v33  ;;  %624 = vmatpush.msra.mxu1 %v519_v27 }
  0x78   :  { %v430_v38 = vmul.f32 %v5931_v34, %v5931_v34  ;;  %v431_v39 = vmul.f32 %v5934_v35, %v5934_v35 }
  0x79   :  { %v376_v40 = vsel %vm354_vm0, %v374_v36, 0.0  ;;  %v377_v41 = vsel %vm354_vm0, %v375_v37, 0.0 }
  0x7a   :  { %v378_v42 = vadd.f32 %v377_v41, %v376_v40  ;;  %v432_v43 = vsel %vm354_vm0, %v430_v38, 0.0  ;;  %v433_v44 = vsel %vm354_vm0, %v431_v39, 0.0 }
  0x7b   :  { %v434_v45 = vadd.f32 %v433_v44, %v432_v43 }
  0x7c   :  { %v379_v46 = vrot.slane %v378_v42, 4 }
  0x7d   :  { %v435_v47 = vrot.slane %v434_v45, 4 }
  0x7e   :  { %v380_v48 = vadd.f32 %v379_v46, %v378_v42 }
  0x7f   :  { %v436_v49 = vadd.f32 %v435_v47, %v434_v45 }
  0x80   :  { %v381_v50 = vrot.slane %v380_v48, 2 }
  0x81   :  { %v437_v51 = vrot.slane %v436_v49, 2 }
  0x82   :  { %v382_v52 = vadd.f32 %v381_v50, %v380_v48  ;;  %v517_v50 = vld [vmem:[#allocation6] sm:$0xff] }
  0x83   :  { %v438_v53 = vadd.f32 %v437_v51, %v436_v49  ;;  %v518_v49 = vld [vmem:[#allocation6 + $0x8] sm:$0xff]  ;;  %v472_v51 = vld [vmem:[#allocation2] sm:$0xff] }
  0x84   :  { %v383_v54 = vrot.slane %v382_v52, 1  ;;  %625 = vmatpush.msra.mxu1 %v518_v49  ;;  %v532_v49 = vld [vmem:[#allocation12 + $0x8] sm:$0xff] }
  0x85   :  { %v439_v55 = vrot.slane %v438_v53, 1 }
  0x86   :  { %v384_v56 = vadd.f32 %v383_v54, %v382_v52  ;;  %626 = vmatpush.msra.mxu1 %v517_v50  ;;  %v528_v50 = vld [vmem:[#allocation10 + $0x8] sm:$0xff] }
  0x87   :  { %v440_v57 = vadd.f32 %v439_v55, %v438_v53  ;;  %v473_v53 = vld [vmem:[#allocation2 + $0x8] sm:$0xff] }
  0x88   :  { %v385_v58 = vmul.f32 0.06666667, %v384_v56 }
  0x89   :  { %v441_v59 = vmul.f32 0.06666667, %v440_v57  ;;  %v475_v57 = vld [vmem:[#allocation2 + $0x18] sm:$0xff] }
  0x8a   :  { %v386_v60 = vadd.f32 1.0, %v385_v58 }
  0x8b   :  { %v442_v61 = vadd.f32 1.0, %v441_v59 }
  0x8c   :  { %4911 = vrsqrt.f32 %v386_v60  ;;  %vm394_vm2 = vcmp.eq.f32.partialorder %v386_v60, inf  ;;  %v397_v9 = vand.u32 2147483648, %v386_v60  ;;  %vm396_vm3 = vcmp.eq.f32.partialorder %v386_v60, 0.0 }
  0x8d   :  { %4913 = vrsqrt.f32 %v442_v61  ;;  %vm450_vm4 = vcmp.eq.f32.partialorder %v442_v61, inf  ;;  %v453_v13 = vand.u32 2147483648, %v442_v61  ;;  %vm452_vm5 = vcmp.eq.f32.partialorder %v442_v61, 0.0 }
  0x92   :  { %v4912_v62 = vpop.eup %4911 }
  0x93   :  { %v4914_v63 = vpop.eup %4913  ;;  %v388_v0 = vmul.f32 %v4912_v62, %v386_v60 }
  0x94   :  { %v444_v1 = vmul.f32 %v4914_v63, %v442_v61 }
  0x95   :  { %v389_v2 = vmul.f32 %v4912_v62, %v388_v0  ;;  %v521_v0 = vld [vmem:[#allocation7] sm:$0xff] }
  0x96   :  { %v445_v3 = vmul.f32 %v4914_v63, %v444_v1  ;;  %v524_v1 = vld [vmem:[#allocation9] sm:$0xff] }
  0x97   :  { %v390_v4 = vmul.f32 0.5, %v389_v2  ;;  %v522_v2 = vld [vmem:[#allocation7 + $0x8] sm:$0xff] }
  0x98   :  { %v446_v5 = vmul.f32 0.5, %v445_v3  ;;  %v525_v3 = vld [vmem:[#allocation9 + $0x8] sm:$0xff] }
  0x99   :  { %v391_v6 = vsub.f32 1.5, %v390_v4  ;;  %v523_v4 = vld [vmem:[#allocation7 + $0x10] sm:$0x3] }
  0x9a   :  { %v447_v7 = vsub.f32 1.5, %v446_v5  ;;  %v526_v5 = vld [vmem:[#allocation9 + $0x10] sm:$0x3] }
  0x9b   :  { %v392_v8 = vmul.f32 %v4912_v62, %v391_v6 }
  0x9c   :  { %v448_v10 = vmul.f32 %v4914_v63, %v447_v7 }
  0x9d   :  { %v393_v11 = vmul.f32 %v392_v8, %v386_v60 }
  0x9e   :  { %v449_v12 = vmul.f32 %v448_v10, %v442_v61  ;;  %v553_v10 = vld [vmem:[#allocation15 + $0x8] sm:$0xff] }
  0x9f   :  { %v395_v14 = vsel %vm394_vm2, %v386_v60, %v393_v11  ;;  %v556_v11 = vld [vmem:[%s7327_s10 + $0x8] sm:$0xff]  ;;  %vm916_vm2 = vcmask 523264  }
  0xa0   :  { %v5948_v15 = vsel %vm396_vm3, %v397_v9, %v395_v14  ;;  %v451_v16 = vsel %vm450_vm4, %v442_v61, %v449_v12  ;;  %v554_v12 = vld [vmem:[#allocation15 + $0x10] sm:$0x3]  ;;  %v552_v14 = vld [vmem:[#allocation15] sm:$0xff] }
  0xa1   :  { %4915 = vrcp.f32 %v5948_v15  ;;  %v5951_v17 = vsel %vm452_vm5, %v453_v13, %v451_v16  ;;  %vm404_vm6 = vweird.f32 %v5948_v15  ;;  %v410_v21 = vand.u32 2147483648, %v5948_v15  ;;  %v557_v13 = vld [vmem:[%s7327_s10 + $0x10] sm:$0x3]  ;;  %v555_v16 = vld [vmem:[%s7327_s10] sm:$0xff] }
  0xa2   :  { %4917 = vrcp.f32 %v5951_v17  ;;  %v408_v23 = vand.u32 2147483647, %v5948_v15  ;;  %vm460_vm10 = vweird.f32 %v5951_v17  ;;  %v466_v41 = vand.u32 2147483648, %v5951_v17 }
  0xa3   :  { %v411_v28 = vor.u32 1.1754944e-38, %v410_v21  ;;  %v464_v43 = vand.u32 2147483647, %v5951_v17 }
  0xa4   :  { %vm409_vm9 = vcmp.eq.f32.partialorder %v408_v23, 8.507059e+37  ;;  %v467_v45 = vor.u32 1.1754944e-38, %v466_v41 }
  0xa5   :  { %vm465_vm13 = vcmp.eq.f32.partialorder %v464_v43, 8.507059e+37 }
  0xa7   :  { %v4916_v18 = vpop.eup %4915 }
  0xa8   :  { %v400_v19 = vmul.f32 %v4916_v18, %v5948_v15  ;;  %v4918_v20 = vpop.eup %4917  ;;  %vm405_vm7 = vweird.f32 %v4916_v18 }
  0xa9   :  { %v456_v24 = vmul.f32 %v4918_v20, %v5951_v17  ;;  %vm406_vm8 = vmor %vm404_vm6, %vm405_vm7  ;;  %vm461_vm11 = vweird.f32 %v4918_v20  ;;  %vm1291_vm7 = vcmask 130048  }
  0xaa   :  { %v401_v22 = vsub.f32 1.0, %v400_v19  ;;  %vm462_vm12 = vmor %vm460_vm10, %vm461_vm11 }
  0xab   :  { %v457_v36 = vsub.f32 1.0, %v456_v24 }
  0xac   :  { %v402_v25 = vmul.f32 %v4916_v18, %v401_v22 }
  0xad   :  { %v458_v40 = vmul.f32 %v4918_v20, %v457_v36 }
  0xae   :  { %v403_v29 = vadd.f32 %v4916_v18, %v402_v25 }
  0xaf   :  { %v459_v42 = vadd.f32 %v4918_v20, %v458_v40 }
  0xb0   :  { %v407_v37 = vsel %vm406_vm8, %v4916_v18, %v403_v29  ;;  %vm1891_vm8 = vcmask 195584  }
  0xb1   :  { %v412_v38 = vsel %vm409_vm9, %v411_v28, %v407_v37  ;;  %v463_v46 = vsel %vm462_vm12, %v4918_v20, %v459_v42 }
  0xb2   :  { %v413_v39 = vmul.f32 %v412_v38, %v5925_v32  ;;  %v414_v44 = vmul.f32 %v412_v38, %v5928_v33  ;;  %v468_v32 = vsel %vm465_vm13, %v467_v45, %v463_v46  ;;  %v527_v45 = vld [vmem:[#allocation10] sm:$0xff]  ;;  %v573_v46 = vld [vmem:[#allocation16 + $0x78] sm:$0xff] }
  0xb3   :  { %v469_v47 = vmul.f32 %v468_v32, %v5931_v34  ;;  %v470_v48 = vmul.f32 %v468_v32, %v5934_v35  ;;  %v474_v35 = vld [vmem:[#allocation2 + $0x10] sm:$0xff]  ;;  %v572_v32 = vld [vmem:[#allocation16 + $0x70] sm:$0xff] }
  0xb4   :  { %4569 = vmatmul.msk.f32.vlgmr.msra.gmra.mxu0 %vm354_vm0, %v413_v39 }
  0xbc   :  { %4570 = vmatmul.msk.f32.gmra.mxu0 %vm354_vm0, %v414_v44  ;;  %v531_v44 = vld [vmem:[#allocation12] sm:$0xff] }
  0xc4   :  { %4571 = vmatmul.msk.f32.gmra.mxu0 %vm354_vm0, %v469_v47  ;;  %v571_v47 = vld [vmem:[#allocation16 + $0x68] sm:$0xff] }
  0xcc   :  { %4572 = vmatmul.msk.f32.gmra.mxu0 %vm354_vm0, %v470_v48  ;;  %v570_v48 = vld [vmem:[#allocation16 + $0x60] sm:$0xff] }
 0x131   :  { %v505_v33 = vpop.f32.mrf.mxu0 }
 0x132   :  { %v5970_v52 = vadd.f32 %v505_v33, %v472_v51  ;;  %v569_v51 = vld [vmem:[#allocation16 + $0x58] sm:$0xff]  ;;  %v568_v33 = vld [vmem:[#allocation16 + $0x50] sm:$0xff] }
 0x134   :  { %4573 = vmatmul.msk.f32.vlgmr.msra.gmra.mxu1 %vm598_vm14, %v5970_v52 }
 0x139   :  { %v508_v34 = vpop.f32.mrf.mxu0 }
 0x13a   :  { %v5974_v54 = vadd.f32 %v508_v34, %v473_v53  ;;  %v533_v53 = vld [vmem:[#allocation12 + $0x10] sm:$0xff] }
 0x13b   :  { %v529_v34 = vld [vmem:[#allocation10 + $0x10] sm:$0xff] }
 0x13c   :  { %820 = vrot.lane.b32.xlu1 %v5974_v54, %s5668_s13  ;;  %4574 = vmatmul.msk.f32.gmra.mxu1 %vm598_vm14, %v5974_v54 }
 0x141   :  { %v511_v55 = vpop.f32.mrf.mxu0 }
 0x142   :  { %v5980_v56 = vadd.f32 %v511_v55, %v474_v35  ;;  %v534_v35 = vld [vmem:[#allocation12 + $0x18] sm:$0xff] }
 0x143   :  { %v530_v55 = vld [vmem:[#allocation10 + $0x18] sm:$0xff] }
 0x144   :  { %818 = vrot.lane.b32.xlu1 %v5970_v52, %s5668_s13  ;;  %4575 = vmatmul.msk.f32.gmra.mxu1 %vm598_vm14, %v5980_v56 }
 0x149   :  { %v514_v58 = vpop.f32.mrf.mxu0 }
 0x14a   :  { %v5986_v59 = vadd.f32 %v514_v58, %v475_v57  ;;  %v567_v57 = vld [vmem:[#allocation16 + $0x48] sm:$0xff]  ;;  %v566_v58 = vld [vmem:[#allocation16 + $0x40] sm:$0xff] }
 0x14c   :  { %824 = vrot.lane.b32.xlu0 %v5986_v59, %s5668_s13  ;;  %4576 = vmatmul.msk.f32.gmra.mxu1 %vm598_vm14, %v5986_v59 }
 0x154   :  { %822 = vrot.lane.b32.xlu0 %v5980_v56, %s5668_s13 }
 0x1b1   :  { %v628_v60 = vpop.f32.mrf.mxu1 }
 0x1b9   :  { %v631_v61 = vpop.f32.mrf.mxu1 }
 0x1c1   :  { %v634_v62 = vpop.f32.mrf.mxu1 }
 0x1c9   :  { %v637_v63 = vpop.f32.mrf.mxu1 }
 0x1ca   :  { %661 = vmatpush.msra.mxu2 %v637_v63  ;;  %696 = vmatpush.msra.mxu3 %v637_v63 }
 0x1cc   :  { %662 = vmatpush.msra.mxu2 %v634_v62  ;;  %697 = vmatpush.msra.mxu3 %v634_v62 }
 0x1ce   :  { %663 = vmatpush.msra.mxu2 %v631_v61  ;;  %698 = vmatpush.msra.mxu3 %v631_v61 }
 0x1d0   :  { %664 = vmatpush.msra.mxu2 %v628_v60  ;;  %699 = vmatpush.msra.mxu3 %v628_v60  ;;  %v821_v60 = vpop.permute.xlu1 %820 }
 0x1d1   :  { %4577 = vmatmul.msk.f32.vlgmr.msra.gmra.mxu2 %vm598_vm14, %v521_v0  ;;  %4580 = vmatmul.msk.f32.vlgmr.msra.gmra.mxu3 %vm598_vm14, %v524_v1 }
 0x1d8   :  { %v819_v0 = vpop.permute.xlu1 %818 }
 0x1d9   :  { %4578 = vmatmul.msk.f32.gmra.mxu2 %vm598_vm14, %v522_v2  ;;  %4581 = vmatmul.msk.f32.gmra.mxu3 %vm598_vm14, %v525_v3  ;;  %v825_v2 = vpop.permute.xlu0 %824 }
 0x1e1   :  { %4579 = vmatmul.msk.f32.gmra.mxu2 %vm598_vm14, %v523_v4  ;;  %4582 = vmatmul.msk.f32.gmra.mxu3 %vm598_vm14, %v526_v5 }
 0x254   :  { %v666_v6 = vpop.f32.mrf.mxu2  ;;  %v701_v7 = vpop.f32.mrf.mxu3 }
 0x255   :  { %v719_v28 = vmul.f32 %v666_v6, %v555_v16  ;;  %v722_v29 = vmul.f32 %v701_v7, %v552_v14  ;;  %v710_v38 = vmul.f32 %v666_v6, %v552_v14  ;;  %v713_v39 = vmul.f32 %v701_v7, %v555_v16 }
 0x257   :  { %v725_v42 = vadd.f32 %v722_v29, %v719_v28  ;;  %v716_v43 = vsub.f32 %v710_v38, %v713_v39  ;;  %v563_v28 = vld [vmem:[#allocation16 + $0x28] sm:$0xff]  ;;  %v562_v29 = vld [vmem:[#allocation16 + $0x20] sm:$0xff]  ;;  %v580_v38 = vld [vmem:[#allocation16 + $0xb0] sm:$0xff] }
 0x258   :  { %v560_v39 = vld [vmem:[#allocation16 + $0x10] sm:$0xff] }
 0x25c   :  { %v669_v8 = vpop.f32.mrf.mxu2  ;;  %v704_v9 = vpop.f32.mrf.mxu3 }
 0x25d   :  { %v720_v20 = vmul.f32 %v669_v8, %v556_v11  ;;  %v723_v21 = vmul.f32 %v704_v9, %v553_v10  ;;  %v711_v22 = vmul.f32 %v669_v8, %v553_v10  ;;  %v714_v23 = vmul.f32 %v704_v9, %v556_v11  ;;  %v823_v10 = vpop.permute.xlu0 %822 }
 0x25f   :  { %v726_v40 = vadd.f32 %v723_v21, %v720_v20  ;;  %v717_v41 = vsub.f32 %v711_v22, %v714_v23  ;;  %v536_v20 = vld [vmem:[#allocation13 + $0x8] sm:$0xff]  ;;  %v537_v22 = vld [vmem:[#allocation13 + $0x10] sm:$0xff] }
 0x260   :  { %v541_v21 = vld [vmem:[#allocation13 + $0x28] sm:$0xff]  ;;  %v542_v23 = vld [vmem:[#allocation13 + $0x30] sm:$0xff] }
 0x264   :  { %v672_v18 = vpop.f32.mrf.mxu2  ;;  %v707_v19 = vpop.f32.mrf.mxu3 }
 0x265   :  { %v712_v24 = vmul.f32 %v672_v18, %v554_v12  ;;  %v721_v25 = vmul.f32 %v672_v18, %v557_v13  ;;  %v715_v26 = vmul.f32 %v707_v19, %v557_v13  ;;  %v724_v27 = vmul.f32 %v707_v19, %v554_v12  ;;  %v535_v18 = vld [vmem:[#allocation13] sm:$0xff] }
 0x266   :  { %v540_v19 = vld [vmem:[#allocation13 + $0x20] sm:$0xff] }
 0x267   :  { %v727_v36 = vadd.f32 %v724_v27, %v721_v25  ;;  %v718_v37 = vsub.f32 %v712_v24, %v715_v26  ;;  %v538_v24 = vld [vmem:[#allocation13 + $0x18] sm:$0xff]  ;;  %v565_v26 = vld [vmem:[#allocation16 + $0x38] sm:$0xff]  ;;  %v564_v27 = vld [vmem:[#allocation16 + $0x30] sm:$0xff] }
 0x268   :  { %v543_v25 = vld [vmem:[#allocation13 + $0x38] sm:$0xff] }
 0x269   :  { %4583 = vmatpush.msk.msrb.mxu2 %vm741_vm15, %v727_v36  ;;  %4588 = vmatpush.msk.msrb.mxu3 %vm741_vm15, %v718_v37  ;;  %v561_v36 = vld [vmem:[#allocation16 + $0x18] sm:$0xff] }
 0x26a   :  { %v581_v37 = vld [vmem:[#allocation16 + $0xb8] sm:$0xff] }
 0x26b   :  { %759 = vmatpush.msrb.mxu2 %v726_v40  ;;  %803 = vmatpush.msrb.mxu3 %v717_v41  ;;  %v579_v40 = vld [vmem:[#allocation16 + $0xa8] sm:$0xff] }
 0x26c   :  { %v559_v41 = vld [vmem:[#allocation16 + $0x8] sm:$0xff] }
 0x26d   :  { %760 = vmatpush.msrb.mxu2 %v725_v42  ;;  %804 = vmatpush.msrb.mxu3 %v716_v43  ;;  %v558_v42 = vld [vmem:[#allocation16] sm:$0xff] }
 0x26e   :  { %4584 = vmatmul.msk.f32.vlgmr.msrb.gmra.mxu2 %vm728_vm1, %v531_v44  ;;  %4589 = vmatmul.msk.f32.vlgmr.msrb.gmra.mxu3 %vm728_vm1, %v527_v45  ;;  %v578_v43 = vld [vmem:[#allocation16 + $0xa0] sm:$0xff]  ;;  %v577_v44 = vld [vmem:[#allocation16 + $0x98] sm:$0xff]  ;;  %v576_v45 = vld [vmem:[#allocation16 + $0x90] sm:$0xff] }
 0x26f   :  { %937 = vmatpush.msra.mxu2 %v573_v46  ;;  %978 = vmatpush.msra.mxu3 %v565_v26  ;;  %v575_v46 = vld [vmem:[#allocation16 + $0x88] sm:$0xff] }
 0x271   :  { %938 = vmatpush.msra.mxu2 %v572_v32  ;;  %979 = vmatpush.msra.mxu3 %v564_v27  ;;  %v574_v32 = vld [vmem:[#allocation16 + $0x80] sm:$0xff] }
 0x273   :  { %939 = vmatpush.msra.mxu2 %v571_v47  ;;  %980 = vmatpush.msra.mxu3 %v563_v28  ;;  %v5669_v47 = vmov 1  }
 0x274   :  { %4867 = vset.pattern.permute.xlu1 %v5669_v47 }
 0x275   :  { %940 = vmatpush.msra.mxu2 %v570_v48  ;;  %981 = vmatpush.msra.mxu3 %v562_v29  ;;  %v584_v48 = vld [vmem:[#allocation18 + $0x8] sm:$0xff] }
 0x276   :  { %4585 = vmatmul.msk.f32.gmra.mxu2 %vm728_vm1, %v532_v49  ;;  %4590 = vmatmul.msk.f32.gmra.mxu3 %vm728_vm1, %v528_v50  ;;  %v5670_v49 = vmov 0   ;;  %v583_v50 = vld [vmem:[#allocation18] sm:$0xff] }
 0x277   :  { %941 = vmatpush.msra.mxu2 %v569_v51  ;;  %982 = vmatpush.msra.mxu3 %v561_v36  ;;  %v585_v51 = vld [vmem:[#allocation18 + $0x10] sm:$0xff] }
 0x278   :  { %1080 = vperm.xlu1 %4867, %v584_v48   ;;  %4866 = vset.pattern.permute.xlu0 %v5670_v49 }
 0x279   :  { %942 = vmatpush.msra.mxu2 %v568_v33  ;;  %983 = vmatpush.msra.mxu3 %v560_v39 }
 0x27a   :  { %1058 = vperm.xlu0 %4866, %v584_v48   ;;  %4864 = vset.pattern.permute.xlu2 %v5670_v49 }
 0x27b   :  { %943 = vmatpush.msra.mxu2 %v567_v57  ;;  %984 = vmatpush.msra.mxu3 %v559_v41 }
 0x27c   :  { %1053 = vperm.xlu2 %4864, %v583_v50  }
 0x27d   :  { %944 = vmatpush.msra.mxu2 %v566_v58  ;;  %985 = vmatpush.msra.mxu3 %v558_v42 }
 0x27e   :  { %4586 = vmatmul.msk.f32.gmra.mxu2 %vm728_vm1, %v533_v53  ;;  %4591 = vmatmul.msk.f32.gmra.mxu3 %vm728_vm1, %v529_v34  ;;  %v586_v34 = vld [vmem:[#allocation18 + $0x18] sm:$0xff] }
 0x280   :  { %1084 = vperm.xlu1 %4867, %v585_v51  }
 0x282   :  { %4869 = vset.pattern.permute.xlu0 %v5669_v47 }
 0x283   :  { %1088 = vperm.xlu0 %4869, %v586_v34  }
 0x284   :  { %4865 = vset.pattern.permute.xlu2 %v5669_v47 }
 0x285   :  { %1076 = vperm.xlu2 %4865, %v583_v50  }
 0x286   :  { %4587 = vmatmul.msk.f32.gmra.mxu2 %vm728_vm1, %v534_v35  ;;  %4592 = vmatmul.msk.f32.gmra.mxu3 %vm728_vm1, %v530_v55 }
 0x28b   :  { %4885 = vset.pattern.permute.xlu0 %v5670_v49 }
 0x28d   :  { %4868 = vset.pattern.permute.xlu2 %v5670_v49 }
 0x28e   :  { %1063 = vperm.xlu2 %4868, %v585_v51  }
 0x296   :  { %1068 = vperm.xlu2 %4868, %v586_v34  }
 0x2f1   :  { %v762_v61 = vpop.f32.mrf.mxu2  ;;  %v806_v62 = vpop.f32.mrf.mxu3 }
 0x2f2   :  { %v807_v63 = vadd.f32 %v806_v62, %v762_v61  ;;  %v590_v62 = vld [vmem:[#allocation19 + $0x18] sm:$0xff] }
 0x2f4   :  { %v830_v1 = vsel %vm598_vm14, %v807_v63, %v819_v0  ;;  %v589_v63 = vld [vmem:[#allocation19 + $0x10] sm:$0xff]  ;;  %v588_v0 = vld [vmem:[#allocation19 + $0x8] sm:$0xff] }
 0x2f5   :  { %4601 = vmatmul.msk.f32.vlgmr.msra.gmra.mxu2 %vm916_vm2, %v830_v1 }
 0x2f9   :  { %v765_v3 = vpop.f32.mrf.mxu2  ;;  %v809_v4 = vpop.f32.mrf.mxu3 }
 0x2fa   :  { %v810_v5 = vadd.f32 %v809_v4, %v765_v3  ;;  %v1054_v4 = vpop.permute.xlu2 %1053 }
 0x2fc   :  { %v831_v6 = vsel %vm598_vm14, %v810_v5, %v821_v60 }
 0x2fd   :  { %4602 = vmatmul.msk.f32.gmra.mxu2 %vm916_vm2, %v831_v6 }
 0x301   :  { %v768_v7 = vpop.f32.mrf.mxu2  ;;  %v812_v8 = vpop.f32.mrf.mxu3 }
 0x302   :  { %v813_v9 = vadd.f32 %v812_v8, %v768_v7  ;;  %v4906_v7 = vld [vmem:[%s7329_s12] ss:$0 sm:$0xff] }
 0x304   :  { %v832_v11 = vsel %vm598_vm14, %v813_v9, %v823_v10 }
 0x305   :  { %4603 = vmatmul.msk.f32.gmra.mxu2 %vm916_vm2, %v832_v11 }
 0x309   :  { %v771_v12 = vpop.f32.mrf.mxu2  ;;  %v815_v13 = vpop.f32.mrf.mxu3 }
 0x30a   :  { %v816_v14 = vadd.f32 %v815_v13, %v771_v12  ;;  %v1077_v13 = vpop.permute.xlu2 %1076 }
 0x30c   :  { %v833_v16 = vsel %vm598_vm14, %v816_v14, %v825_v2 }
 0x30d   :  { %858 = vmatpush.msrb.mxu0 %v833_v16  ;;  %899 = vmatpush.msrb.mxu1 %v833_v16 }
 0x30e   :  { %4604 = vmatmul.msk.f32.gmra.mxu2 %vm916_vm2, %v833_v16 }
 0x30f   :  { %859 = vmatpush.msrb.mxu0 %v832_v11  ;;  %900 = vmatpush.msrb.mxu1 %v832_v11 }
 0x311   :  { %860 = vmatpush.msrb.mxu0 %v831_v6  ;;  %901 = vmatpush.msrb.mxu1 %v831_v6 }
 0x312   :  { %v1064_v39 = vpop.permute.xlu2 %1063 }
 0x313   :  { %861 = vmatpush.msrb.mxu0 %v830_v1  ;;  %902 = vmatpush.msrb.mxu1 %v830_v1  ;;  %v587_v1 = vld [vmem:[#allocation19] sm:$0xff] }
 0x314   :  { %4593 = vmatmul.msk.f32.vlgmr.msrb.gmra.mxu0 %vm598_vm14, %v535_v18  ;;  %4597 = vmatmul.msk.f32.vlgmr.msrb.gmra.mxu1 %vm598_vm14, %v540_v19 }
 0x315   :  { %1019 = vmatpush.msra.mxu0 %v581_v37  ;;  %1143 = vmatpush.msra.mxu1 %v590_v62 }
 0x317   :  { %1020 = vmatpush.msra.mxu0 %v580_v38  ;;  %1144 = vmatpush.msra.mxu1 %v589_v63 }
 0x319   :  { %1021 = vmatpush.msra.mxu0 %v579_v40  ;;  %1145 = vmatpush.msra.mxu1 %v588_v0 }
 0x31b   :  { %1022 = vmatpush.msra.mxu0 %v578_v43  ;;  %1146 = vmatpush.msra.mxu1 %v587_v1 }
 0x31c   :  { %4594 = vmatmul.msk.f32.gmra.mxu0 %vm598_vm14, %v536_v20  ;;  %4598 = vmatmul.msk.f32.gmra.mxu1 %vm598_vm14, %v541_v21  ;;  %v1059_v21 = vpop.permute.xlu0 %1058 }
 0x31d   :  { %1023 = vmatpush.msra.mxu0 %v577_v44 }
 0x31f   :  { %1024 = vmatpush.msra.mxu0 %v576_v45 }
 0x321   :  { %1025 = vmatpush.msra.mxu0 %v575_v46 }
 0x323   :  { %1026 = vmatpush.msra.mxu0 %v574_v32 }
 0x324   :  { %4595 = vmatmul.msk.f32.gmra.mxu0 %vm598_vm14, %v537_v22  ;;  %4599 = vmatmul.msk.f32.gmra.mxu1 %vm598_vm14, %v542_v23 }
 0x32c   :  { %4596 = vmatmul.msk.f32.gmra.mxu0 %vm598_vm14, %v538_v24  ;;  %4600 = vmatmul.msk.f32.gmra.mxu1 %vm598_vm14, %v543_v25  ;;  %v1081_v24 = vpop.permute.xlu1 %1080 }
 0x334   :  { %v1085_v45 = vpop.permute.xlu1 %1084 }
 0x378   :  { %v946_v2 = vpop.f32.mrf.mxu2 }
 0x380   :  { %v949_v8 = vpop.f32.mrf.mxu2 }
 0x388   :  { %v952_v22 = vpop.f32.mrf.mxu2 }
 0x391   :  { %v863_v33 = vpop.f32.mrf.mxu0  ;;  %v904_v53 = vpop.f32.mrf.mxu1 }
 0x392   :  { %4605 = vmatmul.msk.f32.vlgmr.msra.gmra.mxu3 %vm916_vm2, %v863_v33  ;;  %4609 = vmatmul.msk.f32.vlgmr.msra.gmra.mxu0 %vm916_vm2, %v904_v53  ;;  %v955_v44 = vpop.f32.mrf.mxu2 }
 0x399   :  { %v866_v35 = vpop.f32.mrf.mxu0  ;;  %v907_v55 = vpop.f32.mrf.mxu1 }
 0x39a   :  { %4606 = vmatmul.msk.f32.gmra.mxu3 %vm916_vm2, %v866_v35  ;;  %4610 = vmatmul.msk.f32.gmra.mxu0 %vm916_vm2, %v907_v55 }
 0x3a1   :  { %v869_v57 = vpop.f32.mrf.mxu0  ;;  %v910_v58 = vpop.f32.mrf.mxu1 }
 0x3a2   :  { %4607 = vmatmul.msk.f32.gmra.mxu3 %vm916_vm2, %v869_v57  ;;  %4611 = vmatmul.msk.f32.gmra.mxu0 %vm916_vm2, %v910_v58  ;;  %v1069_v58 = vpop.permute.xlu2 %1068 }
 0x3a9   :  { %v872_v60 = vpop.f32.mrf.mxu0  ;;  %v913_v61 = vpop.f32.mrf.mxu1 }
 0x3aa   :  { %4608 = vmatmul.msk.f32.gmra.mxu3 %vm916_vm2, %v872_v60  ;;  %4612 = vmatmul.msk.f32.gmra.mxu0 %vm916_vm2, %v913_v61  ;;  %v1089_v60 = vpop.permute.xlu0 %1088 }
 0x40f   :  { %v1028_v3 = vpop.f32.mrf.mxu0 }
 0x415   :  { %v987_v5 = vpop.f32.mrf.mxu3 }
 0x416   :  { %v988_v6 = vadd.f32 %v987_v5, %v946_v2 }
 0x417   :  { %v1031_v10 = vpop.f32.mrf.mxu0 }
 0x418   :  { %v1040_v9 = vadd.f32 %v1028_v3, %v988_v6 }
 0x41a   :  { %v1047_v11 = vadd.f32 %v4906_v7, %v1040_v9 }
 0x41c   :  { %v1071_v12 = vmul.f32 %v1054_v4, %v1047_v11 }
 0x41d   :  { %v990_v14 = vpop.f32.mrf.mxu3 }
 0x41e   :  { %v1091_v16 = vadd.f32 %v1077_v13, %v1071_v12  ;;  %v991_v18 = vadd.f32 %v990_v14, %v949_v8 }
 0x41f   :  { %v1034_v26 = vpop.f32.mrf.mxu0 }
 0x420   :  { %v1099_v19 = vmin.f32 %v1091_v16, 0.0  ;;  %v1041_v20 = vadd.f32 %v1031_v10, %v991_v18  ;;  %vm1095_vm3 = vcmp.gt.f32.partialorder %v1091_v16, 0.0  ;;  %v6084_v18 = vld [vmem:[#allocation21] sm:$0xff] }
 0x422   :  { %v1103_v23 = vmul.f32 1.442695, %v1099_v19  ;;  %v1048_v25 = vadd.f32 %v4906_v7, %v1041_v20  ;;  %v6091_v20 = vld [vmem:[#allocation21 + $0x8] sm:$0xff] }
 0x424   :  { %4919 = vpow2.f32 %v1103_v23  ;;  %v1072_v27 = vmul.f32 %v1059_v21, %v1048_v25 }
 0x425   :  { %v993_v28 = vpop.f32.mrf.mxu3 }
 0x426   :  { %v1092_v29 = vadd.f32 %v1081_v24, %v1072_v27  ;;  %v994_v36 = vadd.f32 %v993_v28, %v952_v22  ;;  %v6126_v28 = vld [vmem:[#allocation22 + $0x18] sm:$0xff] }
 0x427   :  { %v1037_v50 = vpop.f32.mrf.mxu0 }
 0x428   :  { %v1100_v37 = vmin.f32 %v1092_v29, 0.0  ;;  %v1042_v38 = vadd.f32 %v1034_v26, %v994_v36  ;;  %vm1096_vm4 = vcmp.gt.f32.partialorder %v1092_v29, 0.0 }
 0x42a   :  { %v4920_v40 = vpop.eup %4919  ;;  %v1049_v41 = vadd.f32 %v4906_v7, %v1042_v38  ;;  %v1105_v42 = vmul.f32 1.442695, %v1100_v37 }
 0x42b   :  { %v4613_v43 = vadd.f32 -1.0, %v4920_v40  ;;  %v6142_v40 = vld [vmem:[#allocation22] sm:$0xff] }
 0x42c   :  { %v1073_v46 = vmul.f32 %v1064_v39, %v1049_v41  ;;  %4921 = vpow2.f32 %v1105_v42  ;;  %v6138_v39 = vld [vmem:[#allocation22 + $0x8] sm:$0xff] }
 0x42d   :  { %v996_v32 = vpop.f32.mrf.mxu3  ;;  %v1115_v48 = vsel %vm1095_vm3, %v1091_v16, %v4613_v43 }
 0x42e   :  { %v997_v51 = vadd.f32 %v996_v32, %v955_v44  ;;  %4617 = vmatmul.msk.f32.vlgmr.msra.gmra.mxu1 %vm598_vm14, %v1115_v48  ;;  %v1093_v33 = vadd.f32 %v1085_v45, %v1073_v46  ;;  %v6153_v45 = vld [vmem:[#allocation24] sm:$0xff] }
 0x430   :  { %v1043_v53 = vadd.f32 %v1037_v50, %v997_v51  ;;  %v1101_v34 = vmin.f32 %v1093_v33, 0.0  ;;  %vm1097_vm5 = vcmp.gt.f32.partialorder %v1093_v33, 0.0 }
 0x432   :  { %v4922_v35 = vpop.eup %4921  ;;  %v1050_v55 = vadd.f32 %v4906_v7, %v1043_v53  ;;  %v1107_v57 = vmul.f32 1.442695, %v1101_v34  ;;  %v6161_v53 = vld [vmem:[#allocation24 + $0x8] sm:$0xff] }
 0x433   :  { %v4614_v61 = vadd.f32 -1.0, %v4922_v35 }
 0x434   :  { %v1074_v62 = vmul.f32 %v1069_v58, %v1050_v55  ;;  %4923 = vpow2.f32 %v1107_v57 }
 0x435   :  { %v1116_v63 = vsel %vm1096_vm4, %v1092_v29, %v4614_v61  ;;  %v6130_v29 = vld [vmem:[#allocation22 + $0x10] sm:$0xff] }
 0x436   :  { %v1094_v0 = vadd.f32 %v1089_v60, %v1074_v62  ;;  %4618 = vmatmul.msk.f32.gmra.mxu1 %vm598_vm14, %v1116_v63  ;;  %v6170_v61 = vld [vmem:[#allocation24 + $0x10] sm:$0xff] }
 0x438   :  { %v1102_v1 = vmin.f32 %v1094_v0, 0.0  ;;  %vm1098_vm6 = vcmp.gt.f32.partialorder %v1094_v0, 0.0 }
 0x43a   :  { %v4924_v2 = vpop.eup %4923  ;;  %v1109_v3 = vmul.f32 1.442695, %v1102_v1 }
 0x43b   :  { %v4615_v4 = vadd.f32 -1.0, %v4924_v2 }
 0x43c   :  { %4925 = vpow2.f32 %v1109_v3 }
 0x43d   :  { %v1117_v5 = vsel %vm1097_vm5, %v1093_v33, %v4615_v4  ;;  %v6178_v4 = vld [vmem:[#allocation24 + $0x18] sm:$0xff] }
 0x43e   :  { %4619 = vmatmul.msk.f32.gmra.mxu1 %vm598_vm14, %v1117_v5 }
 0x442   :  { %v4926_v6 = vpop.eup %4925 }
 0x443   :  { %v4616_v7 = vadd.f32 -1.0, %v4926_v6 }
 0x445   :  { %v1118_v8 = vsel %vm1098_vm6, %v1094_v0, %v4616_v7 }
 0x446   :  { %4620 = vmatmul.msk.f32.gmra.mxu1 %vm598_vm14, %v1118_v8 }
 0x4ab   :  { %v1148_v9 = vpop.f32.mrf.mxu1 }
 0x4b3   :  { %v1151_v10 = vpop.f32.mrf.mxu1 }
 0x4bb   :  { %v6057_v11 = vpop.f32.mrf.mxu1 }
 0x4bc   :  { %1168 = vrot.lane.b32.xlu2 %v6057_v11, %s5671_s28 }
 0x4c3   :  { %v6061_v12 = vpop.f32.mrf.mxu1 }
 0x4c4   :  { %1164 = vrot.lane.b32.xlu2 %v1148_v9, %s5671_s28  ;;  %1170 = vrot.lane.b32.xlu1 %v6061_v12, %s5671_s28 }
 0x4cc   :  { %1531 = vrot.lane.b32.xlu2 %v1148_v9, %s5672_s18  ;;  %1166 = vrot.lane.b32.xlu1 %v1151_v10, %s5671_s28 }
 0x4d4   :  { %1537 = vrot.lane.b32.xlu2 %v6061_v12, %s5672_s18 }
 0x4dc   :  { %1209 = vrot.lane.b32.xlu2 %v6057_v11, %s5673_s24 }
 0x4e4   :  { %1205 = vrot.lane.b32.xlu2 %v1148_v9, %s5673_s24 }
 0x4ec   :  { %1381 = vrot.lane.b32.xlu2 %v6057_v11, %s5674_s11 }
 0x516   :  { %v6075_v13 = vpop.permute.xlu2 %1168 }
 0x51e   :  { %v6086_v19 = vpop.permute.xlu2 %1164 }
 0x526   :  { %v1532_v23 = vpop.permute.xlu2 %1531 }
 0x52e   :  { %v1538_v25 = vpop.permute.xlu2 %1537 }
 0x536   :  { %v6077_v14 = vpop.permute.xlu1 %1170  ;;  %v6132_v36 = vpop.permute.xlu2 %1209 }
 0x537   :  { %1194 = vmatpush.msrb.mxu2 %v6077_v14 }
 0x539   :  { %1195 = vmatpush.msrb.mxu2 %v6075_v13 }
 0x53e   :  { %v6081_v16 = vpop.permute.xlu1 %1166  ;;  %v6150_v43 = vpop.permute.xlu2 %1205 }
 0x53f   :  { %1196 = vmatpush.msrb.mxu2 %v6081_v16 }
 0x541   :  { %1197 = vmatpush.msrb.mxu2 %v6086_v19 }
 0x542   :  { %4621 = vmatmul.msk.f32.vlgmr.msrb.gmra.mxu2 %vm598_vm14, %v6084_v18 }
 0x546   :  { %v1382_v63 = vpop.permute.xlu2 %1381 }
 0x54a   :  { %4622 = vmatmul.msk.f32.gmra.mxu2 %vm598_vm14, %v6091_v20 }
 0x5c5   :  { %v1199_v21 = vpop.f32.mrf.mxu2 }
 0x5c6   :  { %1691 = vrot.lane.b32.xlu2 %v1199_v21, %s5675_s23  ;;  %1539 = vrot.lane.b32.xlu1 %v1199_v21, %s5672_s18 }
 0x5cd   :  { %v1202_v22 = vpop.f32.mrf.mxu2 }
 0x5ce   :  { %1687 = vrot.lane.b32.xlu2 %v6057_v11, %s5675_s23  ;;  %1535 = vrot.lane.b32.xlu1 %v6057_v11, %s5672_s18 }
 0x5cf   :  { %1541 = vrot.lane.b32.xlu0 %v1202_v22, %s5672_s18  ;;  %4625 = vmatpush.xpose.msk.msrb.mxu0 %vm354_vm0, %v1202_v22 }
 0x5d3   :  { %4626 = vmatpush.xpose.msk.msrb.mxu0 %vm354_vm0, %v1199_v21 }
 0x5d6   :  { %4627 = vmatmul.msk.f32.vlgmr.msrb.gmra.mxu0 %vm354_vm0, %v1148_v9  ;;  %1211 = vrot.lane.b32.xlu1 %v6061_v12, %s5673_s24 }
 0x5d7   :  { %1533 = vrot.lane.b32.xlu0 %v1151_v10, %s5672_s18 }
 0x5de   :  { %4628 = vmatmul.msk.f32.gmra.mxu0 %vm354_vm0, %v1151_v10  ;;  %1207 = vrot.lane.b32.xlu1 %v1151_v10, %s5673_s24 }
 0x5df   :  { %1385 = vrot.lane.b32.xlu0 %v1199_v21, %s5674_s11 }
 0x5e6   :  { %4629 = vmatmul.msk.f32.gmra.mxu0 %vm354_vm0, %v6057_v11  ;;  %1379 = vrot.lane.b32.xlu1 %v1151_v10, %s5674_s11 }
 0x5e7   :  { %1387 = vrot.lane.b32.xlu0 %v1202_v22, %s5674_s11 }
 0x5ee   :  { %4630 = vmatmul.msk.f32.gmra.mxu0 %vm354_vm0, %v6061_v12  ;;  %1685 = vrot.lane.b32.xlu1 %v1151_v10, %s5675_s23 }
 0x5ef   :  { %1377 = vrot.lane.b32.xlu0 %v1148_v9, %s5674_s11 }
 0x5f6   :  { %1693 = vrot.lane.b32.xlu1 %v1202_v22, %s5675_s23 }
 0x5f7   :  { %1383 = vrot.lane.b32.xlu0 %v6061_v12, %s5674_s11 }
 0x5ff   :  { %1683 = vrot.lane.b32.xlu0 %v1148_v9, %s5675_s23 }
 0x607   :  { %1689 = vrot.lane.b32.xlu0 %v6061_v12, %s5675_s23 }
 0x620   :  { %v1692_v6 = vpop.permute.xlu2 %1691 }
 0x62b   :  { %1970 = vxpose.xlu1.b32.start [1/2] (short) (narrow) %v1148_v9, 32 }
 0x633   :  { %1971 = vxpose.xlu1.b32.end [2/2] (short) (narrow) %v1151_v10, 32 }
 0x638   :  { %v1540_v24 = vpop.permute.xlu1 %1539 }
 0x640   :  { %v1536_v26 = vpop.permute.xlu1 %1535 }
 0x641   :  { %v1542_v27 = vpop.permute.xlu0 %1541 }
 0x642   :  { %4645 = vmatpush.xpose.msk.msra.mxu0 %vm354_vm0, %v1542_v27 }
 0x646   :  { %4646 = vmatpush.xpose.msk.msra.mxu0 %vm354_vm0, %v1540_v24 }
 0x648   :  { %v6134_v37 = vpop.permute.xlu1 %1211 }
 0x649   :  { %v1534_v38 = vpop.permute.xlu0 %1533  ;;  %4647 = vmatmul.msk.f32.vlgmr.msra.gmra.mxu0 %vm354_vm0, %v1532_v23  ;;  %1229 = vmatpush.msrb.mxu3 %v6134_v37 }
 0x64a   :  { %1916 = vmatpush.msrb.mxu0 %v6126_v28 }
 0x64b   :  { %1230 = vmatpush.msrb.mxu3 %v6132_v36 }
 0x64c   :  { %1917 = vmatpush.msrb.mxu0 %v6130_v29 }
 0x64e   :  { %1918 = vmatpush.msrb.mxu0 %v6138_v39 }
 0x650   :  { %1919 = vmatpush.msrb.mxu0 %v6142_v40  ;;  %v6146_v41 = vpop.permute.xlu1 %1207 }
 0x651   :  { %v1386_v42 = vpop.permute.xlu0 %1385  ;;  %4648 = vmatmul.msk.f32.gmra.mxu0 %vm354_vm0, %v1534_v38  ;;  %1231 = vmatpush.msrb.mxu3 %v6146_v41 }
 0x653   :  { %v1271_v44 = vpop.f32.mrf.mxu0  ;;  %1232 = vmatpush.msrb.mxu3 %v6150_v43 }
 0x654   :  { %v1283_v46 = vmul.f32 0.35355338, %v1271_v44  ;;  %4623 = vmatmul.msk.f32.vlgmr.msrb.gmra.mxu3 %vm598_vm14, %v6084_v18  ;;  %v1688_v18 = vpop.permute.xlu2 %1687 }
 0x656   :  { %v1287_v32 = vadd.f32 %v1283_v46, %v6153_v45 }
 0x658   :  { %v1380_v48 = vpop.permute.xlu1 %1379  ;;  %v1292_v50 = vsel %vm1291_vm7, %v1287_v32, -inf }
 0x659   :  { %v1388_v51 = vpop.permute.xlu0 %1387  ;;  %4649 = vmatmul.msk.f32.gmra.mxu0 %vm354_vm0, %v1536_v26  ;;  %1293 = vmax.xlane.f32.xlu2 %v1292_v50 }
 0x65a   :  { %4635 = vmatpush.xpose.msk.msra.mxu2 %vm354_vm0, %v1388_v51 }
 0x65b   :  { %v1274_v33 = vpop.f32.mrf.mxu0 }
 0x65c   :  { %v1284_v34 = vmul.f32 0.35355338, %v1274_v33  ;;  %4624 = vmatmul.msk.f32.gmra.mxu3 %vm598_vm14, %v6091_v20 }
 0x65e   :  { %4636 = vmatpush.xpose.msk.msra.mxu2 %vm354_vm0, %v1386_v42  ;;  %v1288_v35 = vadd.f32 %v1284_v34, %v6161_v53 }
 0x660   :  { %v1686_v55 = vpop.permute.xlu1 %1685  ;;  %v1295_v57 = vsel %vm1291_vm7, %v1288_v35, -inf }
 0x661   :  { %v1378_v58 = vpop.permute.xlu0 %1377  ;;  %4650 = vmatmul.msk.f32.gmra.mxu0 %vm354_vm0, %v1538_v25  ;;  %1296 = vmax.xlane.f32.xlu0 %v1295_v57 }
 0x662   :  { %4637 = vmatmul.msk.f32.vlgmr.msra.gmra.mxu2 %vm354_vm0, %v1378_v58 }
 0x663   :  { %v1277_v60 = vpop.f32.mrf.mxu0 }
 0x664   :  { %v1285_v62 = vmul.f32 0.35355338, %v1277_v60 }
 0x666   :  { %v1289_v0 = vadd.f32 %v1285_v62, %v6170_v61 }
 0x668   :  { %v1694_v1 = vpop.permute.xlu1 %1693  ;;  %v1298_v2 = vsel %vm1291_vm7, %v1289_v0, -inf }
 0x669   :  { %4665 = vmatmul.msk.f32.vlgmr.msrb.gmra.mxu0 %vm598_vm14, %v6086_v19  ;;  %1299 = vmax.xlane.f32.xlu2 %v1298_v2  ;;  %v1384_v9 = vpop.permute.xlu0 %1383 }
 0x66a   :  { %4638 = vmatmul.msk.f32.gmra.mxu2 %vm354_vm0, %v1380_v48 }
 0x66b   :  { %4655 = vmatpush.xpose.msk.msrb.mxu2 %vm354_vm0, %v1694_v1  ;;  %v1280_v3 = vpop.f32.mrf.mxu0 }
 0x66c   :  { %v1286_v5 = vmul.f32 0.35355338, %v1280_v3 }
 0x66e   :  { %v1290_v7 = vadd.f32 %v1286_v5, %v6178_v4 }
 0x66f   :  { %4656 = vmatpush.xpose.msk.msrb.mxu2 %vm354_vm0, %v1692_v6 }
 0x670   :  { %v1301_v8 = vsel %vm1291_vm7, %v1290_v7, -inf }
 0x671   :  { %4666 = vmatmul.msk.f32.gmra.mxu0 %vm598_vm14, %v6081_v16  ;;  %1302 = vmax.xlane.f32.xlu2 %v1301_v8  ;;  %v1684_v10 = vpop.permute.xlu0 %1683 }
 0x672   :  { %4639 = vmatmul.msk.f32.gmra.mxu2 %vm354_vm0, %v1382_v63 }
 0x679   :  { %4667 = vmatmul.msk.f32.gmra.mxu0 %vm598_vm14, %v6075_v13  ;;  %v1690_v16 = vpop.permute.xlu0 %1689 }
 0x67a   :  { %4640 = vmatmul.msk.f32.gmra.mxu2 %vm354_vm0, %v1384_v9 }
 0x681   :  { %4668 = vmatmul.msk.f32.gmra.mxu0 %vm598_vm14, %v6077_v14 }
 0x682   :  { %4657 = vmatmul.msk.f32.vlgmr.msrb.gmra.mxu2 %vm354_vm0, %v1684_v10 }
 0x68a   :  { %4658 = vmatmul.msk.f32.gmra.mxu2 %vm354_vm0, %v1686_v55 }
 0x692   :  { %4659 = vmatmul.msk.f32.gmra.mxu2 %vm354_vm0, %v1688_v18 }
 0x69a   :  { %4660 = vmatmul.msk.f32.gmra.mxu2 %vm354_vm0, %v1690_v16 }
 0x6c6   :  { %v1572_v19 = vpop.f32.mrf.mxu0 }
 0x6c7   :  { %v1584_v20 = vmul.f32 0.35355338, %v1572_v19 }
 0x6c9   :  { %v6196_v13 = vadd.f32 %v1584_v20, %v6153_v45 }
 0x6cb   :  { %v1592_v21 = vsel %vm1291_vm7, %v6196_v13, -inf }
 0x6cc   :  { %v1294_v22 = vpop.xlane.xlu2 %1293  ;;  %1593 = vmax.xlane.f32.xlu0 %v1592_v21 }
 0x6cd   :  { %v1304_v14 = vsub.f32 %v1287_v32, %v1294_v22 }
 0x6ce   :  { %v1575_v23 = vpop.f32.mrf.mxu0 }
 0x6cf   :  { %v1308_v24 = vmul.f32 1.442695, %v1304_v14  ;;  %v1585_v25 = vmul.f32 0.35355338, %v1575_v23  ;;  %v1986_v16 = vpop.trf.xlu1 }
 0x6d1   :  { %4927 = vpow2.f32 %v1308_v24  ;;  %v6201_v26 = vadd.f32 %v1585_v25, %v6161_v53 }
 0x6d3   :  { %v1595_v27 = vsel %vm1291_vm7, %v6201_v26, -inf }
 0x6d4   :  { %v1297_v38 = vpop.xlane.xlu0 %1296  ;;  %1596 = vmax.xlane.f32.xlu2 %v1595_v27 }
 0x6d5   :  { %v1305_v42 = vsub.f32 %v1288_v35, %v1297_v38 }
 0x6d6   :  { %v1578_v44 = vpop.f32.mrf.mxu0 }
 0x6d7   :  { %v6205_v46 = vpop.eup %4927  ;;  %v1310_v48 = vmul.f32 1.442695, %v1305_v42  ;;  %v1586_v50 = vmul.f32 0.35355338, %v1578_v44  ;;  %v1987_v19 = vpop.trf.xlu1 }
 0x6d8   :  { %v1316_v32 = vsel %vm1291_vm7, %v6205_v46, 0.0 }
 0x6d9   :  { %1317 = vadd.xlane.f32.xlu1 %v1316_v32  ;;  %v6210_v51 = vadd.f32 %v1586_v50, %v6170_v61  ;;  %4929 = vpow2.f32 %v1310_v48 }
 0x6db   :  { %v1598_v33 = vsel %vm1291_vm7, %v6210_v51, -inf }
 0x6dc   :  { %v1300_v34 = vpop.xlane.xlu2 %1299  ;;  %1599 = vmax.xlane.f32.xlu0 %v1598_v33 }
 0x6dd   :  { %v1306_v55 = vsub.f32 %v1289_v0, %v1300_v34 }
 0x6de   :  { %v1581_v35 = vpop.f32.mrf.mxu0 }
 0x6df   :  { %v1312_v57 = vmul.f32 1.442695, %v1306_v55  ;;  %v1587_v58 = vmul.f32 0.35355338, %v1581_v35  ;;  %v6214_v60 = vpop.eup %4929  ;;  %v1988_v22 = vpop.trf.xlu1 }
 0x6e0   :  { %v1319_v63 = vsel %vm1291_vm7, %v6214_v60, 0.0 }
 0x6e1   :  { %v6217_v62 = vadd.f32 %v1587_v58, %v6178_v4  ;;  %4931 = vpow2.f32 %v1312_v57 }
 0x6e3   :  { %v1601_v1 = vsel %vm1291_vm7, %v6217_v62, -inf }
 0x6e4   :  { %1320 = vadd.xlane.f32.xlu0 %v1319_v63  ;;  %1602 = vmax.xlane.f32.xlu2 %v1601_v1  ;;  %v1303_v2 = vpop.xlane.xlu2 %1302 }
 0x6e5   :  { %v1307_v3 = vsub.f32 %v1290_v7, %v1303_v2  ;;  %v1234_v7 = vpop.f32.mrf.mxu3  ;;  %v1418_v23 = vpop.f32.mrf.mxu2 }
 0x6e6   :  { %v1921_v0 = vpop.f32.mrf.mxu0 }
 0x6e7   :  { %v1314_v5 = vmul.f32 1.442695, %v1307_v3  ;;  %v6223_v6 = vpop.eup %4931  ;;  %v1989_v14 = vpop.trf.xlu1 }
 0x6e8   :  { %v1322_v8 = vsel %vm1291_vm7, %v6223_v6, 0.0 }
 0x6e9   :  { %4933 = vpow2.f32 %v1314_v5 }
 0x6ec   :  { %1323 = vadd.xlane.f32.xlu2 %v1322_v8 }
 0x6ed   :  { %v1237_v20 = vpop.f32.mrf.mxu3  ;;  %v1421_v24 = vpop.f32.mrf.mxu2 }
 0x6ee   :  { %v1924_v9 = vpop.f32.mrf.mxu0  ;;  %v6233_v21 = vpack.i.bf16 %v1234_v7, %v1237_v20  ;;  %1362 = vmatpush.msrb.mxu1 %v1237_v20 }
 0x6ef   :  { %v6227_v10 = vpop.eup %4933  ;;  %2028 = vmatpush.msra.mxu2 %v1924_v9  ;;  %v1430_v9 = vmul.f32 0.35355338, %v1418_v23 }
 0x6f0   :  { %v1325_v18 = vsel %vm1291_vm7, %v6227_v10, 0.0  ;;  %1363 = vmatpush.msrb.mxu1 %v1234_v7 }
 0x6f1   :  { %2029 = vmatpush.msra.mxu2 %v1921_v0  ;;  %1326 = vadd.xlane.f32.xlu0 %v1325_v18 }
 0x6f2   :  { %4673 = vmatmul.msk.f32.vlgmr.msra.gmra.mxu2 %vm1291_vm7, %v1986_v16 }
 0x6f5   :  { %v1424_v38 = vpop.f32.mrf.mxu2 }
 0x6fa   :  { %4674 = vmatmul.msk.f32.gmra.mxu2 %vm1291_vm7, %v1987_v19  ;;  %v6259_v19 = vadd.f32 %v1430_v9, %v6153_v45 }
 0x6fc   :  { %v1438_v23 = vsel %vm1291_vm7, %v6259_v19, -inf }
 0x6fd   :  { %v1427_v34 = vpop.f32.mrf.mxu2 }
 0x702   :  { %4675 = vmatmul.msk.f32.gmra.mxu2 %vm1291_vm7, %v1988_v22  ;;  %v1431_v22 = vmul.f32 0.35355338, %v1421_v24  ;;  %v1432_v24 = vmul.f32 0.35355338, %v1424_v38 }
 0x705   :  { %4871 = vrot.lane.b32.xlu0 %v6233_v21, %s5672_s18  ;;  %v1724_v2 = vpop.f32.mrf.mxu2 }
 0x70a   :  { %4676 = vmatmul.msk.f32.gmra.mxu2 %vm1291_vm7, %v1989_v14 }
 0x70d   :  { %v1727_v20 = vpop.f32.mrf.mxu2 }
 0x70e   :  { %v1737_v14 = vmul.f32 0.35355338, %v1727_v20 }
 0x73f   :  { %v1594_v25 = vpop.xlane.xlu0 %1593 }
 0x740   :  { %v1604_v27 = vsub.f32 %v6196_v13, %v1594_v25 }
 0x742   :  { %v1608_v42 = vmul.f32 1.442695, %v1604_v27 }
 0x744   :  { %4935 = vpow2.f32 %v1608_v42 }
 0x747   :  { %v1597_v44 = vpop.xlane.xlu2 %1596 }
 0x748   :  { %v1605_v48 = vsub.f32 %v6201_v26, %v1597_v44  ;;  %v6270_v44 = vadd.f32 %v1431_v22, %v6161_v53 }
 0x74a   :  { %v6241_v50 = vpop.eup %4935  ;;  %v1610_v32 = vmul.f32 1.442695, %v1605_v48  ;;  %v6273_v48 = vadd.f32 %v1737_v14, %v6161_v53  ;;  %v1433_v53 = vmul.f32 0.35355338, %v1427_v34 }
 0x74b   :  { %v1616_v33 = vsel %vm1291_vm7, %v6241_v50, 0.0 }
 0x74c   :  { %4937 = vpow2.f32 %v1610_v32  ;;  %v1318_v55 = vpop.xlane.xlu1 %1317  ;;  %1617 = vadd.xlane.f32.xlu2 %v1616_v33  ;;  %v1441_v32 = vsel %vm1291_vm7, %v6270_v44, -inf  ;;  %v1747_v33 = vsel %vm1291_vm7, %v6273_v48, -inf }
 0x74d   :  { %4939 = vrcp.f32 %v1318_v55 }
 0x74f   :  { %v1600_v35 = vpop.xlane.xlu0 %1599 }
 0x750   :  { %v1606_v13 = vsub.f32 %v6210_v51, %v1600_v35  ;;  %v6282_v35 = vadd.f32 %v1432_v24, %v6170_v61 }
 0x752   :  { %v6246_v57 = vpop.eup %4937  ;;  %v1612_v58 = vmul.f32 1.442695, %v1606_v13  ;;  %v1444_v38 = vsel %vm1291_vm7, %v6282_v35, -inf  ;;  %v6288_v13 = vadd.f32 %v1433_v53, %v6178_v4 }
 0x753   :  { %v4940_v63 = vpop.eup %4939  ;;  %v1619_v26 = vsel %vm1291_vm7, %v6246_v57, 0.0 }
 0x754   :  { %v1332_v1 = vmul.f32 %v4940_v63, %v6205_v46  ;;  %4941 = vpow2.f32 %v1612_v58  ;;  %1620 = vadd.xlane.f32.xlu2 %v1619_v26  ;;  %v1736_v58 = vmul.f32 0.35355338, %v1724_v2  ;;  %v1447_v63 = vsel %vm1291_vm7, %v6288_v13, -inf  ;;  %v1730_v26 = vpop.f32.mrf.mxu2 }
 0x756   :  { %4631 = vmatmul.msk.f32.vlgmr.msrb.gmra.mxu1 %vm1291_vm7, %v1332_v1  ;;  %v1738_v1 = vmul.f32 0.35355338, %v1730_v26 }
 0x757   :  { %v1321_v3 = vpop.xlane.xlu0 %1320  ;;  %v1603_v0 = vpop.xlane.xlu2 %1602 }
 0x758   :  { %4943 = vrcp.f32 %v1321_v3  ;;  %v1607_v5 = vsub.f32 %v6217_v62, %v1603_v0  ;;  %v6298_v3 = vadd.f32 %v1738_v1, %v6170_v61 }
 0x75a   :  { %v6253_v51 = vpop.eup %4941  ;;  %v1614_v8 = vmul.f32 1.442695, %v1607_v5  ;;  %v1750_v0 = vsel %vm1291_vm7, %v6298_v3, -inf }
 0x75b   :  { %v1622_v18 = vsel %vm1291_vm7, %v6253_v51, 0.0 }
 0x75c   :  { %4945 = vpow2.f32 %v1614_v8  ;;  %1623 = vadd.xlane.f32.xlu2 %v1622_v18 }
 0x75e   :  { %v4944_v46 = vpop.eup %4943 }
 0x75f   :  { %v1324_v16 = vpop.xlane.xlu2 %1323  ;;  %v1333_v7 = vmul.f32 %v4944_v46, %v6214_v60  ;;  %v5161_v46 = vld [vmem:[#allocation6 + $0x18] sm:$0xff] }
 0x760   :  { %4947 = vrcp.f32 %v1324_v16  ;;  %v5162_v16 = vld [vmem:[#allocation6 + $0x10] sm:$0xff] }
 0x761   :  { %4632 = vmatmul.msk.f32.gmra.mxu1 %vm1291_vm7, %v1333_v7  ;;  %v5163_v7 = vld [vmem:[#allocation6 + $0x8] sm:$0xff] }
 0x762   :  { %v6262_v62 = vpop.eup %4945 }
 0x763   :  { %v1625_v25 = vsel %vm1291_vm7, %v6262_v62, 0.0 }
 0x764   :  { %v1327_v27 = vpop.xlane.xlu0 %1326  ;;  %1439 = vmax.xlane.f32.xlu2 %v1438_v23  ;;  %1626 = vadd.xlane.f32.xlu0 %v1625_v25 }
 0x765   :  { %4949 = vrcp.f32 %v1327_v27 }
 0x766   :  { %v4948_v60 = vpop.eup %4947 }
 0x767   :  { %v1334_v42 = vmul.f32 %v4948_v60, %v6223_v6 }
 0x769   :  { %4633 = vmatmul.msk.f32.gmra.mxu1 %vm1291_vm7, %v1334_v42  ;;  %v1733_v42 = vpop.f32.mrf.mxu2 }
 0x76b   :  { %v4950_v55 = vpop.eup %4949 }
 0x76c   :  { %1442 = vmax.xlane.f32.xlu2 %v1441_v32  ;;  %1748 = vmax.xlane.f32.xlu0 %v1747_v33  ;;  %v1335_v6 = vmul.f32 %v4950_v55, %v6227_v10  ;;  %v6293_v10 = vadd.f32 %v1736_v58, %v6153_v45 }
 0x76e   :  { %v1744_v34 = vsel %vm1291_vm7, %v6293_v10, -inf }
 0x771   :  { %4634 = vmatmul.msk.f32.gmra.mxu1 %vm1291_vm7, %v1335_v6 }
 0x774   :  { %1445 = vmax.xlane.f32.xlu2 %v1444_v38 }
 0x775   :  { %v2031_v26 = vpop.f32.mrf.mxu2 }
 0x777   :  { %v4872_v2 = vpop.permute.xlu0 %4871 }
 0x778   :  { %v4873_v5 = vunpack.i.l.bf16 %v4872_v2  ;;  %v4874_v8 = vunpack.i.h.bf16 %v4872_v2  ;;  %v2043_v2 = vmul.f32 0.25, %v2031_v26 }
 0x77a   :  { %1668 = vmatpush.msra.mxu1 %v4873_v5 }
 0x77c   :  { %1448 = vmax.xlane.f32.xlu2 %v1447_v63  ;;  %1669 = vmatpush.msra.mxu1 %v4874_v8  ;;  %v6344_v8 = vld [vmem:[#allocation25] sm:$0xff] }
 0x77e   :  { %1953 = vmatpush.msrb.mxu1 %v6126_v28 }
 0x780   :  { %1954 = vmatpush.msrb.mxu1 %v6130_v29 }
 0x782   :  { %1955 = vmatpush.msrb.mxu1 %v6138_v39 }
 0x784   :  { %1745 = vmax.xlane.f32.xlu2 %v1744_v34  ;;  %1956 = vmatpush.msrb.mxu1 %v6142_v40  ;;  %v5164_v40 = vld [vmem:[#allocation6] sm:$0xff] }
 0x78c   :  { %1751 = vmax.xlane.f32.xlu2 %v1750_v0 }
 0x7bf   :  { %v1618_v45 = vpop.xlane.xlu2 %1617 }
 0x7c0   :  { %4951 = vrcp.f32 %v1618_v45 }
 0x7c6   :  { %v4952_v61 = vpop.eup %4951 }
 0x7c7   :  { %v1632_v9 = vmul.f32 %v4952_v61, %v6241_v50  ;;  %v1621_v18 = vpop.xlane.xlu2 %1620  ;;  %v6349_v61 = vadd.f32 %v2043_v2, %v6344_v8 }
 0x7c8   :  { %4953 = vrcp.f32 %v1621_v18 }
 0x7c9   :  { %4651 = vmatmul.msk.f32.vlgmr.msra.gmra.mxu1 %vm1291_vm7, %v1632_v9 }
 0x7ca   :  { %2600 = vmatpush.msra.mxu1 %v5161_v46 }
 0x7cc   :  { %2601 = vmatpush.msra.mxu1 %v5162_v16 }
 0x7ce   :  { %v4954_v28 = vpop.eup %4953  ;;  %2602 = vmatpush.msra.mxu1 %v5163_v7 }
 0x7cf   :  { %v1624_v29 = vpop.xlane.xlu2 %1623  ;;  %v1633_v39 = vmul.f32 %v4954_v28, %v6246_v57  ;;  %v6358_v28 = vld [vmem:[#allocation25 + $0x8] sm:$0xff] }
 0x7d0   :  { %4955 = vrcp.f32 %v1624_v29  ;;  %2603 = vmatpush.msra.mxu1 %v5164_v40 }
 0x7d1   :  { %4652 = vmatmul.msk.f32.gmra.mxu1 %vm1291_vm7, %v1633_v39 }
 0x7d6   :  { %v4956_v50 = vpop.eup %4955 }
 0x7d7   :  { %v1627_v20 = vpop.xlane.xlu0 %1626  ;;  %v1440_v22 = vpop.xlane.xlu2 %1439  ;;  %v1634_v14 = vmul.f32 %v4956_v50, %v6253_v51  ;;  %v1739_v51 = vmul.f32 0.35355338, %v1733_v42  ;;  %v6371_v50 = vld [vmem:[#allocation25 + $0x10] sm:$0xff] }
 0x7d8   :  { %4957 = vrcp.f32 %v1627_v20  ;;  %v1450_v23 = vsub.f32 %v6259_v19, %v1440_v22 }
 0x7d9   :  { %4653 = vmatmul.msk.f32.gmra.mxu1 %vm1291_vm7, %v1634_v14  ;;  %v6321_v6 = vadd.f32 %v1739_v51, %v6178_v4 }
 0x7da   :  { %v1454_v25 = vmul.f32 1.442695, %v1450_v23 }
 0x7db   :  { %v1753_v38 = vsel %vm1291_vm7, %v6321_v6, -inf }
 0x7dc   :  { %4959 = vpow2.f32 %v1454_v25 }
 0x7de   :  { %v4958_v27 = vpop.eup %4957 }
 0x7df   :  { %v1443_v60 = vpop.xlane.xlu2 %1442  ;;  %v1635_v57 = vmul.f32 %v4958_v27, %v6262_v62  ;;  %v6377_v27 = vld [vmem:[#allocation25 + $0x18] sm:$0xff] }
 0x7e0   :  { %v1451_v24 = vsub.f32 %v6270_v44, %v1443_v60 }
 0x7e1   :  { %4654 = vmatmul.msk.f32.gmra.mxu1 %vm1291_vm7, %v1635_v57  ;;  %v1749_v57 = vpop.xlane.xlu0 %1748 }
 0x7e2   :  { %v6316_v32 = vpop.eup %4959  ;;  %v1456_v33 = vmul.f32 1.442695, %v1451_v24  ;;  %v1757_v24 = vsub.f32 %v6273_v48, %v1749_v57 }
 0x7e3   :  { %v1462_v19 = vsel %vm1291_vm7, %v6316_v32, 0.0 }
 0x7e4   :  { %1463 = vadd.xlane.f32.xlu2 %v1462_v19  ;;  %4961 = vpow2.f32 %v1456_v33  ;;  %v1762_v33 = vmul.f32 1.442695, %v1757_v24 }
 0x7e7   :  { %v1446_v55 = vpop.xlane.xlu2 %1445 }
 0x7e8   :  { %v1452_v62 = vsub.f32 %v6282_v35, %v1446_v55 }
 0x7e9   :  { %4669 = vmatmul.msk.f32.vlgmr.msrb.gmra.mxu1 %vm598_vm14, %v6150_v43 }
 0x7ea   :  { %v1458_v44 = vmul.f32 1.442695, %v1452_v62  ;;  %v6326_v53 = vpop.eup %4961 }
 0x7eb   :  { %v1465_v58 = vsel %vm1291_vm7, %v6326_v53, 0.0 }
 0x7ec   :  { %4963 = vpow2.f32 %v1458_v44  ;;  %1754 = vmax.xlane.f32.xlu2 %v1753_v38  ;;  %1466 = vadd.xlane.f32.xlu1 %v1465_v58 }
 0x7ef   :  { %v1449_v63 = vpop.xlane.xlu2 %1448 }
 0x7f0   :  { %v1453_v4 = vsub.f32 %v6288_v13, %v1449_v63 }
 0x7f1   :  { %4670 = vmatmul.msk.f32.gmra.mxu1 %vm598_vm14, %v6146_v41  ;;  %v2034_v41 = vpop.f32.mrf.mxu2 }
 0x7f2   :  { %v6335_v43 = vpop.eup %4963  ;;  %v1460_v35 = vmul.f32 1.442695, %v1453_v4  ;;  %v2044_v18 = vmul.f32 0.25, %v2034_v41 }
 0x7f3   :  { %v1468_v1 = vsel %vm1291_vm7, %v6335_v43, 0.0 }
 0x7f4   :  { %4965 = vpow2.f32 %v1460_v35  ;;  %1469 = vadd.xlane.f32.xlu1 %v1468_v1 }
 0x7f7   :  { %v1746_v34 = vpop.xlane.xlu2 %1745 }
 0x7f8   :  { %v1756_v0 = vsub.f32 %v6293_v10, %v1746_v34 }
 0x7f9   :  { %4671 = vmatmul.msk.f32.gmra.mxu1 %vm598_vm14, %v6132_v36  ;;  %v2051_v36 = vsel %vm598_vm14, %v6349_v61, -inf }
 0x7fa   :  { %v6342_v13 = vpop.eup %4965  ;;  %v1760_v5 = vmul.f32 1.442695, %v1756_v0 }
 0x7fb   :  { %v1471_v45 = vsel %vm1291_vm7, %v6342_v13, 0.0 }
 0x7fc   :  { %4967 = vpow2.f32 %v1760_v5  ;;  %1472 = vadd.xlane.f32.xlu0 %v1471_v45 }
 0x7ff   :  { %v1752_v9 = vpop.xlane.xlu2 %1751 }
 0x800   :  { %v1758_v10 = vsub.f32 %v6298_v3, %v1752_v9  ;;  %v2037_v3 = vpop.f32.mrf.mxu2 }
 0x801   :  { %4672 = vmatmul.msk.f32.gmra.mxu1 %vm598_vm14, %v6134_v37  ;;  %v6365_v37 = vadd.f32 %v2044_v18, %v6358_v28  ;;  %v2045_v39 = vmul.f32 0.25, %v2037_v3 }
 0x802   :  { %v6356_v46 = vpop.eup %4967  ;;  %v1764_v16 = vmul.f32 1.442695, %v1758_v10 }
 0x803   :  { %v1768_v7 = vsel %vm1291_vm7, %v6356_v46, 0.0  ;;  %v2054_v29 = vsel %vm598_vm14, %v6365_v37, -inf  ;;  %v2049_v22 = vadd.f32 %v2045_v39, %v6371_v50 }
 0x804   :  { %4969 = vpow2.f32 %v1764_v16  ;;  %4876 = vrot.lane.b32.xlu2 %v6233_v21, %s5674_s11  ;;  %2052 = vmax.xlane.f32.xlu0 %v2051_v36 }
 0x805   :  { %1769 = vadd.xlane.f32.xlu1 %v1768_v7  ;;  %v2057_v23 = vsel %vm598_vm14, %v2049_v22, -inf  ;;  %4971 = vpow2.f32 %v1762_v33 }
 0x808   :  { %v2040_v14 = vpop.f32.mrf.mxu2 }
 0x809   :  { %v2046_v25 = vmul.f32 0.25, %v2040_v14 }
 0x80a   :  { %v6369_v40 = vpop.eup %4969 }
 0x80b   :  { %v1774_v20 = vsel %vm1291_vm7, %v6369_v40, 0.0  ;;  %v2050_v60 = vadd.f32 %v2046_v25, %v6377_v27  ;;  %v6382_v51 = vpop.eup %4971 }
 0x80c   :  { %2055 = vmax.xlane.f32.xlu0 %v2054_v29  ;;  %v1771_v19 = vsel %vm1291_vm7, %v6382_v51, 0.0 }
 0x80d   :  { %1775 = vadd.xlane.f32.xlu1 %v1774_v20  ;;  %v2060_v42 = vsel %vm598_vm14, %v2050_v60, -inf }
 0x814   :  { %2058 = vmax.xlane.f32.xlu0 %v2057_v23 }
 0x81c   :  { %2061 = vmax.xlane.f32.xlu0 %v2060_v42 }
 0x82d   :  { %1772 = vadd.xlane.f32.xlu2 %v1771_v19 }
 0x830   :  { %4881 = vrot.lane.b32.xlu0 %v6233_v21, %s5675_s23 }
 0x856   :  { %2136 = vxpose.xlu2.b32.start [1/2] (short) (narrow) %v6057_v11, 32 }
 0x857   :  { %v1464_v55 = vpop.xlane.xlu2 %1463 }
 0x858   :  { %4973 = vrcp.f32 %v1464_v55 }
 0x85e   :  { %2137 = vxpose.xlu2.b32.end [2/2] (short) (narrow) %v6061_v12, 32  ;;  %v4974_v63 = vpop.eup %4973 }
 0x85f   :  { %v1755_v62 = vpop.xlane.xlu2 %1754  ;;  %v1467_v38 = vpop.xlane.xlu1 %1466  ;;  %v1478_v11 = vmul.f32 %v4974_v63, %v6316_v32 }
 0x860   :  { %v1759_v48 = vsub.f32 %v6321_v6, %v1755_v62 }
 0x862   :  { %v1766_v44 = vmul.f32 1.442695, %v1759_v48 }
 0x864   :  { %4975 = vpow2.f32 %v1766_v44 }
 0x865   :  { %4977 = vrcp.f32 %v1467_v38 }
 0x867   :  { %v4877_v58 = vpop.permute.xlu2 %4876  ;;  %v1470_v21 = vpop.xlane.xlu1 %1469 }
 0x868   :  { %v4878_v4 = vunpack.i.l.bf16 %v4877_v58  ;;  %v4879_v35 = vunpack.i.h.bf16 %v4877_v58  ;;  %4979 = vrcp.f32 %v1470_v21 }
 0x86a   :  { %v6391_v26 = vpop.eup %4975  ;;  %1516 = vmatpush.msra.mxu3 %v4878_v4 }
 0x86b   :  { %v1777_v12 = vsel %vm1291_vm7, %v6391_v26, 0.0  ;;  %v4978_v1 = vpop.eup %4977 }
 0x86c   :  { %1778 = vadd.xlane.f32.xlu1 %v1777_v12  ;;  %1517 = vmatpush.msra.mxu3 %v4879_v35  ;;  %v1479_v34 = vmul.f32 %v4978_v1, %v6326_v53 }
 0x86d   :  { %4641 = vmatmul.msk.f32.vlgmr.msra.gmra.mxu3 %vm1291_vm7, %v1478_v11 }
 0x86e   :  { %v4980_v2 = vpop.eup %4979 }
 0x86f   :  { %v1473_v6 = vpop.xlane.xlu0 %1472  ;;  %v1480_v32 = vmul.f32 %v4980_v2, %v6335_v43 }
 0x870   :  { %4981 = vrcp.f32 %v1473_v6 }
 0x875   :  { %4642 = vmatmul.msk.f32.gmra.mxu3 %vm1291_vm7, %v1479_v34 }
 0x876   :  { %v4982_v41 = vpop.eup %4981 }
 0x877   :  { %v2053_v0 = vpop.xlane.xlu0 %2052  ;;  %v1481_v45 = vmul.f32 %v4982_v41, %v6342_v13 }
 0x878   :  { %v2063_v39 = vsub.f32 %v6349_v61, %v2053_v0  ;;  %v1770_v20 = vpop.xlane.xlu1 %1769 }
 0x87a   :  { %v2067_v14 = vmul.f32 1.442695, %v2063_v39 }
 0x87d   :  { %4643 = vmatmul.msk.f32.gmra.mxu3 %vm1291_vm7, %v1480_v32 }
 0x87f   :  { %v2056_v5 = vpop.xlane.xlu0 %2055 }
 0x880   :  { %v2064_v7 = vsub.f32 %v6365_v37, %v2056_v5  ;;  %v1776_v19 = vpop.xlane.xlu1 %1775 }
 0x882   :  { %v2069_v29 = vmul.f32 1.442695, %v2064_v7 }
 0x885   :  { %4644 = vmatmul.msk.f32.gmra.mxu3 %vm1291_vm7, %v1481_v45 }
 0x887   :  { %v2059_v9 = vpop.xlane.xlu0 %2058 }
 0x888   :  { %v2065_v10 = vsub.f32 %v2049_v22, %v2059_v9 }
 0x88a   :  { %v2071_v36 = vmul.f32 1.442695, %v2065_v10  ;;  %v1927_v10 = vpop.f32.mrf.mxu0 }
 0x88c   :  { %4983 = vpow2.f32 %v2071_v36 }
 0x88f   :  { %v2062_v53 = vpop.xlane.xlu0 %2061 }
 0x890   :  { %v2066_v18 = vsub.f32 %v2050_v60, %v2062_v53 }
 0x892   :  { %v6403_v16 = vpop.eup %4983  ;;  %v2073_v3 = vmul.f32 1.442695, %v2066_v18 }
 0x893   :  { %v2081_v43 = vsel %vm598_vm14, %v6403_v16, 0.0 }
 0x894   :  { %4985 = vpow2.f32 %v2073_v3  ;;  %2082 = vadd.xlane.f32.xlu0 %v2081_v43 }
 0x895   :  { %4987 = vpow2.f32 %v2069_v29  ;;  %v1930_v29 = vpop.f32.mrf.mxu0 }
 0x896   :  { %4989 = vrcp.f32 %v1770_v20 }
 0x897   :  { %4991 = vpow2.f32 %v2067_v14 }
 0x89a   :  { %v4986_v13 = vpop.eup %4985 }
 0x89b   :  { %v2084_v22 = vsel %vm598_vm14, %v4986_v13, 0.0  ;;  %v4988_v23 = vpop.eup %4987 }
 0x89c   :  { %2085 = vadd.xlane.f32.xlu1 %v2084_v22  ;;  %v4990_v60 = vpop.eup %4989  ;;  %v2078_v42 = vsel %vm598_vm14, %v4988_v23, 0.0 }
 0x89d   :  { %v1784_v61 = vmul.f32 %v4990_v60, %v6356_v46  ;;  %v4992_v33 = vpop.eup %4991  ;;  %v6419_v46 = vpop.f32.mrf.mxu1 }
 0x89e   :  { %v2075_v62 = vsel %vm598_vm14, %v4992_v33, 0.0 }
 0x8a0   :  { %v1773_v37 = vpop.xlane.xlu2 %1772 }
 0x8a1   :  { %4993 = vrcp.f32 %v1773_v37 }
 0x8a2   :  { %v4882_v25 = vpop.permute.xlu0 %4881  ;;  %4995 = vrcp.f32 %v1776_v19 }
 0x8a3   :  { %v4883_v57 = vunpack.i.l.bf16 %v4882_v25  ;;  %v4884_v24 = vunpack.i.h.bf16 %v4882_v25 }
 0x8a4   :  { %2079 = vadd.xlane.f32.xlu1 %v2078_v42 }
 0x8a5   :  { %1820 = vmatpush.msrb.mxu3 %v4883_v57  ;;  %v6421_v63 = vpop.f32.mrf.mxu1 }
 0x8a7   :  { %1821 = vmatpush.msrb.mxu3 %v4884_v24  ;;  %v4994_v55 = vpop.eup %4993 }
 0x8a8   :  { %4661 = vmatmul.msk.f32.vlgmr.msrb.gmra.mxu3 %vm1291_vm7, %v1784_v61  ;;  %v1785_v48 = vmul.f32 %v4994_v55, %v6382_v51  ;;  %v4996_v44 = vpop.eup %4995 }
 0x8a9   :  { %v1786_v38 = vmul.f32 %v4996_v44, %v6369_v40 }
 0x8ac   :  { %2076 = vadd.xlane.f32.xlu1 %v2075_v62 }
 0x8ad   :  { %v6425_v51 = vpop.f32.mrf.mxu1 }
 0x8b0   :  { %4662 = vmatmul.msk.f32.gmra.mxu3 %vm1291_vm7, %v1785_v48 }
 0x8b5   :  { %v6427_v11 = vpop.f32.mrf.mxu1 }
 0x8b8   :  { %4663 = vmatmul.msk.f32.gmra.mxu3 %vm1291_vm7, %v1786_v38 }
 0x8bd   :  { %v6429_v40 = vpop.f32.mrf.mxu1 }
 0x8c0   :  { %4887 = vset.pattern.permute.xlu2 %v5669_v47 }
 0x8c5   :  { %v6433_v21 = vpop.f32.mrf.mxu1 }
 0x8cd   :  { %v6437_v0 = vpop.f32.mrf.mxu1 }
 0x8d5   :  { %v6444_v36 = vpop.f32.mrf.mxu1 }
 0x8df   :  { %v1779_v58 = vpop.xlane.xlu1 %1778 }
 0x8e0   :  { %4997 = vrcp.f32 %v1779_v58 }
 0x8e6   :  { %v4998_v4 = vpop.eup %4997 }
 0x8e7   :  { %v1787_v35 = vmul.f32 %v4998_v4, %v6391_v26 }
 0x8e9   :  { %4664 = vmatmul.msk.f32.gmra.mxu3 %vm1291_vm7, %v1787_v35 }
 0x8ef   :  { %v2152_v20 = vpop.trf.xlu2 }
 0x8f0   :  { %v6431_v12 = vpop.f32.mrf.mxu3 }
 0x8f7   :  { %v2153_v22 = vpop.trf.xlu2 }
 0x8f8   :  { %v6435_v6 = vpop.f32.mrf.mxu3 }
 0x8ff   :  { %v2154_v14 = vpop.trf.xlu2 }
 0x900   :  { %v6439_v41 = vpop.f32.mrf.mxu3 }
 0x907   :  { %v2083_v1 = vpop.xlane.xlu0 %2082 }
 0x908   :  { %v6447_v7 = vpop.f32.mrf.mxu3 }
 0x90f   :  { %v2086_v34 = vpop.xlane.xlu1 %2085 }
 0x910   :  { %4999 = vrcp.f32 %v2086_v34 }
 0x911   :  { %5001 = vrcp.f32 %v2083_v1 }
 0x916   :  { %v5000_v26 = vpop.eup %4999 }
 0x917   :  { %v2094_v2 = vmul.f32 %v5000_v26, %v4986_v13  ;;  %v2080_v32 = vpop.xlane.xlu1 %2079  ;;  %v5002_v5 = vpop.eup %5001 }
 0x918   :  { %5003 = vrcp.f32 %v2080_v32  ;;  %v2093_v45 = vmul.f32 %v5002_v5, %v6403_v16  ;;  %v1958_v13 = vpop.f32.mrf.mxu1 }
 0x919   :  { %4677 = vmatpush.xpose.msk.msra.mxu3 %vm598_vm14, %v2094_v2 }
 0x91d   :  { %4678 = vmatpush.xpose.msk.msra.mxu3 %vm598_vm14, %v2093_v45 }
 0x91e   :  { %v5004_v9 = vpop.eup %5003 }
 0x91f   :  { %v2077_v53 = vpop.xlane.xlu1 %2076  ;;  %v2092_v18 = vmul.f32 %v5004_v9, %v4988_v23  ;;  %v2155_v23 = vpop.trf.xlu2 }
 0x920   :  { %5005 = vrcp.f32 %v2077_v53  ;;  %v1961_v39 = vpop.f32.mrf.mxu1 }
 0x921   :  { %4679 = vmatpush.xpose.msk.msra.mxu3 %vm598_vm14, %v2092_v18 }
 0x926   :  { %v5006_v3 = vpop.eup %5005 }
 0x927   :  { %v2091_v43 = vmul.f32 %v5006_v3, %v4992_v33 }
 0x929   :  { %4680 = vmatpush.xpose.msk.msra.mxu3 %vm598_vm14, %v2091_v43 }
 0x92b   :  { %v1823_v16 = vpop.f32.mrf.mxu3 }
 0x92c   :  { %4681 = vmatmul.msk.f32.vlgmr.msra.gmra.mxu3 %vm598_vm14, %v1958_v13  ;;  %1871 = vrot.lane.b32.xlu2 %v1823_v16, %s5676_s25 }
 0x92d   :  { %2194 = vmatpush.msrb.mxu3 %v1930_v29 }
 0x92f   :  { %2195 = vmatpush.msrb.mxu3 %v1927_v10 }
 0x933   :  { %v1826_v37 = vpop.f32.mrf.mxu3 }
 0x934   :  { %4682 = vmatmul.msk.f32.gmra.mxu3 %vm598_vm14, %v1961_v39 }
 0x93b   :  { %v1829_v25 = vpop.f32.mrf.mxu3 }
 0x93c   :  { %4683 = vmatmul.msk.f32.vlgmr.msrb.gmra.mxu3 %vm1291_vm7, %v2152_v20 }
 0x944   :  { %4684 = vmatmul.msk.f32.gmra.mxu3 %vm1291_vm7, %v2153_v22 }
 0x94c   :  { %4685 = vmatmul.msk.f32.gmra.mxu3 %vm1291_vm7, %v2154_v14 }
 0x954   :  { %4686 = vmatmul.msk.f32.gmra.mxu3 %vm1291_vm7, %v2155_v23 }
 0x96c   :  { %v1832_v60 = vpop.f32.mrf.mxu3 }
 0x9af   :  { %v6457_v57 = vpop.f32.mrf.mxu3 }
 0x9b7   :  { %v6459_v42 = vpop.f32.mrf.mxu3 }
 0x9bf   :  { %v2197_v24 = vpop.f32.mrf.mxu3 }
 0x9c0   :  { %v2209_v61 = vmul.f32 0.25, %v2197_v24 }
 0x9c2   :  { %v2213_v33 = vadd.f32 %v2209_v61, %v6344_v8 }
 0x9c4   :  { %v2217_v19 = vsel %vm598_vm14, %v2213_v33, -inf }
 0x9c5   :  { %2218 = vmax.xlane.f32.xlu0 %v2217_v19  ;;  %v1964_v19 = vpop.f32.mrf.mxu1 }
 0x9c7   :  { %v2200_v55 = vpop.f32.mrf.mxu3 }
 0x9c8   :  { %v2210_v1 = vmul.f32 0.25, %v2200_v55 }
 0x9ca   :  { %v2214_v8 = vadd.f32 %v2210_v1, %v6358_v28 }
 0x9cc   :  { %v2220_v26 = vsel %vm598_vm14, %v2214_v8, -inf }
 0x9cf   :  { %v2203_v62 = vpop.f32.mrf.mxu3 }
 0x9d0   :  { %v2211_v48 = vmul.f32 0.25, %v2203_v62 }
 0x9d2   :  { %v2215_v44 = vadd.f32 %v2211_v48, %v6371_v50  ;;  %v1967_v48 = vpop.f32.mrf.mxu1 }
 0x9d4   :  { %v2223_v38 = vsel %vm598_vm14, %v2215_v44, -inf }
 0x9d5   :  { %2224 = vmax.xlane.f32.xlu1 %v2223_v38  ;;  %v1872_v38 = vpop.permute.xlu2 %1871 }
 0x9d7   :  { %v2206_v58 = vpop.f32.mrf.mxu3 }
 0x9d8   :  { %v2212_v4 = vmul.f32 0.25, %v2206_v58 }
 0x9da   :  { %v2216_v35 = vadd.f32 %v2212_v4, %v6377_v27 }
 0x9dc   :  { %v2226_v34 = vsel %vm598_vm14, %v2216_v35, -inf }
 0x9dd   :  { %2227 = vmax.xlane.f32.xlu1 %v2226_v34 }
 0x9e5   :  { %2221 = vmax.xlane.f32.xlu1 %v2220_v26 }
 0xa38   :  { %v2219_v2 = vpop.xlane.xlu0 %2218 }
 0xa39   :  { %v2229_v50 = vsub.f32 %v2213_v33, %v2219_v2 }
 0xa3b   :  { %v2233_v9 = vmul.f32 1.442695, %v2229_v50 }
 0xa48   :  { %v2225_v32 = vpop.xlane.xlu1 %2224 }
 0xa49   :  { %v2231_v5 = vsub.f32 %v2215_v44, %v2225_v32 }
 0xa4b   :  { %v2237_v45 = vmul.f32 1.442695, %v2231_v5 }
 0xa4d   :  { %5007 = vpow2.f32 %v2237_v45 }
 0xa4e   :  { %5009 = vpow2.f32 %v2233_v9 }
 0xa50   :  { %v2228_v10 = vpop.xlane.xlu1 %2227 }
 0xa51   :  { %v2232_v53 = vsub.f32 %v2216_v35, %v2228_v10 }
 0xa53   :  { %v5008_v18 = vpop.eup %5007  ;;  %v2239_v27 = vmul.f32 1.442695, %v2232_v53 }
 0xa54   :  { %v2247_v3 = vsel %vm598_vm14, %v5008_v18, 0.0  ;;  %v5010_v43 = vpop.eup %5009 }
 0xa55   :  { %5011 = vpow2.f32 %v2239_v27  ;;  %2248 = vadd.xlane.f32.xlu0 %v2247_v3  ;;  %v2241_v39 = vsel %vm598_vm14, %v5010_v43, 0.0 }
 0xa58   :  { %v2222_v28 = vpop.xlane.xlu1 %2221 }
 0xa59   :  { %v2230_v29 = vsub.f32 %v2214_v8, %v2222_v28 }
 0xa5b   :  { %v5012_v13 = vpop.eup %5011  ;;  %v2235_v16 = vmul.f32 1.442695, %v2230_v29  ;;  %v5678_v29 = vmov 32.0  }
 0xa5c   :  { %v2250_v20 = vsel %vm598_vm14, %v5012_v13, 0.0 }
 0xa5d   :  { %5013 = vpow2.f32 %v2235_v16  ;;  %2242 = vadd.xlane.f32.xlu0 %v2241_v39  ;;  %2251 = vadd.xlane.f32.xlu1 %v2250_v20 }
 0xa63   :  { %v5014_v22 = vpop.eup %5013 }
 0xa64   :  { %v2244_v14 = vsel %vm598_vm14, %v5014_v22, 0.0 }
 0xa65   :  { %2245 = vadd.xlane.f32.xlu1 %v2244_v14 }
 0xa71   :  { %1855 = vrot.lane.b32.xlu0 %v6429_v40, %s5677_s1  ;;  %v2411_v40 = vsel %vm598_vm14, %v6457_v57, 0.0 }
 0xa79   :  { %1841 = vrot.lane.b32.xlu0 %v6435_v6, %s5650_s30 }
 0xa7e   :  { %1839 = vrot.lane.b32.xlu1 %v6431_v12, %s5650_s30  ;;  %v2414_v12 = vsel %vm598_vm14, %v6459_v42, 0.0 }
 0xa81   :  { %1873 = vrot.lane.b32.xlu0 %v1826_v37, %s5676_s25 }
 0xa86   :  { %1857 = vrot.lane.b32.xlu1 %v6433_v21, %s5677_s1 }
 0xa89   :  { %1859 = vrot.lane.b32.xlu0 %v6437_v0, %s5677_s1 }
 0xa8e   :  { %1843 = vrot.lane.b32.xlu1 %v6439_v41, %s5650_s30 }
 0xa91   :  { %1845 = vrot.lane.b32.xlu0 %v6447_v7, %s5650_s30 }
 0xa96   :  { %1875 = vrot.lane.b32.xlu1 %v1829_v25, %s5676_s25 }
 0xa99   :  { %1877 = vrot.lane.b32.xlu0 %v1832_v60, %s5676_s25 }
 0xa9e   :  { %1861 = vrot.lane.b32.xlu1 %v6444_v36, %s5677_s1 }
 0xac3   :  { %2412 = vadd.xlane.f32.xlu0 %v2411_v40 }
 0xac8   :  { %v2249_v21 = vpop.xlane.xlu0 %2248 }
 0xacb   :  { %2415 = vadd.xlane.f32.xlu0 %v2414_v12 }
 0xad0   :  { %v2252_v6 = vpop.xlane.xlu1 %2251  ;;  %v2243_v7 = vpop.xlane.xlu0 %2242 }
 0xad1   :  { %5015 = vrcp.f32 %v2252_v6 }
 0xad2   :  { %5017 = vrcp.f32 %v2249_v21 }
 0xad7   :  { %v5016_v0 = vpop.eup %5015 }
 0xad8   :  { %v2246_v41 = vpop.xlane.xlu1 %2245  ;;  %v2260_v23 = vmul.f32 %v5016_v0, %v5012_v13  ;;  %v5018_v37 = vpop.eup %5017 }
 0xad9   :  { %5019 = vrcp.f32 %v2246_v41  ;;  %v2259_v36 = vmul.f32 %v5018_v37, %v5008_v18 }
 0xada   :  { %4687 = vmatpush.xpose.msk.msra.mxu0 %vm598_vm14, %v2260_v23  ;;  %5021 = vrcp.f32 %v2243_v7 }
 0xadb   :  { %5023 = vrcp.f32 %v5678_v29 }
 0xade   :  { %4688 = vmatpush.xpose.msk.msra.mxu0 %vm598_vm14, %v2259_v36 }
 0xadf   :  { %v5020_v25 = vpop.eup %5019 }
 0xae0   :  { %v2258_v60 = vmul.f32 %v5020_v25, %v5014_v22  ;;  %v5022_v24 = vpop.eup %5021 }
 0xae1   :  { %v2257_v33 = vmul.f32 %v5022_v24, %v5010_v43  ;;  %v5024_v13 = vpop.eup %5023 }
 0xae2   :  { %4689 = vmatpush.xpose.msk.msra.mxu0 %vm598_vm14, %v2258_v60  ;;  %v2315_v16 = vmul.f32 32.0, %v5024_v13  ;;  %vm2319_vm9 = vweird.f32 %v5024_v13 }
 0xae3   :  { %v1856_v61 = vpop.permute.xlu0 %1855 }
 0xae4   :  { %v2316_v39 = vsub.f32 1.0, %v2315_v16 }
 0xae6   :  { %4690 = vmatpush.xpose.msk.msra.mxu0 %vm598_vm14, %v2257_v33  ;;  %v2317_v22 = vmul.f32 %v5024_v13, %v2316_v39 }
 0xae8   :  { %v2318_v14 = vadd.f32 %v5024_v13, %v2317_v22 }
 0xae9   :  { %4691 = vmatmul.msk.f32.vlgmr.msra.gmra.mxu0 %vm598_vm14, %v1964_v19 }
 0xaeb   :  { %v1842_v55 = vpop.permute.xlu0 %1841 }
 0xaec   :  { %v1884_v34 = vsel %vm354_vm0, %v6421_v63, %v1842_v55 }
 0xaf0   :  { %v1840_v62 = vpop.permute.xlu1 %1839 }
 0xaf1   :  { %v1883_v44 = vsel %vm354_vm0, %v6419_v46, %v1840_v62  ;;  %4692 = vmatmul.msk.f32.gmra.mxu0 %vm598_vm14, %v1967_v48 }
 0xaf2   :  { %v1887_v58 = vsel %vm1291_vm7, %v1883_v44, %v1856_v61 }
 0xaf3   :  { %v1874_v4 = vpop.permute.xlu0 %1873  ;;  %v1892_v35 = vsel %vm1891_vm8, %v1887_v58, %v1872_v38 }
 0xaf4   :  { %v2302_v1 = vsel %vm598_vm14, %v1892_v35, 0.0 }
 0xaf5   :  { %2303 = vadd.xlane.f32.xlu1 %v2302_v1 }
 0xaf8   :  { %v1858_v8 = vpop.permute.xlu1 %1857 }
 0xaf9   :  { %v1888_v26 = vsel %vm1291_vm7, %v1884_v34, %v1858_v8 }
 0xafa   :  { %v1893_v2 = vsel %vm1891_vm8, %v1888_v26, %v1874_v4 }
 0xafb   :  { %v2305_v46 = vsel %vm598_vm14, %v1893_v2, 0.0  ;;  %v1860_v32 = vpop.permute.xlu0 %1859 }
 0xafd   :  { %2306 = vadd.xlane.f32.xlu1 %v2305_v46 }
 0xb00   :  { %v1844_v5 = vpop.permute.xlu1 %1843 }
 0xb01   :  { %v1885_v50 = vsel %vm354_vm0, %v6425_v51, %v1844_v5 }
 0xb02   :  { %v1889_v10 = vsel %vm1291_vm7, %v1885_v50, %v1860_v32 }
 0xb03   :  { %v1846_v45 = vpop.permute.xlu0 %1845 }
 0xb04   :  { %v1886_v18 = vsel %vm354_vm0, %v6427_v11, %v1846_v45  ;;  %v6522_v11 = vsel %vm2319_vm9, %v5024_v13, %v2318_v14 }
 0xb08   :  { %v1876_v9 = vpop.permute.xlu1 %1875 }
 0xb09   :  { %v1894_v53 = vsel %vm1891_vm8, %v1889_v10, %v1876_v9 }
 0xb0a   :  { %v2308_v63 = vsel %vm598_vm14, %v1894_v53, 0.0 }
 0xb0b   :  { %2309 = vadd.xlane.f32.xlu1 %v2308_v63  ;;  %v1878_v3 = vpop.permute.xlu0 %1877 }
 0xb10   :  { %v1862_v27 = vpop.permute.xlu1 %1861 }
 0xb11   :  { %v1890_v28 = vsel %vm1291_vm7, %v1886_v18, %v1862_v27 }
 0xb12   :  { %v1895_v43 = vsel %vm1891_vm8, %v1890_v28, %v1878_v3 }
 0xb13   :  { %v2311_v51 = vsel %vm598_vm14, %v1895_v43, 0.0 }
 0xb14   :  { %2312 = vadd.xlane.f32.xlu1 %v2311_v51 }
 0xb36   :  { %v2413_v20 = vpop.xlane.xlu0 %2412 }
 0xb37   :  { %v2423_v23 = vmul.f32 %v2413_v20, %v6522_v11 }
 0xb39   :  { %v6537_v24 = vsub.f32 %v6457_v57, %v2423_v23 }
 0xb3e   :  { %v2416_v12 = vpop.xlane.xlu0 %2415 }
 0xb3f   :  { %v2424_v41 = vmul.f32 %v2416_v12, %v6522_v11 }
 0xb41   :  { %v6533_v36 = vsub.f32 %v6459_v42, %v2424_v41  ;;  %v2431_v42 = vmul.f32 %v6537_v24, %v6537_v24 }
 0xb43   :  { %v2432_v62 = vmul.f32 %v6533_v36, %v6533_v36  ;;  %v2435_v38 = vsel %vm598_vm14, %v2431_v42, 0.0 }
 0xb45   :  { %v2438_v57 = vsel %vm598_vm14, %v2432_v62, 0.0  ;;  %v597_v62 = vld [vmem:[%s7334_s17] sm:$0xf] }
 0xb66   :  { %v2296_v40 = vpop.f32.mrf.mxu0 }
 0xb67   :  { %v2417_v21 = vsel %vm598_vm14, %v2296_v40, 0.0 }
 0xb68   :  { %v2304_v6 = vpop.xlane.xlu1 %2303  ;;  %2418 = vadd.xlane.f32.xlu0 %v2417_v21 }
 0xb69   :  { %v2321_v0 = vmul.f32 %v6522_v11, %v2304_v6 }
 0xb6b   :  { %v6527_v7 = vsub.f32 %v1892_v35, %v2321_v0 }
 0xb6d   :  { %v2329_v37 = vmul.f32 %v6527_v7, %v6527_v7 }
 0xb6e   :  { %v2299_v25 = vpop.f32.mrf.mxu0 }
 0xb6f   :  { %v2333_v60 = vsel %vm598_vm14, %v2329_v37, 0.0  ;;  %v2420_v61 = vsel %vm598_vm14, %v2299_v25, 0.0 }
 0xb70   :  { %2334 = vadd.xlane.f32.xlu1 %v2333_v60  ;;  %v2307_v33 = vpop.xlane.xlu1 %2306  ;;  %2421 = vadd.xlane.f32.xlu0 %v2420_v61 }
 0xb71   :  { %v2322_v19 = vmul.f32 %v6522_v11, %v2307_v33 }
 0xb73   :  { %v6541_v55 = vsub.f32 %v1893_v2, %v2322_v19 }
 0xb75   :  { %v2330_v48 = vmul.f32 %v6541_v55, %v6541_v55 }
 0xb77   :  { %v2336_v44 = vsel %vm598_vm14, %v2330_v48, 0.0 }
 0xb78   :  { %2439 = vadd.xlane.f32.xlu1 %v2438_v57  ;;  %2337 = vadd.xlane.f32.xlu2 %v2336_v44 }
 0xb79   :  { %2436 = vadd.xlane.f32.xlu0 %v2435_v38 }
 0xb7e   :  { %v2310_v58 = vpop.xlane.xlu1 %2309 }
 0xb7f   :  { %v2323_v4 = vmul.f32 %v6522_v11, %v2310_v58 }
 0xb81   :  { %v6553_v35 = vsub.f32 %v1894_v53, %v2323_v4 }
 0xb83   :  { %v2331_v1 = vmul.f32 %v6553_v35, %v6553_v35 }
 0xb85   :  { %v2339_v34 = vsel %vm598_vm14, %v2331_v1, 0.0 }
 0xb86   :  { %2340 = vadd.xlane.f32.xlu0 %v2339_v34  ;;  %v6584_v34 = vperm.slane %v597_v62, 0 }
 0xb87   :  { %v2313_v8 = vpop.xlane.xlu1 %2312 }
 0xb88   :  { %v2324_v26 = vmul.f32 %v6522_v11, %v2313_v8 }
 0xb8a   :  { %v6559_v2 = vsub.f32 %v1895_v43, %v2324_v26 }
 0xb8c   :  { %v2332_v46 = vmul.f32 %v6559_v2, %v6559_v2 }
 0xb8e   :  { %v2342_v32 = vsel %vm598_vm14, %v2332_v46, 0.0 }
 0xb8f   :  { %2343 = vadd.xlane.f32.xlu0 %v2342_v32 }
 0xbdb   :  { %v2419_v5 = vpop.xlane.xlu0 %2418 }
 0xbdc   :  { %v2425_v50 = vmul.f32 %v2419_v5, %v6522_v11 }
 0xbde   :  { %v6565_v45 = vsub.f32 %v2296_v40, %v2425_v50 }
 0xbe0   :  { %v2433_v9 = vmul.f32 %v6565_v45, %v6565_v45 }
 0xbe2   :  { %v2441_v10 = vsel %vm598_vm14, %v2433_v9, 0.0 }
 0xbe3   :  { %v2335_v53 = vpop.xlane.xlu1 %2334  ;;  %v2422_v63 = vpop.xlane.xlu0 %2421  ;;  %2442 = vadd.xlane.f32.xlu1 %v2441_v10 }
 0xbe4   :  { %v2345_v18 = vmul.f32 %v2335_v53, %v6522_v11  ;;  %v2426_v27 = vmul.f32 %v2422_v63, %v6522_v11  ;;  %v6587_v53 = vperm.slane %v597_v62, 1  ;;  %v6589_v63 = vperm.slane %v597_v62, 2 }
 0xbe6   :  { %v2349_v3 = vadd.f32 1e-05, %v2345_v18  ;;  %v6572_v28 = vsub.f32 %v2299_v25, %v2426_v27 }
 0xbe8   :  { %5025 = vrsqrt.f32 %v2349_v3  ;;  %v2434_v43 = vmul.f32 %v6572_v28, %v6572_v28  ;;  %vm2359_vm11 = vweird.f32 %v2349_v3 }
 0xbea   :  { %v2444_v51 = vsel %vm598_vm14, %v2434_v43, 0.0 }
 0xbeb   :  { %v2338_v29 = vpop.xlane.xlu2 %2337  ;;  %v2440_v13 = vpop.xlane.xlu1 %2439  ;;  %2445 = vadd.xlane.f32.xlu1 %v2444_v51 }
 0xbec   :  { %v2437_v16 = vpop.xlane.xlu0 %2436  ;;  %v2346_v39 = vmul.f32 %v2338_v29, %v6522_v11  ;;  %v2448_v20 = vmul.f32 %v2440_v13, %v6522_v11  ;;  %v6593_v13 = vperm.slane %v597_v62, 3 }
 0xbed   :  { %v2447_v22 = vmul.f32 %v2437_v16, %v6522_v11 }
 0xbee   :  { %v5026_v14 = vpop.eup %5025  ;;  %v2350_v40 = vadd.f32 1e-05, %v2346_v39  ;;  %v2452_v12 = vadd.f32 1e-05, %v2448_v20 }
 0xbef   :  { %v2354_v21 = vmul.f32 %v5026_v14, %v2349_v3  ;;  %v2451_v6 = vadd.f32 1e-05, %v2447_v22  ;;  %vm2360_vm10 = vweird.f32 %v5026_v14 }
 0xbf0   :  { %5027 = vrsqrt.f32 %v2350_v40  ;;  %vm2361_vm12 = vmor %vm2359_vm11, %vm2360_vm10  ;;  %vm2369_vm4 = vweird.f32 %v2350_v40  ;;  %vm2471_vm11 = vweird.f32 %v2452_v12 }
 0xbf1   :  { %v2355_v0 = vmul.f32 %v5026_v14, %v2354_v21  ;;  %5029 = vrsqrt.f32 %v2451_v6  ;;  %vm2461_vm6 = vweird.f32 %v2451_v6 }
 0xbf2   :  { %5031 = vrsqrt.f32 %v2452_v12 }
 0xbf3   :  { %v2356_v41 = vmul.f32 0.5, %v2355_v0 }
 0xbf5   :  { %v2357_v23 = vsub.f32 1.5, %v2356_v41 }
 0xbf6   :  { %v5028_v37 = vpop.eup %5027 }
 0xbf7   :  { %v5030_v25 = vpop.eup %5029  ;;  %v2358_v60 = vmul.f32 %v5026_v14, %v2357_v23  ;;  %v2364_v61 = vmul.f32 %v5028_v37, %v2350_v40  ;;  %vm2370_vm13 = vweird.f32 %v5028_v37 }
 0xbf8   :  { %v5032_v33 = vpop.eup %5031  ;;  %v2456_v19 = vmul.f32 %v5030_v25, %v2451_v6  ;;  %vm2462_vm3 = vweird.f32 %v5030_v25  ;;  %vm2371_vm9 = vmor %vm2369_vm4, %vm2370_vm13 }
 0xbf9   :  { %v2365_v42 = vmul.f32 %v5028_v37, %v2364_v61  ;;  %v2466_v48 = vmul.f32 %v5032_v33, %v2452_v12  ;;  %v2341_v57 = vpop.xlane.xlu0 %2340  ;;  %v2362_v44 = vsel %vm2361_vm12, %v5026_v14, %v2358_v60  ;;  %vm2472_vm5 = vweird.f32 %v5032_v33  ;;  %vm2463_vm10 = vmor %vm2461_vm6, %vm2462_vm3 }
 0xbfa   :  { %v2457_v38 = vmul.f32 %v5030_v25, %v2456_v19  ;;  %v2347_v58 = vmul.f32 %v2341_v57, %v6522_v11  ;;  %v2393_v46 = vmul.f32 %v2362_v44, %v6527_v7  ;;  %vm2473_vm12 = vmor %vm2471_vm11, %vm2472_vm5 }
 0xbfb   :  { %v2366_v4 = vmul.f32 0.5, %v2365_v42  ;;  %v2467_v1 = vmul.f32 %v5032_v33, %v2466_v48 }
 0xbfc   :  { %v2458_v8 = vmul.f32 0.5, %v2457_v38  ;;  %v2351_v26 = vadd.f32 1e-05, %v2347_v58  ;;  %v2398_v27 = vmul.f32 %v6584_v34, %v2393_v46 }
 0xbfd   :  { %v2367_v32 = vsub.f32 1.5, %v2366_v4  ;;  %v2468_v5 = vmul.f32 0.5, %v2467_v1 }
 0xbfe   :  { %v2459_v50 = vsub.f32 1.5, %v2458_v8  ;;  %5033 = vrsqrt.f32 %v2351_v26  ;;  %v2403_v21 = vadd.f32 %v6587_v53, %v2398_v27  ;;  %vm2379_vm3 = vweird.f32 %v2351_v26 }
 0xbff   :  { %v2368_v9 = vmul.f32 %v5028_v37, %v2367_v32  ;;  %v2469_v10 = vsub.f32 1.5, %v2468_v5 }
 0xc00   :  { %v2460_v18 = vmul.f32 %v5030_v25, %v2459_v50 }
 0xc01   :  { %v2372_v7 = vsel %vm2371_vm9, %v5028_v37, %v2368_v9  ;;  %v2470_v3 = vmul.f32 %v5032_v33, %v2469_v10 }
 0xc02   :  { %v2464_v43 = vsel %vm2463_vm10, %v5030_v25, %v2460_v18  ;;  %v2394_v51 = vmul.f32 %v2372_v7, %v6541_v55  ;;  %v2344_v29 = vpop.xlane.xlu0 %2343 }
 0xc03   :  { %v2495_v16 = vmul.f32 %v2464_v43, %v6537_v24  ;;  %v2474_v39 = vsel %vm2473_vm12, %v5032_v33, %v2470_v3  ;;  %v2348_v20 = vmul.f32 %v2344_v29, %v6522_v11 }
 0xc04   :  { %v5034_v22 = vpop.eup %5033  ;;  %v2496_v14 = vmul.f32 %v2474_v39, %v6533_v36  ;;  %v2399_v40 = vmul.f32 %v6584_v34, %v2394_v51  ;;  %v2407_v36 = vmul.f32 0.5, %v2403_v21 }
 0xc05   :  { %v2500_v12 = vmul.f32 %v6589_v63, %v2495_v16  ;;  %v2374_v6 = vmul.f32 %v5034_v22, %v2351_v26  ;;  %v2352_v55 = vadd.f32 1e-05, %v2348_v20  ;;  %vm2380_vm13 = vweird.f32 %v5034_v22 }
 0xc06   :  { %v2404_v0 = vadd.f32 %v6587_v53, %v2399_v40  ;;  %v2501_v41 = vmul.f32 %v6589_v63, %v2496_v14  ;;  %vm2381_vm4 = vmor %vm2379_vm3, %vm2380_vm13 }
 0xc07   :  { %v2505_v24 = vadd.f32 %v6593_v13, %v2500_v12  ;;  %v2375_v23 = vmul.f32 %v5034_v22, %v2374_v6  ;;  %5035 = vrsqrt.f32 %v2352_v55  ;;  %vm2389_vm6 = vweird.f32 %v2352_v55 }
 0xc08   :  { %v2408_v37 = vmul.f32 0.5, %v2404_v0  ;;  %v2506_v25 = vadd.f32 %v6593_v13, %v2501_v41 }
 0xc09   :  { %v2509_v60 = vmul.f32 0.5, %v2505_v24  ;;  %v2376_v61 = vmul.f32 0.5, %v2375_v23 }
 0xc0a   :  { %v2510_v33 = vmul.f32 0.5, %v2506_v25 }
 0xc0b   :  { %v2513_v19 = vadd.f32 %v2509_v60, %v2407_v36  ;;  %v2377_v62 = vsub.f32 1.5, %v2376_v61 }
 0xc0c   :  { %v2514_v42 = vadd.f32 %v2510_v33, %v2408_v37 }
 0xc0d   :  { %v5036_v48 = vpop.eup %5035  ;;  %v2378_v57 = vmul.f32 %v5034_v22, %v2377_v62  ;;  %v6606_v44 = vadd.f32 %v2513_v19, %v5970_v52  ;;  %v2557_v62 = vld [vmem:[#allocation18 + $0x20] sm:$0xff] }
 0xc0e   :  { %v2384_v38 = vmul.f32 %v5036_v48, %v2352_v55  ;;  %v6609_v58 = vadd.f32 %v2514_v42, %v5974_v54  ;;  %vm2390_vm5 = vweird.f32 %v5036_v48 }
 0xc0f   :  { %v2382_v4 = vsel %vm2381_vm4, %v5034_v22, %v2378_v57  ;;  %4698 = vmatmul.msk.f32.vlgmr.msra.gmra.mxu1 %vm598_vm14, %v6606_v44  ;;  %vm2391_vm9 = vmor %vm2389_vm6, %vm2390_vm5  ;;  %v5167_v57 = vld [vmem:[#allocation7 + $0x8] sm:$0xff] }
 0xc10   :  { %v2395_v1 = vmul.f32 %v2382_v4, %v6553_v35  ;;  %v2385_v8 = vmul.f32 %v5036_v48, %v2384_v38  ;;  %2753 = vrot.lane.b32.xlu2 %v6609_v58, %s5668_s13  ;;  %v5168_v38 = vld [vmem:[#allocation9 + $0x8] sm:$0xff]  ;;  %v5169_v4 = vld [vmem:[#allocation7 + $0x10] sm:$0x3] }
 0xc12   :  { %v2386_v46 = vmul.f32 0.5, %v2385_v8  ;;  %v2400_v26 = vmul.f32 %v6584_v34, %v2395_v1  ;;  %v5170_v1 = vld [vmem:[#allocation9 + $0x10] sm:$0x3] }
 0xc14   :  { %v2387_v52 = vsub.f32 1.5, %v2386_v46  ;;  %v2405_v32 = vadd.f32 %v6587_v53, %v2400_v26 }
 0xc16   :  { %v2388_v5 = vmul.f32 %v5036_v48, %v2387_v52  ;;  %v2409_v41 = vmul.f32 0.5, %v2405_v32  ;;  %v2524_v32 = vld [vmem:[#allocation15 + $0x28] sm:$0x3] }
 0xc17   :  { %4699 = vmatmul.msk.f32.gmra.mxu1 %vm598_vm14, %v6609_v58 }
 0xc18   :  { %v2392_v54 = vsel %vm2391_vm9, %v5036_v48, %v2388_v5  ;;  %v5166_v48 = vld [vmem:[#allocation9] sm:$0xff]  ;;  %v4695_v5 = vld [vmem:[%s7327_s10 + $0x28] sm:$0x3] }
 0xc19   :  { %v2396_v35 = vmul.f32 %v2392_v54, %v6559_v2 }
 0xc1b   :  { %v2401_v50 = vmul.f32 %v6584_v34, %v2396_v35  ;;  %v2523_v35 = vld [vmem:[#allocation15 + $0x20] sm:$0xff] }
 0xc1d   :  { %v2406_v9 = vadd.f32 %v6587_v53, %v2401_v50  ;;  %v4694_v50 = vld [vmem:[%s7327_s10 + $0x20] sm:$0xff] }
 0xc1f   :  { %v2410_v61 = vmul.f32 0.5, %v2406_v9  ;;  %v2522_v9 = vld [vmem:[#allocation15 + $0x18] sm:$0xff] }
 0xc56   :  { %v2443_v10 = vpop.xlane.xlu1 %2442 }
 0xc57   :  { %v2449_v18 = vmul.f32 %v2443_v10, %v6522_v11  ;;  %v4693_v10 = vld [vmem:[%s7327_s10 + $0x18] sm:$0xff] }
 0xc59   :  { %v2453_v27 = vadd.f32 1e-05, %v2449_v18 }
 0xc5b   :  { %5037 = vrsqrt.f32 %v2453_v27  ;;  %vm2481_vm11 = vweird.f32 %v2453_v27 }
 0xc5e   :  { %v2446_v7 = vpop.xlane.xlu1 %2445 }
 0xc5f   :  { %v2450_v3 = vmul.f32 %v2446_v7, %v6522_v11 }
 0xc61   :  { %v5038_v43 = vpop.eup %5037  ;;  %v2454_v51 = vadd.f32 1e-05, %v2450_v3 }
 0xc62   :  { %v2476_v29 = vmul.f32 %v5038_v43, %v2453_v27  ;;  %vm2482_vm10 = vweird.f32 %v5038_v43 }
 0xc63   :  { %5039 = vrsqrt.f32 %v2454_v51  ;;  %vm2483_vm12 = vmor %vm2481_vm11, %vm2482_vm10  ;;  %vm2491_vm3 = vweird.f32 %v2454_v51 }
 0xc64   :  { %v2477_v16 = vmul.f32 %v5038_v43, %v2476_v29 }
 0xc66   :  { %v2478_v39 = vmul.f32 0.5, %v2477_v16 }
 0xc68   :  { %v2479_v20 = vsub.f32 1.5, %v2478_v39 }
 0xc69   :  { %v5040_v2 = vpop.eup %5039 }
 0xc6a   :  { %v2480_v34 = vmul.f32 %v5038_v43, %v2479_v20  ;;  %v2486_v53 = vmul.f32 %v5040_v2, %v2454_v51  ;;  %vm2492_vm13 = vweird.f32 %v5040_v2 }
 0xc6b   :  { %vm2493_vm4 = vmor %vm2491_vm3, %vm2492_vm13 }
 0xc6c   :  { %v2484_v22 = vsel %vm2483_vm12, %v5038_v43, %v2480_v34  ;;  %v2487_v14 = vmul.f32 %v5040_v2, %v2486_v53 }
 0xc6d   :  { %v2497_v40 = vmul.f32 %v2484_v22, %v6565_v45 }
 0xc6e   :  { %v2488_v21 = vmul.f32 0.5, %v2487_v14 }
 0xc6f   :  { %v2502_v12 = vmul.f32 %v6589_v63, %v2497_v40 }
 0xc70   :  { %v2489_v6 = vsub.f32 1.5, %v2488_v21 }
 0xc71   :  { %v2507_v55 = vadd.f32 %v6593_v13, %v2502_v12 }
 0xc72   :  { %v2490_v0 = vmul.f32 %v5040_v2, %v2489_v6 }
 0xc73   :  { %v2511_v24 = vmul.f32 0.5, %v2507_v55  ;;  %v2545_v55 = vld [vmem:[#allocation16 + $0x138] sm:$0xff] }
 0xc74   :  { %v2494_v23 = vsel %vm2493_vm4, %v5040_v2, %v2490_v0  ;;  %v5171_v0 = vld [vmem:[#allocation12] sm:$0xff] }
 0xc75   :  { %v2498_v37 = vmul.f32 %v2494_v23, %v6572_v28  ;;  %v2515_v25 = vadd.f32 %v2511_v24, %v2409_v41  ;;  %v5172_v41 = vld [vmem:[#allocation10] sm:$0xff]  ;;  %v2543_v23 = vld [vmem:[#allocation16 + $0x128] sm:$0xff] }
 0xc76   :  { %v2544_v24 = vld [vmem:[#allocation16 + $0x130] sm:$0xff] }
 0xc77   :  { %v6630_v36 = vadd.f32 %v2515_v25, %v5980_v56  ;;  %v2503_v45 = vmul.f32 %v6589_v63, %v2498_v37  ;;  %v2542_v37 = vld [vmem:[#allocation16 + $0x120] sm:$0xff]  ;;  %v2541_v25 = vld [vmem:[#allocation16 + $0x118] sm:$0xff] }
 0xc79   :  { %2755 = vrot.lane.b32.xlu1 %v6630_v36, %s5668_s13  ;;  %4700 = vmatmul.msk.f32.gmra.mxu1 %vm598_vm14, %v6630_v36  ;;  %v2508_v60 = vadd.f32 %v6593_v13, %v2503_v45  ;;  %v5173_v45 = vld [vmem:[#allocation12 + $0x8] sm:$0xff] }
 0xc7b   :  { %v2512_v33 = vmul.f32 0.5, %v2508_v60  ;;  %v5174_v60 = vld [vmem:[#allocation10 + $0x8] sm:$0xff] }
 0xc7d   :  { %v2516_v19 = vadd.f32 %v2512_v33, %v2410_v61  ;;  %v2540_v61 = vld [vmem:[#allocation16 + $0x110] sm:$0xff]  ;;  %v5175_v33 = vld [vmem:[#allocation12 + $0x10] sm:$0xff] }
 0xc7f   :  { %v6639_v28 = vadd.f32 %v2516_v19, %v5986_v59  ;;  %v5165_v59 = vld [vmem:[#allocation7] sm:$0xff] }
 0xc80   :  { %v5176_v19 = vld [vmem:[#allocation10 + $0x10] sm:$0xff] }
 0xc81   :  { %2984 = vperm.xlu1 %4867, %v2557_v62   ;;  %2757 = vrot.lane.b32.xlu0 %v6639_v28, %s5668_s13 }
 0xc82   :  { %4701 = vmatmul.msk.f32.gmra.mxu1 %vm598_vm14, %v6639_v28 }
 0xc89   :  { %2751 = vrot.lane.b32.xlu0 %v6606_v44, %s5668_s13  ;;  %4886 = vset.pattern.permute.xlu1 %v5670_v49 }
 0xc8c   :  { %v2605_v56 = vpop.f32.mrf.mxu1 }
 0xc91   :  { %2961 = vperm.xlu0 %4885, %v2557_v62   ;;  %v5177_v62 = vld [vmem:[#allocation12 + $0x18] sm:$0xff] }
 0xc94   :  { %v2608_v63 = vpop.f32.mrf.mxu1 }
 0xcf6   :  { %v2611_v13 = vpop.f32.mrf.mxu1 }
 0xcff   :  { %v2614_v42 = vpop.f32.mrf.mxu1 }
 0xd00   :  { %2629 = vmatpush.msrb.mxu2 %v2614_v42  ;;  %2655 = vmatpush.msrb.mxu0 %v2614_v42  ;;  %v2758_v42 = vpop.permute.xlu0 %2757 }
 0xd02   :  { %2630 = vmatpush.msrb.mxu2 %v2611_v13  ;;  %2656 = vmatpush.msrb.mxu0 %v2611_v13  ;;  %v2538_v13 = vld [vmem:[#allocation16 + $0x100] sm:$0xff] }
 0xd04   :  { %2631 = vmatpush.msrb.mxu2 %v2608_v63  ;;  %2657 = vmatpush.msrb.mxu0 %v2608_v63  ;;  %v2539_v63 = vld [vmem:[#allocation16 + $0x108] sm:$0xff] }
 0xd06   :  { %2632 = vmatpush.msrb.mxu2 %v2605_v56  ;;  %2658 = vmatpush.msrb.mxu0 %v2605_v56  ;;  %v5178_v56 = vld [vmem:[#allocation10 + $0x18] sm:$0xff] }
 0xd07   :  { %4702 = vmatmul.msk.f32.vlgmr.msrb.gmra.mxu2 %vm598_vm14, %v5165_v59  ;;  %4705 = vmatmul.msk.f32.vlgmr.msrb.gmra.mxu0 %vm598_vm14, %v5166_v48 }
 0xd0f   :  { %4703 = vmatmul.msk.f32.gmra.mxu2 %vm598_vm14, %v5167_v57  ;;  %4706 = vmatmul.msk.f32.gmra.mxu0 %vm598_vm14, %v5168_v38  ;;  %v2752_v38 = vpop.permute.xlu0 %2751 }
 0xd17   :  { %4704 = vmatmul.msk.f32.gmra.mxu2 %vm598_vm14, %v5169_v4  ;;  %4707 = vmatmul.msk.f32.gmra.mxu0 %vm598_vm14, %v5170_v1 }
 0xd84   :  { %v2660_v8 = vpop.f32.mrf.mxu0 }
 0xd85   :  { %v2672_v20 = vmul.f32 %v4693_v10, %v2660_v8  ;;  %v2681_v2 = vmul.f32 %v2660_v8, %v2522_v9 }
 0xd8a   :  { %v2634_v46 = vpop.f32.mrf.mxu2 }
 0xd8b   :  { %v2669_v34 = vmul.f32 %v2634_v46, %v2522_v9  ;;  %v2678_v53 = vmul.f32 %v4693_v10, %v2634_v46 }
 0xd8c   :  { %v2663_v26 = vpop.f32.mrf.mxu0 }
 0xd8d   :  { %v2673_v7 = vmul.f32 %v4694_v50, %v2663_v26  ;;  %v2682_v3 = vmul.f32 %v2663_v26, %v2523_v35  ;;  %v2684_v12 = vadd.f32 %v2681_v2, %v2678_v53  ;;  %v2675_v6 = vsub.f32 %v2669_v34, %v2672_v20  ;;  %v2754_v26 = vpop.permute.xlu2 %2753  ;;  %v5186_v20 = vld [vmem:[#allocation13 + $0x38] sm:$0xff]  ;;  %v2553_v2 = vld [vmem:[#allocation16 + $0x178] sm:$0xff]  ;;  %v2552_v34 = vld [vmem:[#allocation16 + $0x170] sm:$0xff] }
 0xd8e   :  { %v2537_v53 = vld [vmem:[#allocation16 + $0xf8] sm:$0xff] }
 0xd92   :  { %v2637_v52 = vpop.f32.mrf.mxu2 }
 0xd93   :  { %v2670_v51 = vmul.f32 %v2637_v52, %v2523_v35  ;;  %v2679_v29 = vmul.f32 %v4694_v50, %v2637_v52  ;;  %v2756_v35 = vpop.permute.xlu1 %2755 }
 0xd94   :  { %v2666_v54 = vpop.f32.mrf.mxu0 }
 0xd95   :  { %v2674_v18 = vmul.f32 %v4695_v5, %v2666_v54  ;;  %v2683_v27 = vmul.f32 %v2666_v54, %v2524_v32  ;;  %v2685_v40 = vadd.f32 %v2682_v3, %v2679_v29  ;;  %v2676_v21 = vsub.f32 %v2670_v51, %v2673_v7  ;;  %v5179_v7 = vld [vmem:[#allocation13] sm:$0xff]  ;;  %v5182_v51 = vld [vmem:[#allocation13 + $0x28] sm:$0xff]  ;;  %v5183_v29 = vld [vmem:[#allocation13 + $0x10] sm:$0xff] }
 0xd96   :  { %v5180_v3 = vld [vmem:[#allocation13 + $0x20] sm:$0xff] }
 0xd9a   :  { %v2640_v43 = vpop.f32.mrf.mxu2 }
 0xd9b   :  { %v2671_v16 = vmul.f32 %v2640_v43, %v2524_v32  ;;  %v2680_v39 = vmul.f32 %v4695_v5, %v2640_v43  ;;  %v5181_v43 = vld [vmem:[#allocation13 + $0x8] sm:$0xff] }
 0xd9d   :  { %v2677_v22 = vsub.f32 %v2671_v16, %v2674_v18  ;;  %v2686_v14 = vadd.f32 %v2683_v27, %v2680_v39  ;;  %v5184_v16 = vld [vmem:[#allocation13 + $0x30] sm:$0xff]  ;;  %v5185_v39 = vld [vmem:[#allocation13 + $0x18] sm:$0xff] }
 0xd9f   :  { %4708 = vmatpush.msk.msra.mxu3 %vm741_vm15, %v2686_v14  ;;  %4713 = vmatpush.msk.msrb.mxu1 %vm741_vm15, %v2677_v22  ;;  %v2551_v22 = vld [vmem:[#allocation16 + $0x168] sm:$0xff]  ;;  %v2536_v14 = vld [vmem:[#allocation16 + $0xf0] sm:$0xff] }
 0xda1   :  { %2704 = vmatpush.msra.mxu3 %v2685_v40  ;;  %2736 = vmatpush.msrb.mxu1 %v2676_v21  ;;  %v2550_v40 = vld [vmem:[#allocation16 + $0x160] sm:$0xff]  ;;  %v2535_v21 = vld [vmem:[#allocation16 + $0xe8] sm:$0xff] }
 0xda3   :  { %2705 = vmatpush.msra.mxu3 %v2684_v12  ;;  %2737 = vmatpush.msrb.mxu1 %v2675_v6  ;;  %v2549_v12 = vld [vmem:[#allocation16 + $0x158] sm:$0xff]  ;;  %v2534_v6 = vld [vmem:[#allocation16 + $0xe0] sm:$0xff] }
 0xda4   :  { %4709 = vmatmul.msk.f32.vlgmr.msra.gmra.mxu3 %vm728_vm1, %v5171_v0  ;;  %4714 = vmatmul.msk.f32.vlgmr.msrb.gmra.mxu1 %vm728_vm1, %v5172_v41  ;;  %v2533_v0 = vld [vmem:[#allocation16 + $0xd8] sm:$0xff]  ;;  %v2547_v41 = vld [vmem:[#allocation16 + $0x148] sm:$0xff] }
 0xda5   :  { %2845 = vmatpush.msrb.mxu3 %v2545_v55  ;;  %2886 = vmatpush.msra.mxu1 %v2537_v53  ;;  %v2548_v55 = vld [vmem:[#allocation16 + $0x150] sm:$0xff] }
 0xda7   :  { %2846 = vmatpush.msrb.mxu3 %v2544_v24  ;;  %2887 = vmatpush.msra.mxu1 %v2536_v14  ;;  %v2532_v24 = vld [vmem:[#allocation16 + $0xd0] sm:$0xff] }
 0xda9   :  { %2847 = vmatpush.msrb.mxu3 %v2543_v23  ;;  %2888 = vmatpush.msra.mxu1 %v2535_v21  ;;  %v2546_v23 = vld [vmem:[#allocation16 + $0x140] sm:$0xff] }
 0xdab   :  { %2848 = vmatpush.msrb.mxu3 %v2542_v37  ;;  %2889 = vmatpush.msra.mxu1 %v2534_v6  ;;  %v2531_v37 = vld [vmem:[#allocation16 + $0xc8] sm:$0xff] }
 0xdac   :  { %4710 = vmatmul.msk.f32.gmra.mxu3 %vm728_vm1, %v5173_v45  ;;  %4715 = vmatmul.msk.f32.gmra.mxu1 %vm728_vm1, %v5174_v60  ;;  %v2559_v45 = vld [vmem:[#allocation18 + $0x30] sm:$0xff]  ;;  %v2558_v60 = vld [vmem:[#allocation18 + $0x28] sm:$0xff] }
 0xdad   :  { %2849 = vmatpush.msrb.mxu3 %v2541_v25  ;;  %2890 = vmatpush.msra.mxu1 %v2533_v0  ;;  %v2530_v25 = vld [vmem:[#allocation16 + $0xc0] sm:$0xff] }
 0xdae   :  { %2971 = vperm.xlu0 %4885, %v2559_v45   ;;  %2966 = vperm.xlu1 %4886, %v2558_v60  }
 0xdaf   :  { %2850 = vmatpush.msrb.mxu3 %v2540_v61  ;;  %2891 = vmatpush.msra.mxu1 %v2532_v24  ;;  %v2560_v61 = vld [vmem:[#allocation18 + $0x38] sm:$0xff] }
 0xdb0   :  { %2988 = vperm.xlu2 %4887, %v2558_v60  }
 0xdb1   :  { %2851 = vmatpush.msrb.mxu3 %v2539_v63  ;;  %2892 = vmatpush.msra.mxu1 %v2531_v37 }
 0xdb3   :  { %2852 = vmatpush.msrb.mxu3 %v2538_v13  ;;  %2893 = vmatpush.msra.mxu1 %v2530_v25 }
 0xdb4   :  { %4711 = vmatmul.msk.f32.gmra.mxu3 %vm728_vm1, %v5175_v33  ;;  %4716 = vmatmul.msk.f32.gmra.mxu1 %vm728_vm1, %v5176_v19 }
 0xdb6   :  { %4890 = vset.pattern.permute.xlu0 %v5669_v47  ;;  %4888 = vset.pattern.permute.xlu1 %v5669_v47  ;;  %v2565_v47 = vld [vmem:[#allocation19 + $0x38] sm:$0xff] }
 0xdb7   :  { %2996 = vperm.xlu0 %4890, %v2560_v61   ;;  %2992 = vperm.xlu1 %4888, %v2559_v45  }
 0xdb8   :  { %4889 = vset.pattern.permute.xlu2 %v5670_v49  ;;  %v2563_v49 = vld [vmem:[#allocation19 + $0x28] sm:$0xff] }
 0xdb9   :  { %2976 = vperm.xlu2 %4889, %v2560_v61  }
 0xdbc   :  { %4712 = vmatmul.msk.f32.gmra.mxu3 %vm728_vm1, %v5177_v62  ;;  %4717 = vmatmul.msk.f32.gmra.mxu1 %vm728_vm1, %v5178_v56 }
 0xe21   :  { %v2739_v59 = vpop.f32.mrf.mxu1 }
 0xe27   :  { %v2707_v48 = vpop.f32.mrf.mxu3 }
 0xe28   :  { %v2740_v57 = vadd.f32 %v2739_v59, %v2707_v48  ;;  %v2564_v48 = vld [vmem:[#allocation19 + $0x30] sm:$0xff] }
 0xe29   :  { %v2742_v4 = vpop.f32.mrf.mxu1 }
 0xe2a   :  { %v2763_v1 = vsel %vm598_vm14, %v2740_v57, %v2752_v38  ;;  %v2562_v57 = vld [vmem:[#allocation19 + $0x20] sm:$0xff] }
 0xe2b   :  { %4726 = vmatmul.msk.f32.vlgmr.msrb.gmra.mxu3 %vm916_vm2, %v2763_v1 }
 0xe2f   :  { %v2710_v8 = vpop.f32.mrf.mxu3 }
 0xe30   :  { %v2743_v46 = vadd.f32 %v2742_v4, %v2710_v8 }
 0xe31   :  { %v2745_v32 = vpop.f32.mrf.mxu1 }
 0xe32   :  { %v2764_v52 = vsel %vm598_vm14, %v2743_v46, %v2754_v26  ;;  %v4907_v46 = vld [vmem:[%s7329_s12 + $0x1] ss:$0 sm:$0xff] }
 0xe33   :  { %4727 = vmatmul.msk.f32.gmra.mxu3 %vm916_vm2, %v2764_v52 }
 0xe37   :  { %v2713_v5 = vpop.f32.mrf.mxu3 }
 0xe38   :  { %v2746_v54 = vadd.f32 %v2745_v32, %v2713_v5  ;;  %v2985_v32 = vpop.permute.xlu1 %2984 }
 0xe39   :  { %v2748_v9 = vpop.f32.mrf.mxu1 }
 0xe3a   :  { %v2765_v50 = vsel %vm598_vm14, %v2746_v54, %v2756_v35  ;;  %v2962_v54 = vpop.permute.xlu0 %2961 }
 0xe3b   :  { %4728 = vmatmul.msk.f32.gmra.mxu3 %vm916_vm2, %v2765_v50 }
 0xe3f   :  { %v2716_v10 = vpop.f32.mrf.mxu3 }
 0xe40   :  { %v2749_v18 = vadd.f32 %v2748_v9, %v2716_v10 }
 0xe42   :  { %v2766_v27 = vsel %vm598_vm14, %v2749_v18, %v2758_v42  ;;  %v2972_v6 = vpop.permute.xlu0 %2971 }
 0xe43   :  { %2779 = vmatpush.msra.mxu2 %v2766_v27  ;;  %2808 = vmatpush.msra.mxu0 %v2766_v27 }
 0xe44   :  { %4729 = vmatmul.msk.f32.gmra.mxu3 %vm916_vm2, %v2766_v27 }
 0xe45   :  { %2780 = vmatpush.msra.mxu2 %v2765_v50  ;;  %2809 = vmatpush.msra.mxu0 %v2765_v50 }
 0xe47   :  { %2781 = vmatpush.msra.mxu2 %v2764_v52  ;;  %2810 = vmatpush.msra.mxu0 %v2764_v52 }
 0xe49   :  { %2782 = vmatpush.msra.mxu2 %v2763_v1  ;;  %2811 = vmatpush.msra.mxu0 %v2763_v1 }
 0xe4a   :  { %4718 = vmatmul.msk.f32.vlgmr.msra.gmra.mxu2 %vm598_vm14, %v5179_v7  ;;  %4722 = vmatmul.msk.f32.vlgmr.msra.gmra.mxu0 %vm598_vm14, %v5180_v3  ;;  %v2967_v3 = vpop.permute.xlu1 %2966 }
 0xe4b   :  { %2927 = vmatpush.msrb.mxu2 %v2553_v2  ;;  %3051 = vmatpush.msrb.mxu0 %v2565_v47 }
 0xe4d   :  { %2928 = vmatpush.msrb.mxu2 %v2552_v34  ;;  %3052 = vmatpush.msrb.mxu0 %v2564_v48 }
 0xe4f   :  { %2929 = vmatpush.msrb.mxu2 %v2551_v22  ;;  %3053 = vmatpush.msrb.mxu0 %v2563_v49 }
 0xe51   :  { %2930 = vmatpush.msrb.mxu2 %v2550_v40  ;;  %3054 = vmatpush.msrb.mxu0 %v2562_v57 }
 0xe52   :  { %4719 = vmatmul.msk.f32.gmra.mxu2 %vm598_vm14, %v5181_v43  ;;  %4723 = vmatmul.msk.f32.gmra.mxu0 %vm598_vm14, %v5182_v51 }
 0xe53   :  { %2931 = vmatpush.msrb.mxu2 %v2549_v12 }
 0xe55   :  { %2932 = vmatpush.msrb.mxu2 %v2548_v55  ;;  %v2993_v55 = vpop.permute.xlu1 %2992 }
 0xe57   :  { %2933 = vmatpush.msrb.mxu2 %v2547_v41 }
 0xe59   :  { %2934 = vmatpush.msrb.mxu2 %v2546_v23 }
 0xe5a   :  { %4720 = vmatmul.msk.f32.gmra.mxu2 %vm598_vm14, %v5183_v29  ;;  %4724 = vmatmul.msk.f32.gmra.mxu0 %vm598_vm14, %v5184_v16  ;;  %v2989_v16 = vpop.permute.xlu2 %2988 }
 0xe62   :  { %4721 = vmatmul.msk.f32.gmra.mxu2 %vm598_vm14, %v5185_v39  ;;  %4725 = vmatmul.msk.f32.gmra.mxu0 %vm598_vm14, %v5186_v20 }
 0xeae   :  { %v2854_v38 = vpop.f32.mrf.mxu3 }
 0xeb6   :  { %v2857_v26 = vpop.f32.mrf.mxu3 }
 0xebe   :  { %v2860_v43 = vpop.f32.mrf.mxu3 }
 0xec7   :  { %v2813_v33 = vpop.f32.mrf.mxu0  ;;  %v2863_v41 = vpop.f32.mrf.mxu3 }
 0xec8   :  { %4734 = vmatmul.msk.f32.vlgmr.msrb.gmra.mxu2 %vm916_vm2, %v2813_v33 }
 0xecd   :  { %v2784_v19 = vpop.f32.mrf.mxu2 }
 0xece   :  { %4730 = vmatmul.msk.f32.vlgmr.msra.gmra.mxu1 %vm916_vm2, %v2784_v19  ;;  %v2977_v19 = vpop.permute.xlu2 %2976 }
 0xecf   :  { %v2816_v62 = vpop.f32.mrf.mxu0 }
 0xed0   :  { %4735 = vmatmul.msk.f32.gmra.mxu2 %vm916_vm2, %v2816_v62 }
 0xed5   :  { %v2787_v56 = vpop.f32.mrf.mxu2 }
 0xed6   :  { %4731 = vmatmul.msk.f32.gmra.mxu1 %vm916_vm2, %v2787_v56 }
 0xed7   :  { %v2819_v63 = vpop.f32.mrf.mxu0 }
 0xed8   :  { %4736 = vmatmul.msk.f32.gmra.mxu2 %vm916_vm2, %v2819_v63 }
 0xedd   :  { %v2790_v13 = vpop.f32.mrf.mxu2 }
 0xede   :  { %4732 = vmatmul.msk.f32.gmra.mxu1 %vm916_vm2, %v2790_v13 }
 0xedf   :  { %v2822_v42 = vpop.f32.mrf.mxu0 }
 0xee0   :  { %4737 = vmatmul.msk.f32.gmra.mxu2 %vm916_vm2, %v2822_v42  ;;  %v2997_v42 = vpop.permute.xlu0 %2996 }
 0xee5   :  { %v2793_v59 = vpop.f32.mrf.mxu2 }
 0xee6   :  { %4733 = vmatmul.msk.f32.gmra.mxu1 %vm916_vm2, %v2793_v59 }
 0xf4b   :  { %v2895_v4 = vpop.f32.mrf.mxu1  ;;  %v2936_v1 = vpop.f32.mrf.mxu2 }
 0xf4c   :  { %v2896_v8 = vadd.f32 %v2895_v4, %v2854_v38 }
 0xf4e   :  { %v2948_v52 = vadd.f32 %v2936_v1, %v2896_v8 }
 0xf50   :  { %v2955_v5 = vadd.f32 %v4907_v46, %v2948_v52 }
 0xf52   :  { %v2979_v35 = vmul.f32 %v2962_v54, %v2955_v5 }
 0xf53   :  { %v2898_v50 = vpop.f32.mrf.mxu1  ;;  %v2939_v9 = vpop.f32.mrf.mxu2 }
 0xf54   :  { %v2999_v10 = vadd.f32 %v2985_v32, %v2979_v35  ;;  %v2899_v18 = vadd.f32 %v2898_v50, %v2857_v26 }
 0xf56   :  { %v3007_v27 = vmin.f32 %v2999_v10, 0.0  ;;  %v2949_v7 = vadd.f32 %v2939_v9, %v2899_v18  ;;  %vm3003_vm15 = vcmp.gt.f32.partialorder %v2999_v10, 0.0 }
 0xf58   :  { %v3011_v51 = vmul.f32 1.442695, %v3007_v27  ;;  %v2956_v29 = vadd.f32 %v4907_v46, %v2949_v7 }
 0xf5a   :  { %5041 = vpow2.f32 %v3011_v51  ;;  %v2980_v39 = vmul.f32 %v2967_v3, %v2956_v29  ;;  %v6741_v3 = vld [vmem:[#allocation21 + $0x10] sm:$0xff] }
 0xf5b   :  { %v2901_v20 = vpop.f32.mrf.mxu1  ;;  %v2942_v2 = vpop.f32.mrf.mxu2 }
 0xf5c   :  { %v3000_v34 = vadd.f32 %v2989_v16, %v2980_v39  ;;  %v2902_v53 = vadd.f32 %v2901_v20, %v2860_v43  ;;  %v6746_v43 = vld [vmem:[#allocation21 + $0x18] sm:$0xff] }
 0xf5e   :  { %v3008_v22 = vmin.f32 %v3000_v34, 0.0  ;;  %v2950_v14 = vadd.f32 %v2942_v2, %v2902_v53  ;;  %vm3004_vm1 = vcmp.gt.f32.partialorder %v3000_v34, 0.0  ;;  %v6781_v2 = vld [vmem:[#allocation22 + $0x38] sm:$0xff] }
 0xf60   :  { %v5042_v40 = vpop.eup %5041  ;;  %v3013_v21 = vmul.f32 1.442695, %v3008_v22  ;;  %v2957_v12 = vadd.f32 %v4907_v46, %v2950_v14  ;;  %v6788_v14 = vld [vmem:[#allocation22 + $0x28] sm:$0xff] }
 0xf61   :  { %v4738_v0 = vadd.f32 -1.0, %v5042_v40  ;;  %v6791_v40 = vld [vmem:[#allocation22 + $0x20] sm:$0xff] }
 0xf62   :  { %5043 = vpow2.f32 %v3013_v21  ;;  %v2981_v24 = vmul.f32 %v2972_v6, %v2957_v12 }
 0xf63   :  { %v2904_v23 = vpop.f32.mrf.mxu1  ;;  %v3023_v37 = vsel %vm3003_vm15, %v2999_v10, %v4738_v0  ;;  %v2945_v25 = vpop.f32.mrf.mxu2 }
 0xf64   :  { %v2905_v45 = vadd.f32 %v2904_v23, %v2863_v41  ;;  %v3001_v60 = vadd.f32 %v2993_v55, %v2981_v24  ;;  %4742 = vmatmul.msk.f32.vlgmr.msrb.gmra.mxu0 %vm598_vm14, %v3023_v37  ;;  %v6806_v23 = vld [vmem:[#allocation24] sm:$0xff] }
 0xf66   :  { %v3009_v61 = vmin.f32 %v3001_v60, 0.0  ;;  %v2951_v33 = vadd.f32 %v2945_v25, %v2905_v45  ;;  %vm3005_vm2 = vcmp.gt.f32.partialorder %v3001_v60, 0.0 }
 0xf68   :  { %v5044_v62 = vpop.eup %5043  ;;  %v3015_v56 = vmul.f32 1.442695, %v3009_v61  ;;  %v2958_v63 = vadd.f32 %v4907_v46, %v2951_v33 }
 0xf69   :  { %v4739_v13 = vadd.f32 -1.0, %v5044_v62  ;;  %v6818_v62 = vld [vmem:[#allocation24 + $0x8] sm:$0xff] }
 0xf6a   :  { %5045 = vpow2.f32 %v3015_v56  ;;  %v2982_v59 = vmul.f32 %v2977_v19, %v2958_v63 }
 0xf6b   :  { %v3024_v47 = vsel %vm3004_vm1, %v3000_v34, %v4739_v13  ;;  %v6785_v34 = vld [vmem:[#allocation22 + $0x30] sm:$0xff] }
 0xf6c   :  { %v3002_v48 = vadd.f32 %v2997_v42, %v2982_v59  ;;  %4743 = vmatmul.msk.f32.gmra.mxu0 %vm598_vm14, %v3024_v47 }
 0xf6e   :  { %v3010_v49 = vmin.f32 %v3002_v48, 0.0  ;;  %vm3006_vm5 = vcmp.gt.f32.partialorder %v3002_v48, 0.0 }
 0xf70   :  { %v5046_v57 = vpop.eup %5045  ;;  %v3017_v38 = vmul.f32 1.442695, %v3010_v49 }
 0xf71   :  { %v4740_v4 = vadd.f32 -1.0, %v5046_v57 }
 0xf72   :  { %5047 = vpow2.f32 %v3017_v38 }
 0xf73   :  { %v3025_v1 = vsel %vm3005_vm2, %v3001_v60, %v4740_v4 }
 0xf74   :  { %4744 = vmatmul.msk.f32.gmra.mxu0 %vm598_vm14, %v3025_v1 }
 0xf78   :  { %v5048_v8 = vpop.eup %5047 }
 0xf79   :  { %v4741_v46 = vadd.f32 -1.0, %v5048_v8  ;;  %v6836_v8 = vld [vmem:[#allocation24 + $0x18] sm:$0xff] }
 0xf7b   :  { %v3026_v26 = vsel %vm3006_vm5, %v3002_v48, %v4741_v46  ;;  %v6828_v48 = vld [vmem:[#allocation24 + $0x10] sm:$0xff] }
 0xf7c   :  { %4745 = vmatmul.msk.f32.gmra.mxu0 %vm598_vm14, %v3026_v26 }
 0xfe1   :  { %v3056_v52 = vpop.f32.mrf.mxu0 }
 0xfe9   :  { %v3059_v32 = vpop.f32.mrf.mxu0 }
 0xff1   :  { %v6707_v5 = vpop.f32.mrf.mxu0 }
 0xff2   :  { %3076 = vrot.lane.b32.xlu2 %v6707_v5, %s5671_s28 }
 0xff9   :  { %v6711_v54 = vpop.f32.mrf.mxu0 }
 0xffa   :  { %3072 = vrot.lane.b32.xlu2 %v3056_v52, %s5671_s28  ;;  %3078 = vrot.lane.b32.xlu1 %v6711_v54, %s5671_s28 }
0x1002   :  { %3438 = vrot.lane.b32.xlu2 %v3056_v52, %s5672_s18  ;;  %3074 = vrot.lane.b32.xlu1 %v3059_v32, %s5671_s28 }
0x100a   :  { %3444 = vrot.lane.b32.xlu2 %v6711_v54, %s5672_s18 }
0x1012   :  { %3119 = vrot.lane.b32.xlu2 %v6711_v54, %s5673_s24 }
0x101a   :  { %3115 = vrot.lane.b32.xlu2 %v3059_v32, %s5673_s24 }
0x1022   :  { %3288 = vrot.lane.b32.xlu2 %v6707_v5, %s5674_s11 }
0x104c   :  { %v6725_v35 = vpop.permute.xlu2 %3076 }
0x1054   :  { %v6727_v50 = vpop.permute.xlu2 %3072 }
0x105c   :  { %v3439_v9 = vpop.permute.xlu2 %3438 }
0x1064   :  { %v6729_v10 = vpop.permute.xlu2 %3444 }
0x106c   :  { %v6731_v18 = vpop.permute.xlu2 %3119  ;;  %v6733_v27 = vpop.permute.xlu1 %3078 }
0x106d   :  { %3102 = vmatpush.msra.mxu3 %v6733_v27  ;;  %3137 = vmatpush.msrb.mxu1 %v6731_v18 }
0x106f   :  { %3103 = vmatpush.msra.mxu3 %v6725_v35 }
0x1074   :  { %v6738_v7 = vpop.permute.xlu1 %3074  ;;  %v6799_v6 = vpop.permute.xlu2 %3115 }
0x1075   :  { %3104 = vmatpush.msra.mxu3 %v6738_v7 }
0x1077   :  { %3105 = vmatpush.msra.mxu3 %v6727_v50 }
0x1078   :  { %4746 = vmatmul.msk.f32.vlgmr.msra.gmra.mxu3 %vm598_vm14, %v6741_v3 }
0x107c   :  { %v3289_v19 = vpop.permute.xlu2 %3288 }
0x1080   :  { %4747 = vmatmul.msk.f32.gmra.mxu3 %vm598_vm14, %v6746_v43 }
0x10fb   :  { %v3107_v51 = vpop.f32.mrf.mxu3 }
0x10fc   :  { %3598 = vrot.lane.b32.xlu2 %v3107_v51, %s5675_s23  ;;  %3446 = vrot.lane.b32.xlu1 %v3107_v51, %s5672_s18 }
0x1103   :  { %v3110_v29 = vpop.f32.mrf.mxu3 }
0x1104   :  { %3594 = vrot.lane.b32.xlu2 %v6707_v5, %s5675_s23  ;;  %3442 = vrot.lane.b32.xlu1 %v6707_v5, %s5672_s18 }
0x1105   :  { %3448 = vrot.lane.b32.xlu0 %v3110_v29, %s5672_s18  ;;  %4750 = vmatpush.xpose.msk.msra.mxu2 %vm354_vm0, %v3110_v29 }
0x1109   :  { %4751 = vmatpush.xpose.msk.msra.mxu2 %vm354_vm0, %v3107_v51 }
0x110c   :  { %4752 = vmatmul.msk.f32.vlgmr.msra.gmra.mxu2 %vm354_vm0, %v3056_v52  ;;  %3292 = vrot.lane.b32.xlu1 %v3107_v51, %s5674_s11 }
0x110d   :  { %3440 = vrot.lane.b32.xlu0 %v3059_v32, %s5672_s18 }
0x1114   :  { %4753 = vmatmul.msk.f32.gmra.mxu2 %vm354_vm0, %v3059_v32  ;;  %3117 = vrot.lane.b32.xlu1 %v6707_v5, %s5673_s24 }
0x1115   :  { %3294 = vrot.lane.b32.xlu0 %v3110_v29, %s5674_s11 }
0x111c   :  { %4754 = vmatmul.msk.f32.gmra.mxu2 %vm354_vm0, %v6707_v5  ;;  %3286 = vrot.lane.b32.xlu1 %v3059_v32, %s5674_s11 }
0x111d   :  { %3284 = vrot.lane.b32.xlu0 %v3056_v52, %s5674_s11 }
0x1124   :  { %4755 = vmatmul.msk.f32.gmra.mxu2 %vm354_vm0, %v6711_v54  ;;  %3592 = vrot.lane.b32.xlu1 %v3059_v32, %s5675_s23 }
0x1125   :  { %3113 = vrot.lane.b32.xlu0 %v3056_v52, %s5673_s24 }
0x112c   :  { %3600 = vrot.lane.b32.xlu1 %v3110_v29, %s5675_s23 }
0x112d   :  { %3290 = vrot.lane.b32.xlu0 %v6711_v54, %s5674_s11 }
0x1135   :  { %3590 = vrot.lane.b32.xlu0 %v3056_v52, %s5675_s23 }
0x113d   :  { %3596 = vrot.lane.b32.xlu0 %v6711_v54, %s5675_s23 }
0x1156   :  { %v3599_v47 = vpop.permute.xlu2 %3598 }
0x1161   :  { %3876 = vxpose.xlu1.b32.start [1/2] (short) (narrow) %v3056_v52, 32 }
0x1169   :  { %3877 = vxpose.xlu1.b32.end [2/2] (short) (narrow) %v3059_v32, 32  ;;  %v3595_v32 = vpop.permute.xlu2 %3594 }
0x116e   :  { %v3447_v16 = vpop.permute.xlu1 %3446 }
0x1176   :  { %v3443_v39 = vpop.permute.xlu1 %3442 }
0x1177   :  { %v3449_v20 = vpop.permute.xlu0 %3448 }
0x1178   :  { %4770 = vmatpush.xpose.msk.msrb.mxu2 %vm354_vm0, %v3449_v20 }
0x117c   :  { %4771 = vmatpush.xpose.msk.msrb.mxu2 %vm354_vm0, %v3447_v16 }
0x117e   :  { %v3293_v53 = vpop.permute.xlu1 %3292 }
0x117f   :  { %v3441_v22 = vpop.permute.xlu0 %3440  ;;  %4772 = vmatmul.msk.f32.vlgmr.msrb.gmra.mxu2 %vm354_vm0, %v3439_v9 }
0x1180   :  { %3822 = vmatpush.msra.mxu2 %v6781_v2 }
0x1182   :  { %3823 = vmatpush.msra.mxu2 %v6785_v34 }
0x1184   :  { %3824 = vmatpush.msra.mxu2 %v6788_v14 }
0x1186   :  { %3825 = vmatpush.msra.mxu2 %v6791_v40  ;;  %v6795_v21 = vpop.permute.xlu1 %3117 }
0x1187   :  { %v3295_v12 = vpop.permute.xlu0 %3294  ;;  %4773 = vmatmul.msk.f32.gmra.mxu2 %vm354_vm0, %v3441_v22  ;;  %3138 = vmatpush.msrb.mxu1 %v6795_v21 }
0x1188   :  { %4760 = vmatpush.xpose.msk.msrb.mxu3 %vm354_vm0, %v3295_v12 }
0x1189   :  { %3139 = vmatpush.msrb.mxu1 %v6799_v6 }
0x118c   :  { %4761 = vmatpush.xpose.msk.msrb.mxu3 %vm354_vm0, %v3293_v53 }
0x118e   :  { %v3287_v55 = vpop.permute.xlu1 %3286 }
0x118f   :  { %v3285_v0 = vpop.permute.xlu0 %3284  ;;  %v3179_v41 = vpop.f32.mrf.mxu2  ;;  %4774 = vmatmul.msk.f32.gmra.mxu2 %vm354_vm0, %v3443_v39 }
0x1190   :  { %v3191_v24 = vmul.f32 0.35355338, %v3179_v41  ;;  %4762 = vmatmul.msk.f32.vlgmr.msrb.gmra.mxu3 %vm354_vm0, %v3285_v0 }
0x1192   :  { %v3195_v37 = vadd.f32 %v6806_v23, %v3191_v24 }
0x1194   :  { %v3199_v25 = vsel %vm1291_vm7, %v3195_v37, -inf }
0x1195   :  { %3200 = vmax.xlane.f32.xlu2 %v3199_v25 }
0x1196   :  { %v3593_v45 = vpop.permute.xlu1 %3592 }
0x1197   :  { %v6810_v60 = vpop.permute.xlu0 %3113  ;;  %v3182_v61 = vpop.f32.mrf.mxu2  ;;  %4775 = vmatmul.msk.f32.gmra.mxu2 %vm354_vm0, %v6729_v10 }
0x1198   :  { %v3192_v33 = vmul.f32 0.35355338, %v3182_v61  ;;  %3140 = vmatpush.msrb.mxu1 %v6810_v60  ;;  %4763 = vmatmul.msk.f32.gmra.mxu3 %vm354_vm0, %v3287_v55 }
0x1199   :  { %4748 = vmatmul.msk.f32.vlgmr.msrb.gmra.mxu1 %vm598_vm14, %v6741_v3 }
0x119a   :  { %v3196_v56 = vadd.f32 %v6818_v62, %v3192_v33 }
0x119c   :  { %v3202_v63 = vsel %vm1291_vm7, %v3196_v56, -inf }
0x119d   :  { %3203 = vmax.xlane.f32.xlu0 %v3202_v63 }
0x119e   :  { %v3601_v13 = vpop.permute.xlu1 %3600 }
0x119f   :  { %v3185_v42 = vpop.f32.mrf.mxu2  ;;  %4790 = vmatmul.msk.f32.vlgmr.msra.gmra.mxu2 %vm598_vm14, %v6727_v50  ;;  %4780 = vmatpush.xpose.msk.msra.mxu3 %vm354_vm0, %v3601_v13  ;;  %v3291_v38 = vpop.permute.xlu0 %3290 }
0x11a0   :  { %v3193_v59 = vmul.f32 0.35355338, %v3185_v42  ;;  %4764 = vmatmul.msk.f32.gmra.mxu3 %vm354_vm0, %v3289_v19 }
0x11a1   :  { %4749 = vmatmul.msk.f32.gmra.mxu1 %vm598_vm14, %v6746_v43 }
0x11a2   :  { %v3197_v49 = vadd.f32 %v6828_v48, %v3193_v59 }
0x11a3   :  { %4781 = vmatpush.xpose.msk.msra.mxu3 %vm354_vm0, %v3599_v47 }
0x11a4   :  { %v3205_v57 = vsel %vm1291_vm7, %v3197_v49, -inf }
0x11a5   :  { %3206 = vmax.xlane.f32.xlu2 %v3205_v57 }
0x11a7   :  { %v3188_v4 = vpop.f32.mrf.mxu2  ;;  %4791 = vmatmul.msk.f32.gmra.mxu2 %vm598_vm14, %v6738_v7  ;;  %v3591_v52 = vpop.permute.xlu0 %3590 }
0x11a8   :  { %v3194_v1 = vmul.f32 0.35355338, %v3188_v4  ;;  %4765 = vmatmul.msk.f32.gmra.mxu3 %vm354_vm0, %v3291_v38 }
0x11aa   :  { %v3198_v46 = vadd.f32 %v6836_v8, %v3194_v1 }
0x11ac   :  { %v3208_v26 = vsel %vm1291_vm7, %v3198_v46, -inf }
0x11ad   :  { %3209 = vmax.xlane.f32.xlu0 %v3208_v26 }
0x11af   :  { %4792 = vmatmul.msk.f32.gmra.mxu2 %vm598_vm14, %v6725_v35  ;;  %v3597_v50 = vpop.permute.xlu0 %3596 }
0x11b0   :  { %4782 = vmatmul.msk.f32.vlgmr.msra.gmra.mxu3 %vm354_vm0, %v3591_v52 }
0x11b7   :  { %4793 = vmatmul.msk.f32.gmra.mxu2 %vm598_vm14, %v6733_v27 }
0x11b8   :  { %4783 = vmatmul.msk.f32.gmra.mxu3 %vm354_vm0, %v3593_v45 }
0x11c0   :  { %4784 = vmatmul.msk.f32.gmra.mxu3 %vm354_vm0, %v3595_v32 }
0x11c8   :  { %4785 = vmatmul.msk.f32.gmra.mxu3 %vm354_vm0, %v3597_v50 }
0x1202   :  { %v3479_v9 = vpop.f32.mrf.mxu2 }
0x1203   :  { %v3491_v10 = vmul.f32 0.35355338, %v3479_v9 }
0x1205   :  { %v6849_v7 = vadd.f32 %v6806_v23, %v3491_v10 }
0x1207   :  { %v3499_v35 = vsel %vm1291_vm7, %v6849_v7, -inf }
0x1208   :  { %v3201_v3 = vpop.xlane.xlu2 %3200  ;;  %3500 = vmax.xlane.f32.xlu2 %v3499_v35 }
0x1209   :  { %v3211_v43 = vsub.f32 %v3195_v37, %v3201_v3 }
0x120a   :  { %v3482_v27 = vpop.f32.mrf.mxu2 }
0x120b   :  { %v3215_v51 = vmul.f32 1.442695, %v3211_v43  ;;  %v3492_v29 = vmul.f32 0.35355338, %v3482_v27  ;;  %v3892_v27 = vpop.trf.xlu1 }
0x120d   :  { %5049 = vpow2.f32 %v3215_v51  ;;  %v6854_v16 = vadd.f32 %v6818_v62, %v3492_v29 }
0x120f   :  { %v3502_v39 = vsel %vm1291_vm7, %v6854_v16, -inf }
0x1210   :  { %v3204_v20 = vpop.xlane.xlu0 %3203  ;;  %3503 = vmax.xlane.f32.xlu0 %v3502_v39 }
0x1211   :  { %v3212_v53 = vsub.f32 %v3196_v56, %v3204_v20 }
0x1212   :  { %v3485_v22 = vpop.f32.mrf.mxu2 }
0x1213   :  { %v6858_v12 = vpop.eup %5049  ;;  %v3217_v55 = vmul.f32 1.442695, %v3212_v53  ;;  %v3493_v0 = vmul.f32 0.35355338, %v3485_v22  ;;  %v3325_v37 = vpop.f32.mrf.mxu3 }
0x1214   :  { %v3223_v41 = vsel %vm1291_vm7, %v6858_v12, 0.0  ;;  %v3893_v22 = vpop.trf.xlu1 }
0x1215   :  { %5051 = vpow2.f32 %v3217_v55  ;;  %v6863_v24 = vadd.f32 %v6828_v48, %v3493_v0  ;;  %3224 = vadd.xlane.f32.xlu2 %v3223_v41 }
0x1216   :  { %v3142_v61 = vpop.f32.mrf.mxu1 }
0x1217   :  { %v3505_v25 = vsel %vm1291_vm7, %v6863_v24, -inf }
0x1218   :  { %v3207_v45 = vpop.xlane.xlu2 %3206  ;;  %3506 = vmax.xlane.f32.xlu1 %v3505_v25 }
0x1219   :  { %v3213_v33 = vsub.f32 %v3197_v49, %v3207_v45  ;;  %v3337_v45 = vmul.f32 0.35355338, %v3325_v37 }
0x121a   :  { %v3488_v19 = vpop.f32.mrf.mxu2 }
0x121b   :  { %v6867_v56 = vpop.eup %5051  ;;  %v3219_v63 = vmul.f32 1.442695, %v3213_v33  ;;  %v3494_v13 = vmul.f32 0.35355338, %v3488_v19  ;;  %v3328_v4 = vpop.f32.mrf.mxu3 }
0x121c   :  { %v3226_v42 = vsel %vm1291_vm7, %v6867_v56, 0.0  ;;  %v3338_v32 = vmul.f32 0.35355338, %v3328_v4  ;;  %v3894_v0 = vpop.trf.xlu1 }
0x121d   :  { %v6872_v59 = vadd.f32 %v6836_v8, %v3494_v13  ;;  %3227 = vadd.xlane.f32.xlu2 %v3226_v42  ;;  %5053 = vpow2.f32 %v3219_v63 }
0x121e   :  { %v3145_v38 = vpop.f32.mrf.mxu1  ;;  %v6883_v35 = vadd.f32 %v6818_v62, %v3338_v32 }
0x121f   :  { %v3508_v47 = vsel %vm1291_vm7, %v6872_v59, -inf  ;;  %3269 = vmatpush.msra.mxu0 %v3145_v38  ;;  %v6887_v43 = vpack.i.bf16 %v3142_v61, %v3145_v38 }
0x1220   :  { %3509 = vmax.xlane.f32.xlu0 %v3508_v47  ;;  %v3210_v57 = vpop.xlane.xlu0 %3209  ;;  %v3348_v29 = vsel %vm1291_vm7, %v6883_v35, -inf }
0x1221   :  { %v3214_v49 = vsub.f32 %v3198_v46, %v3210_v57  ;;  %3270 = vmatpush.msra.mxu0 %v3142_v61  ;;  %v6907_v61 = vadd.f32 %v6806_v23, %v3337_v45 }
0x1222   :  { %v3827_v1 = vpop.f32.mrf.mxu2 }
0x1223   :  { %v3221_v26 = vmul.f32 1.442695, %v3214_v49  ;;  %v6876_v52 = vpop.eup %5053  ;;  %v3331_v46 = vpop.f32.mrf.mxu3  ;;  %v3345_v63 = vsel %vm1291_vm7, %v6907_v61, -inf }
0x1224   :  { %v3229_v50 = vsel %vm1291_vm7, %v6876_v52, 0.0  ;;  %v3339_v51 = vmul.f32 0.35355338, %v3331_v46  ;;  %v3895_v25 = vpop.trf.xlu1 }
0x1225   :  { %5055 = vpow2.f32 %v3221_v26 }
0x1226   :  { %v6895_v39 = vadd.f32 %v6828_v48, %v3339_v51 }
0x1228   :  { %3230 = vadd.xlane.f32.xlu0 %v3229_v50  ;;  %v3351_v20 = vsel %vm1291_vm7, %v6895_v39, -inf }
0x122a   :  { %v3830_v9 = vpop.f32.mrf.mxu2 }
0x122b   :  { %v6880_v10 = vpop.eup %5055  ;;  %3934 = vmatpush.msrb.mxu3 %v3830_v9  ;;  %v3334_v53 = vpop.f32.mrf.mxu3 }
0x122c   :  { %v3232_v3 = vsel %vm1291_vm7, %v6880_v10, 0.0 }
0x122d   :  { %3935 = vmatpush.msrb.mxu3 %v3827_v1  ;;  %3233 = vadd.xlane.f32.xlu2 %v3232_v3 }
0x122e   :  { %4798 = vmatmul.msk.f32.vlgmr.msrb.gmra.mxu3 %vm1291_vm7, %v3892_v27 }
0x1230   :  { %3349 = vmax.xlane.f32.xlu0 %v3348_v29 }
0x1231   :  { %4897 = vrot.lane.b32.xlu1 %v6887_v43, %s5674_s11 }
0x1233   :  { %v3631_v55 = vpop.f32.mrf.mxu3 }
0x1236   :  { %4799 = vmatmul.msk.f32.gmra.mxu3 %vm1291_vm7, %v3893_v22 }
0x1238   :  { %3352 = vmax.xlane.f32.xlu0 %v3351_v20 }
0x123b   :  { %v6903_v41 = vpop.f32.mrf.mxu3 }
0x123e   :  { %4800 = vmatmul.msk.f32.gmra.mxu3 %vm1291_vm7, %v3894_v0 }
0x1243   :  { %v3637_v33 = vpop.f32.mrf.mxu3 }
0x1244   :  { %v3645_v19 = vmul.f32 0.35355338, %v3637_v33  ;;  %v3340_v33 = vmul.f32 0.35355338, %v3334_v53 }
0x1245   :  { %4892 = vrot.lane.b32.xlu2 %v6887_v43, %s5672_s18 }
0x1246   :  { %4801 = vmatmul.msk.f32.gmra.mxu3 %vm1291_vm7, %v3895_v25  ;;  %v6912_v13 = vadd.f32 %v6828_v48, %v3645_v19 }
0x1248   :  { %v3657_v42 = vsel %vm1291_vm7, %v6912_v13, -inf }
0x126e   :  { %3346 = vmax.xlane.f32.xlu2 %v3345_v63 }
0x1276   :  { %3658 = vmax.xlane.f32.xlu2 %v3657_v42  ;;  %v6941_v42 = vadd.f32 %v6836_v8, %v3340_v33 }
0x127b   :  { %v3501_v47 = vpop.xlane.xlu2 %3500 }
0x127c   :  { %v3511_v57 = vsub.f32 %v6849_v7, %v3501_v47 }
0x127e   :  { %v3515_v37 = vmul.f32 1.442695, %v3511_v57  ;;  %v3354_v57 = vsel %vm1291_vm7, %v6941_v42, -inf }
0x1280   :  { %5057 = vpow2.f32 %v3515_v37 }
0x1283   :  { %v3504_v38 = vpop.xlane.xlu0 %3503 }
0x1284   :  { %v3512_v49 = vsub.f32 %v6854_v16, %v3504_v38 }
0x1286   :  { %v6918_v4 = vpop.eup %5057  ;;  %v3517_v1 = vmul.f32 1.442695, %v3512_v49 }
0x1287   :  { %v3523_v26 = vsel %vm1291_vm7, %v6918_v4, 0.0 }
0x1288   :  { %5059 = vpow2.f32 %v3517_v1  ;;  %v3225_v48 = vpop.xlane.xlu2 %3224  ;;  %3524 = vadd.xlane.f32.xlu0 %v3523_v26 }
0x1289   :  { %5061 = vrcp.f32 %v3225_v48 }
0x128b   :  { %v3507_v32 = vpop.xlane.xlu1 %3506 }
0x128c   :  { %v3513_v50 = vsub.f32 %v6863_v24, %v3507_v32 }
0x128e   :  { %v6923_v9 = vpop.eup %5059  ;;  %v3519_v7 = vmul.f32 1.442695, %v3513_v50 }
0x128f   :  { %v5062_v46 = vpop.eup %5061  ;;  %v3526_v16 = vsel %vm1291_vm7, %v6923_v9, 0.0 }
0x1290   :  { %v3239_v3 = vmul.f32 %v5062_v46, %v6858_v12  ;;  %5063 = vpow2.f32 %v3519_v7  ;;  %v3228_v27 = vpop.xlane.xlu2 %3227  ;;  %3527 = vadd.xlane.f32.xlu0 %v3526_v16 }
0x1291   :  { %5065 = vrcp.f32 %v3228_v27 }
0x1292   :  { %4756 = vmatmul.msk.f32.vlgmr.msra.gmra.mxu0 %vm1291_vm7, %v3239_v3 }
0x1293   :  { %v3510_v51 = vpop.xlane.xlu0 %3509 }
0x1294   :  { %v3514_v29 = vsub.f32 %v6872_v59, %v3510_v51 }
0x1296   :  { %v6930_v20 = vpop.eup %5063  ;;  %v3521_v24 = vmul.f32 1.442695, %v3514_v29 }
0x1297   :  { %v5066_v22 = vpop.eup %5065  ;;  %v3529_v0 = vsel %vm1291_vm7, %v6930_v20, 0.0 }
0x1298   :  { %5067 = vpow2.f32 %v3521_v24  ;;  %3530 = vadd.xlane.f32.xlu0 %v3529_v0  ;;  %v3240_v12 = vmul.f32 %v5066_v22, %v6867_v56  ;;  %v3643_v56 = vmul.f32 0.35355338, %v3631_v55 }
0x129a   :  { %4757 = vmatmul.msk.f32.gmra.mxu0 %vm1291_vm7, %v3240_v12  ;;  %v6948_v1 = vadd.f32 %v6806_v23, %v3643_v56 }
0x129b   :  { %v3231_v25 = vpop.xlane.xlu0 %3230 }
0x129c   :  { %5069 = vrcp.f32 %v3231_v25  ;;  %v3651_v55 = vsel %vm1291_vm7, %v6948_v1, -inf }
0x129e   :  { %v6936_v45 = vpop.eup %5067 }
0x129f   :  { %v3532_v59 = vsel %vm1291_vm7, %v6936_v45, 0.0 }
0x12a0   :  { %v3234_v19 = vpop.xlane.xlu2 %3233  ;;  %3533 = vadd.xlane.f32.xlu0 %v3532_v59 }
0x12a1   :  { %5071 = vrcp.f32 %v3234_v19 }
0x12a2   :  { %v5070_v63 = vpop.eup %5069 }
0x12a3   :  { %v3241_v47 = vmul.f32 %v5070_v63, %v6876_v52  ;;  %v3644_v52 = vmul.f32 0.35355338, %v6903_v41  ;;  %v3350_v7 = vpop.xlane.xlu0 %3349 }
0x12a5   :  { %4758 = vmatmul.msk.f32.gmra.mxu0 %vm1291_vm7, %v3241_v47  ;;  %v6958_v48 = vadd.f32 %v6818_v62, %v3644_v52  ;;  %v3640_v62 = vpop.f32.mrf.mxu3 }
0x12a7   :  { %v5072_v37 = vpop.eup %5071  ;;  %v3654_v23 = vsel %vm1291_vm7, %v6958_v48, -inf }
0x12a8   :  { %3355 = vmax.xlane.f32.xlu0 %v3354_v57  ;;  %v4893_v53 = vpop.permute.xlu2 %4892  ;;  %v3242_v26 = vmul.f32 %v5072_v37, %v6880_v10  ;;  %v4898_v10 = vpop.permute.xlu1 %4897 }
0x12a9   :  { %v4894_v38 = vunpack.i.l.bf16 %v4893_v53  ;;  %v4895_v49 = vunpack.i.h.bf16 %v4893_v53  ;;  %v4899_v41 = vunpack.i.l.bf16 %v4898_v10  ;;  %v4900_v32 = vunpack.i.h.bf16 %v4898_v10 }
0x12ab   :  { %3575 = vmatpush.msrb.mxu0 %v4894_v38  ;;  %3423 = vmatpush.msra.mxu1 %v4899_v41  ;;  %v3353_v27 = vpop.xlane.xlu0 %3352 }
0x12ad   :  { %4759 = vmatmul.msk.f32.gmra.mxu0 %vm1291_vm7, %v3242_v26  ;;  %3424 = vmatpush.msra.mxu1 %v4900_v32 }
0x12ae   :  { %3576 = vmatpush.msrb.mxu0 %v4895_v49 }
0x12b0   :  { %3859 = vmatpush.msra.mxu0 %v6781_v2  ;;  %3652 = vmax.xlane.f32.xlu0 %v3651_v55 }
0x12b1   :  { %v3937_v49 = vpop.f32.mrf.mxu3 }
0x12b2   :  { %3860 = vmatpush.msra.mxu0 %v6785_v34 }
0x12b4   :  { %3861 = vmatpush.msra.mxu0 %v6788_v14  ;;  %v3358_v14 = vsub.f32 %v6883_v35, %v3350_v7 }
0x12b6   :  { %3862 = vmatpush.msra.mxu0 %v6791_v40  ;;  %v3646_v40 = vmul.f32 0.35355338, %v3640_v62  ;;  %v3363_v3 = vmul.f32 1.442695, %v3358_v14 }
0x12b8   :  { %3655 = vmax.xlane.f32.xlu0 %v3654_v23  ;;  %v6971_v51 = vadd.f32 %v6836_v8, %v3646_v40 }
0x12b9   :  { %v3940_v41 = vpop.f32.mrf.mxu3 }
0x12ba   :  { %v3660_v29 = vsel %vm1291_vm7, %v6971_v51, -inf  ;;  %v3950_v7 = vmul.f32 0.25, %v3940_v41 }
0x12c1   :  { %v3943_v40 = vpop.f32.mrf.mxu3 }
0x12e1   :  { %v3347_v2 = vpop.xlane.xlu2 %3346 }
0x12e2   :  { %v3357_v50 = vsub.f32 %v6907_v61, %v3347_v2  ;;  %v3359_v61 = vsub.f32 %v6895_v39, %v3353_v27  ;;  %v7001_v2 = vld [vmem:[#allocation25] sm:$0xff]  ;;  %v3951_v27 = vmul.f32 0.25, %v3943_v40 }
0x12e4   :  { %v3361_v34 = vmul.f32 1.442695, %v3357_v50  ;;  %v3365_v24 = vmul.f32 1.442695, %v3359_v61 }
0x12e6   :  { %5073 = vpow2.f32 %v3361_v34 }
0x12e7   :  { %5075 = vpow2.f32 %v3363_v3 }
0x12e8   :  { %5077 = vpow2.f32 %v3365_v24 }
0x12e9   :  { %v3659_v26 = vpop.xlane.xlu2 %3658 }
0x12ea   :  { %v3665_v23 = vsub.f32 %v6912_v13, %v3659_v26 }
0x12ec   :  { %v6965_v46 = vpop.eup %5073  ;;  %v3671_v32 = vmul.f32 1.442695, %v3665_v23 }
0x12ed   :  { %v3369_v16 = vsel %vm1291_vm7, %v6965_v46, 0.0  ;;  %v6976_v22 = vpop.eup %5075 }
0x12ee   :  { %3370 = vadd.xlane.f32.xlu2 %v3369_v16  ;;  %v3372_v0 = vsel %vm1291_vm7, %v6976_v22, 0.0  ;;  %v6980_v12 = vpop.eup %5077  ;;  %v7015_v16 = vld [vmem:[#allocation25 + $0x8] sm:$0xff] }
0x12ef   :  { %v3375_v33 = vsel %vm1291_vm7, %v6980_v12, 0.0 }
0x12f6   :  { %3661 = vmax.xlane.f32.xlu2 %v3660_v29 }
0x12fb   :  { %v3525_v35 = vpop.xlane.xlu0 %3524 }
0x12fc   :  { %5079 = vrcp.f32 %v3525_v35  ;;  %v7032_v35 = vld [vmem:[#allocation25 + $0x10] sm:$0xff] }
0x12fe   :  { %3373 = vadd.xlane.f32.xlu2 %v3372_v0  ;;  %v3955_v0 = vadd.f32 %v7032_v35, %v3951_v27 }
0x1302   :  { %v5080_v8 = vpop.eup %5079 }
0x1303   :  { %v3539_v39 = vmul.f32 %v5080_v8, %v6918_v4  ;;  %v3528_v25 = vpop.xlane.xlu0 %3527 }
0x1304   :  { %5081 = vrcp.f32 %v3528_v25  ;;  %v7038_v25 = vld [vmem:[#allocation25 + $0x18] sm:$0xff] }
0x1305   :  { %4776 = vmatmul.msk.f32.vlgmr.msrb.gmra.mxu0 %vm1291_vm7, %v3539_v39  ;;  %v3963_v39 = vsel %vm598_vm14, %v3955_v0, -inf }
0x1306   :  { %3376 = vadd.xlane.f32.xlu2 %v3375_v33 }
0x130a   :  { %v5082_v59 = vpop.eup %5081 }
0x130b   :  { %v3531_v19 = vpop.xlane.xlu0 %3530  ;;  %v3540_v63 = vmul.f32 %v5082_v59, %v6923_v9 }
0x130c   :  { %5083 = vrcp.f32 %v3531_v19 }
0x130d   :  { %4777 = vmatmul.msk.f32.gmra.mxu0 %vm1291_vm7, %v3540_v63 }
0x1312   :  { %v5084_v47 = vpop.eup %5083 }
0x1313   :  { %v3534_v56 = vpop.xlane.xlu0 %3533  ;;  %v3541_v57 = vmul.f32 %v5084_v47, %v6930_v20 }
0x1314   :  { %5085 = vrcp.f32 %v3534_v56 }
0x1315   :  { %4778 = vmatmul.msk.f32.gmra.mxu0 %vm1291_vm7, %v3541_v57 }
0x131a   :  { %v5086_v4 = vpop.eup %5085 }
0x131b   :  { %v3356_v37 = vpop.xlane.xlu0 %3355  ;;  %v3542_v53 = vmul.f32 %v5086_v4, %v6936_v45  ;;  %v3949_v45 = vmul.f32 0.25, %v3937_v49 }
0x131c   :  { %v3360_v38 = vsub.f32 %v6941_v42, %v3356_v37 }
0x131d   :  { %4779 = vmatmul.msk.f32.gmra.mxu0 %vm1291_vm7, %v3542_v53 }
0x131e   :  { %v3367_v9 = vmul.f32 1.442695, %v3360_v38 }
0x1320   :  { %5087 = vpow2.f32 %v3367_v9 }
0x1323   :  { %v3653_v52 = vpop.xlane.xlu0 %3652 }
0x1324   :  { %v3663_v55 = vsub.f32 %v6948_v1, %v3653_v52  ;;  %v7004_v1 = vadd.f32 %v7001_v2, %v3949_v45 }
0x1325   :  { %4794 = vmatmul.msk.f32.vlgmr.msra.gmra.mxu0 %vm598_vm14, %v6810_v60 }
0x1326   :  { %v6996_v20 = vpop.eup %5087  ;;  %v3667_v10 = vmul.f32 1.442695, %v3663_v55  ;;  %v3957_v62 = vsel %vm598_vm14, %v7004_v1, -inf }
0x1327   :  { %v3378_v42 = vsel %vm1291_vm7, %v6996_v20, 0.0 }
0x1328   :  { %5089 = vpow2.f32 %v3667_v10  ;;  %3379 = vadd.xlane.f32.xlu0 %v3378_v42 }
0x1329   :  { %5091 = vpow2.f32 %v3671_v32 }
0x132b   :  { %v3656_v50 = vpop.xlane.xlu0 %3655 }
0x132c   :  { %v3664_v60 = vsub.f32 %v6958_v48, %v3656_v50  ;;  %v7018_v48 = vadd.f32 %v7015_v16, %v3950_v7 }
0x132d   :  { %4795 = vmatmul.msk.f32.gmra.mxu0 %vm598_vm14, %v6799_v6 }
0x132e   :  { %v7009_v13 = vpop.eup %5089  ;;  %v3669_v34 = vmul.f32 1.442695, %v3664_v60  ;;  %v3960_v61 = vsel %vm598_vm14, %v7018_v48, -inf }
0x132f   :  { %v3675_v14 = vsel %vm1291_vm7, %v7009_v13, 0.0  ;;  %v7020_v6 = vpop.eup %5091 }
0x1330   :  { %5093 = vpow2.f32 %v3669_v34  ;;  %3958 = vmax.xlane.f32.xlu0 %v3957_v62  ;;  %3676 = vadd.xlane.f32.xlu2 %v3675_v14  ;;  %v3681_v29 = vsel %vm1291_vm7, %v7020_v6, 0.0 }
0x1335   :  { %4796 = vmatmul.msk.f32.gmra.mxu0 %vm598_vm14, %v6795_v21  ;;  %v3946_v21 = vpop.f32.mrf.mxu3 }
0x1336   :  { %v7024_v3 = vpop.eup %5093  ;;  %v3952_v8 = vmul.f32 0.25, %v3946_v21 }
0x1337   :  { %v3678_v24 = vsel %vm1291_vm7, %v7024_v3, 0.0 }
0x1338   :  { %3961 = vmax.xlane.f32.xlu0 %v3960_v61  ;;  %3682 = vadd.xlane.f32.xlu2 %v3681_v29  ;;  %v3956_v33 = vadd.f32 %v7038_v25, %v3952_v8 }
0x1339   :  { %3679 = vadd.xlane.f32.xlu1 %v3678_v24 }
0x133a   :  { %v3966_v59 = vsel %vm598_vm14, %v3956_v33, -inf }
0x133d   :  { %4797 = vmatmul.msk.f32.gmra.mxu0 %vm598_vm14, %v6731_v18 }
0x1340   :  { %3964 = vmax.xlane.f32.xlu0 %v3963_v39 }
0x1348   :  { %3967 = vmax.xlane.f32.xlu0 %v3966_v59 }
0x135c   :  { %4902 = vrot.lane.b32.xlu0 %v6887_v43, %s5675_s23 }
0x1361   :  { %v3371_v19 = vpop.xlane.xlu2 %3370 }
0x1362   :  { %5095 = vrcp.f32 %v3371_v19 }
0x1368   :  { %v5096_v63 = vpop.eup %5095 }
0x1369   :  { %v3385_v47 = vmul.f32 %v5096_v63, %v6965_v46  ;;  %v3662_v18 = vpop.xlane.xlu2 %3661 }
0x136a   :  { %v3666_v56 = vsub.f32 %v6971_v51, %v3662_v18 }
0x136b   :  { %4766 = vmatmul.msk.f32.vlgmr.msra.gmra.mxu1 %vm1291_vm7, %v3385_v47 }
0x136c   :  { %v3673_v57 = vmul.f32 1.442695, %v3666_v56 }
0x136e   :  { %5097 = vpow2.f32 %v3673_v57  ;;  %v7075_v57 = vpop.f32.mrf.mxu0 }
0x1371   :  { %v3374_v4 = vpop.xlane.xlu2 %3373 }
0x1372   :  { %5099 = vrcp.f32 %v3374_v4 }
0x1374   :  { %v7047_v37 = vpop.eup %5097 }
0x1375   :  { %v3684_v53 = vsel %vm1291_vm7, %v7047_v37, 0.0 }
0x1376   :  { %3685 = vadd.xlane.f32.xlu2 %v3684_v53 }
0x1378   :  { %v5100_v43 = vpop.eup %5099 }
0x1379   :  { %v3377_v38 = vpop.xlane.xlu2 %3376  ;;  %v3386_v49 = vmul.f32 %v5100_v43, %v6976_v22 }
0x137a   :  { %5101 = vrcp.f32 %v3377_v38 }
0x137b   :  { %4767 = vmatmul.msk.f32.gmra.mxu1 %vm1291_vm7, %v3386_v49 }
0x1380   :  { %v5102_v46 = vpop.eup %5101 }
0x1381   :  { %v3387_v51 = vmul.f32 %v5102_v46, %v6980_v12 }
0x1383   :  { %4768 = vmatmul.msk.f32.gmra.mxu1 %vm1291_vm7, %v3387_v51 }
0x139b   :  { %v3380_v9 = vpop.xlane.xlu0 %3379 }
0x139c   :  { %5103 = vrcp.f32 %v3380_v9 }
0x13a2   :  { %v5104_v26 = vpop.eup %5103 }
0x13a3   :  { %v3959_v52 = vpop.xlane.xlu0 %3958  ;;  %v3388_v55 = vmul.f32 %v5104_v26, %v6996_v20  ;;  %v3677_v7 = vpop.xlane.xlu2 %3676 }
0x13a4   :  { %v3969_v62 = vsub.f32 %v7004_v1, %v3959_v52  ;;  %v3833_v52 = vpop.f32.mrf.mxu2 }
0x13a5   :  { %4769 = vmatmul.msk.f32.gmra.mxu1 %vm1291_vm7, %v3388_v55 }
0x13a6   :  { %v3973_v40 = vmul.f32 1.442695, %v3969_v62 }
0x13ab   :  { %v3962_v23 = vpop.xlane.xlu0 %3961  ;;  %v3683_v39 = vpop.xlane.xlu2 %3682 }
0x13ac   :  { %v3970_v12 = vsub.f32 %v7018_v48, %v3962_v23  ;;  %v3680_v48 = vpop.xlane.xlu1 %3679 }
0x13ae   :  { %v3975_v20 = vmul.f32 1.442695, %v3970_v12 }
0x13b3   :  { %v3965_v10 = vpop.xlane.xlu0 %3964 }
0x13b4   :  { %v3971_v45 = vsub.f32 %v3955_v0, %v3965_v10 }
0x13b6   :  { %v3977_v22 = vmul.f32 1.442695, %v3971_v45 }
0x13b8   :  { %5105 = vpow2.f32 %v3977_v22 }
0x13bb   :  { %v3968_v42 = vpop.xlane.xlu0 %3967 }
0x13bc   :  { %v3972_v41 = vsub.f32 %v3956_v33, %v3968_v42  ;;  %v3836_v42 = vpop.f32.mrf.mxu2 }
0x13be   :  { %v7057_v32 = vpop.eup %5105  ;;  %v3979_v50 = vmul.f32 1.442695, %v3972_v41 }
0x13bf   :  { %v3987_v60 = vsel %vm598_vm14, %v7057_v32, 0.0 }
0x13c0   :  { %5107 = vpow2.f32 %v3979_v50  ;;  %3988 = vadd.xlane.f32.xlu0 %v3987_v60 }
0x13c1   :  { %5109 = vpow2.f32 %v3975_v20 }
0x13c2   :  { %5111 = vrcp.f32 %v3677_v7 }
0x13c3   :  { %5113 = vpow2.f32 %v3973_v40 }
0x13c4   :  { %5115 = vrcp.f32 %v3680_v48 }
0x13c5   :  { %5117 = vrcp.f32 %v3683_v39 }
0x13c6   :  { %v5108_v34 = vpop.eup %5107 }
0x13c7   :  { %v3990_v14 = vsel %vm598_vm14, %v5108_v34, 0.0  ;;  %v5110_v27 = vpop.eup %5109 }
0x13c8   :  { %3991 = vadd.xlane.f32.xlu2 %v3990_v14  ;;  %v5112_v29 = vpop.eup %5111  ;;  %v3984_v0 = vsel %vm598_vm14, %v5110_v27, 0.0 }
0x13c9   :  { %v3691_v1 = vmul.f32 %v5112_v29, %v7009_v13  ;;  %v5114_v8 = vpop.eup %5113 }
0x13ca   :  { %v5116_v33 = vpop.eup %5115  ;;  %v3981_v59 = vsel %vm598_vm14, %v5114_v8, 0.0 }
0x13cb   :  { %v3692_v19 = vmul.f32 %v5116_v33, %v7024_v3  ;;  %v5118_v63 = vpop.eup %5117  ;;  %v7078_v3 = vpop.f32.mrf.mxu0 }
0x13cc   :  { %v3693_v47 = vmul.f32 %v5118_v63, %v7020_v6 }
0x13ce   :  { %v4903_v61 = vpop.permute.xlu0 %4902 }
0x13cf   :  { %v4904_v24 = vunpack.i.l.bf16 %v4903_v61  ;;  %v4905_v21 = vunpack.i.h.bf16 %v4903_v61 }
0x13d0   :  { %3985 = vadd.xlane.f32.xlu2 %v3984_v0 }
0x13d1   :  { %3727 = vmatpush.msrb.mxu1 %v4904_v24 }
0x13d3   :  { %3728 = vmatpush.msrb.mxu1 %v4905_v21  ;;  %v7080_v4 = vpop.f32.mrf.mxu0 }
0x13d4   :  { %4786 = vmatmul.msk.f32.vlgmr.msrb.gmra.mxu1 %vm1291_vm7, %v3691_v1 }
0x13d8   :  { %3982 = vadd.xlane.f32.xlu2 %v3981_v59 }
0x13db   :  { %v7082_v6 = vpop.f32.mrf.mxu0 }
0x13dc   :  { %4787 = vmatmul.msk.f32.gmra.mxu1 %vm1291_vm7, %v3692_v19 }
0x13e3   :  { %v7084_v53 = vpop.f32.mrf.mxu0 }
0x13e4   :  { %4788 = vmatmul.msk.f32.gmra.mxu1 %vm1291_vm7, %v3693_v47 }
0x13e8   :  { %v7098_v12 = vpop.f32.mrf.mxu1 }
0x13e9   :  { %v3686_v13 = vpop.xlane.xlu2 %3685 }
0x13ea   :  { %5119 = vrcp.f32 %v3686_v13 }
0x13eb   :  { %v7086_v43 = vpop.f32.mrf.mxu0 }
0x13f0   :  { %v5120_v18 = vpop.eup %5119 }
0x13f1   :  { %v3694_v56 = vmul.f32 %v5120_v18, %v7047_v37 }
0x13f3   :  { %4789 = vmatmul.msk.f32.gmra.mxu1 %vm1291_vm7, %v3694_v56  ;;  %v7088_v49 = vpop.f32.mrf.mxu0 }
0x13f8   :  { %v7101_v50 = vpop.f32.mrf.mxu1 }
0x13fb   :  { %v7093_v55 = vpop.f32.mrf.mxu0 }
0x1400   :  { %v7103_v60 = vpop.f32.mrf.mxu1 }
0x1401   :  { %4042 = vxpose.xlu2.b32.start [1/2] (short) (narrow) %v6707_v5, 32 }
0x1403   :  { %v3864_v41 = vpop.f32.mrf.mxu0 }
0x1409   :  { %4043 = vxpose.xlu2.b32.end [2/2] (short) (narrow) %v6711_v54, 32 }
0x1422   :  { %v7105_v20 = vpop.f32.mrf.mxu1 }
0x1433   :  { %v3989_v38 = vpop.xlane.xlu0 %3988 }
0x143b   :  { %v3992_v37 = vpop.xlane.xlu2 %3991 }
0x143c   :  { %5121 = vrcp.f32 %v3992_v37 }
0x143d   :  { %5123 = vrcp.f32 %v3989_v38 }
0x1442   :  { %v5122_v5 = vpop.eup %5121 }
0x1443   :  { %v4000_v46 = vmul.f32 %v5122_v5, %v5108_v34  ;;  %v3986_v51 = vpop.xlane.xlu2 %3985  ;;  %v5124_v54 = vpop.eup %5123 }
0x1444   :  { %5125 = vrcp.f32 %v3986_v51  ;;  %v3999_v9 = vmul.f32 %v5124_v54, %v7057_v32  ;;  %v3867_v32 = vpop.f32.mrf.mxu0 }
0x1445   :  { %4802 = vmatpush.xpose.msk.msra.mxu1 %vm598_vm14, %v4000_v46 }
0x1449   :  { %4803 = vmatpush.xpose.msk.msra.mxu1 %vm598_vm14, %v3999_v9 }
0x144a   :  { %v5126_v26 = vpop.eup %5125 }
0x144b   :  { %v3983_v23 = vpop.xlane.xlu2 %3982  ;;  %v3998_v10 = vmul.f32 %v5126_v26, %v5110_v27 }
0x144c   :  { %5127 = vrcp.f32 %v3983_v23 }
0x144d   :  { %4804 = vmatpush.xpose.msk.msra.mxu1 %vm598_vm14, %v3998_v10 }
0x1451   :  { %v3730_v34 = vpop.f32.mrf.mxu1 }
0x1452   :  { %v5128_v45 = vpop.eup %5127 }
0x1453   :  { %v3997_v22 = vmul.f32 %v5128_v45, %v5114_v8 }
0x1455   :  { %4805 = vmatpush.xpose.msk.msra.mxu1 %vm598_vm14, %v3997_v22 }
0x1458   :  { %4806 = vmatmul.msk.f32.vlgmr.msra.gmra.mxu1 %vm598_vm14, %v3864_v41 }
0x1459   :  { %4100 = vmatpush.msrb.mxu1 %v3836_v42  ;;  %v3733_v27 = vpop.f32.mrf.mxu1 }
0x145b   :  { %4101 = vmatpush.msrb.mxu1 %v3833_v52 }
0x1460   :  { %4807 = vmatmul.msk.f32.gmra.mxu1 %vm598_vm14, %v3867_v32 }
0x1461   :  { %v3736_v48 = vpop.f32.mrf.mxu1 }
0x1470   :  { %v3739_v61 = vpop.f32.mrf.mxu1 }
0x1482   :  { %3778 = vrot.lane.b32.xlu2 %v3730_v34, %s5676_s25 }
0x149a   :  { %v4058_v7 = vpop.trf.xlu2 }
0x149b   :  { %4808 = vmatmul.msk.f32.vlgmr.msrb.gmra.mxu1 %vm1291_vm7, %v4058_v7 }
0x14a2   :  { %v4059_v62 = vpop.trf.xlu2 }
0x14a3   :  { %4809 = vmatmul.msk.f32.gmra.mxu1 %vm1291_vm7, %v4059_v62 }
0x14aa   :  { %v4060_v14 = vpop.trf.xlu2 }
0x14ab   :  { %4810 = vmatmul.msk.f32.gmra.mxu1 %vm1291_vm7, %v4060_v14 }
0x14b2   :  { %v4061_v40 = vpop.trf.xlu2 }
0x14b3   :  { %4811 = vmatmul.msk.f32.gmra.mxu1 %vm1291_vm7, %v4061_v40 }
0x14d5   :  { %v7112_v29 = vpop.f32.mrf.mxu1 }
0x14dd   :  { %v7114_v24 = vpop.f32.mrf.mxu1 }
0x1518   :  { %v4103_v0 = vpop.f32.mrf.mxu1 }
0x1519   :  { %v4115_v56 = vmul.f32 0.25, %v4103_v0 }
0x1520   :  { %v4106_v21 = vpop.f32.mrf.mxu1 }
0x1521   :  { %v4116_v1 = vmul.f32 0.25, %v4106_v21  ;;  %v3870_v21 = vpop.f32.mrf.mxu0 }
0x1523   :  { %v4120_v8 = vadd.f32 %v7015_v16, %v4116_v1  ;;  %v4119_v16 = vadd.f32 %v7001_v2, %v4115_v56 }
0x1525   :  { %v4126_v39 = vsel %vm598_vm14, %v4120_v8, -inf  ;;  %v4123_v37 = vsel %vm598_vm14, %v4119_v16, -inf }
0x1526   :  { %4127 = vmax.xlane.f32.xlu0 %v4126_v39 }
0x1528   :  { %v4109_v33 = vpop.f32.mrf.mxu1 }
0x1529   :  { %v4117_v47 = vmul.f32 0.25, %v4109_v33  ;;  %v3873_v39 = vpop.f32.mrf.mxu0 }
0x152b   :  { %v4121_v18 = vadd.f32 %v7032_v35, %v4117_v47 }
0x152d   :  { %v4129_v38 = vsel %vm598_vm14, %v4121_v18, -inf }
0x1530   :  { %v4112_v59 = vpop.f32.mrf.mxu1 }
0x1531   :  { %v4118_v19 = vmul.f32 0.25, %v4112_v59 }
0x1533   :  { %v4122_v63 = vadd.f32 %v7038_v25, %v4118_v19  ;;  %v3779_v19 = vpop.permute.xlu2 %3778 }
0x1535   :  { %v4132_v13 = vsel %vm598_vm14, %v4122_v63, -inf }
0x1536   :  { %4133 = vmax.xlane.f32.xlu1 %v4132_v13 }
0x153e   :  { %4130 = vmax.xlane.f32.xlu1 %v4129_v38 }
0x1546   :  { %4124 = vmax.xlane.f32.xlu1 %v4123_v37 }
0x1599   :  { %v4128_v5 = vpop.xlane.xlu0 %4127 }
0x159a   :  { %v4136_v54 = vsub.f32 %v4120_v8, %v4128_v5 }
0x159c   :  { %v4141_v9 = vmul.f32 1.442695, %v4136_v54 }
0x15a9   :  { %v4134_v46 = vpop.xlane.xlu1 %4133 }
0x15aa   :  { %v4138_v51 = vsub.f32 %v4122_v63, %v4134_v46 }
0x15ac   :  { %v4145_v25 = vmul.f32 1.442695, %v4138_v51 }
0x15ae   :  { %5129 = vpow2.f32 %v4145_v25 }
0x15af   :  { %5131 = vpow2.f32 %v4141_v9 }
0x15b1   :  { %v4131_v26 = vpop.xlane.xlu1 %4130 }
0x15b2   :  { %v4137_v52 = vsub.f32 %v4121_v18, %v4131_v26 }
0x15b4   :  { %v5130_v23 = vpop.eup %5129  ;;  %v4143_v35 = vmul.f32 1.442695, %v4137_v52 }
0x15b5   :  { %v4156_v10 = vsel %vm598_vm14, %v5130_v23, 0.0  ;;  %v5132_v45 = vpop.eup %5131 }
0x15b6   :  { %5133 = vpow2.f32 %v4143_v35  ;;  %4157 = vadd.xlane.f32.xlu0 %v4156_v10  ;;  %v4150_v32 = vsel %vm598_vm14, %v5132_v45, 0.0 }
0x15b9   :  { %v4125_v2 = vpop.xlane.xlu1 %4124 }
0x15ba   :  { %v4135_v22 = vsub.f32 %v4119_v16, %v4125_v2 }
0x15bc   :  { %v5134_v42 = vpop.eup %5133  ;;  %v4139_v41 = vmul.f32 1.442695, %v4135_v22 }
0x15bd   :  { %v4153_v34 = vsel %vm598_vm14, %v5134_v42, 0.0 }
0x15be   :  { %5135 = vpow2.f32 %v4139_v41  ;;  %4151 = vadd.xlane.f32.xlu0 %v4150_v32  ;;  %4154 = vadd.xlane.f32.xlu1 %v4153_v34 }
0x15c4   :  { %v5136_v7 = vpop.eup %5135 }
0x15c5   :  { %v4147_v62 = vsel %vm598_vm14, %v5136_v7, 0.0 }
0x15c6   :  { %4148 = vadd.xlane.f32.xlu1 %v4147_v62 }
0x15d2   :  { %3746 = vrot.lane.b32.xlu0 %v7098_v12, %s5650_s30 }
0x15da   :  { %3748 = vrot.lane.b32.xlu0 %v7101_v50, %s5650_s30 }
0x15df   :  { %3762 = vrot.lane.b32.xlu1 %v7084_v53, %s5677_s1  ;;  %v4310_v53 = vsel %vm598_vm14, %v7112_v29, 0.0 }
0x15e2   :  { %3780 = vrot.lane.b32.xlu0 %v3733_v27, %s5676_s25 }
0x15e7   :  { %3764 = vrot.lane.b32.xlu1 %v7086_v43, %s5677_s1 }
0x15ea   :  { %3766 = vrot.lane.b32.xlu0 %v7088_v49, %s5677_s1  ;;  %v4313_v49 = vsel %vm598_vm14, %v7114_v24, 0.0 }
0x15ef   :  { %3750 = vrot.lane.b32.xlu1 %v7103_v60, %s5650_s30 }
0x15f2   :  { %3752 = vrot.lane.b32.xlu0 %v7105_v20, %s5650_s30 }
0x15f7   :  { %3782 = vrot.lane.b32.xlu1 %v3736_v48, %s5676_s25 }
0x15fa   :  { %3784 = vrot.lane.b32.xlu0 %v3739_v61, %s5676_s25 }
0x15ff   :  { %3768 = vrot.lane.b32.xlu1 %v7093_v55, %s5677_s1 }
0x1624   :  { %4311 = vadd.xlane.f32.xlu0 %v4310_v53 }
0x1629   :  { %v4158_v43 = vpop.xlane.xlu0 %4157 }
0x162a   :  { %5137 = vrcp.f32 %v4158_v43 }
0x162c   :  { %4314 = vadd.xlane.f32.xlu0 %v4313_v49 }
0x1630   :  { %v5138_v12 = vpop.eup %5137 }
0x1631   :  { %v4166_v50 = vmul.f32 %v5138_v12, %v5130_v23  ;;  %v4155_v60 = vpop.xlane.xlu1 %4154  ;;  %v4152_v20 = vpop.xlane.xlu0 %4151 }
0x1632   :  { %5139 = vrcp.f32 %v4155_v60 }
0x1633   :  { %4812 = vmatpush.xpose.msk.msrb.mxu2 %vm598_vm14, %v4166_v50  ;;  %5141 = vrcp.f32 %v4152_v20 }
0x1638   :  { %v5140_v14 = vpop.eup %5139 }
0x1639   :  { %v4149_v55 = vpop.xlane.xlu1 %4148  ;;  %v4165_v40 = vmul.f32 %v5140_v14, %v5134_v42  ;;  %v5142_v27 = vpop.eup %5141 }
0x163a   :  { %5143 = vrcp.f32 %v4149_v55  ;;  %v4164_v48 = vmul.f32 %v5142_v27, %v5132_v45 }
0x163b   :  { %4813 = vmatpush.xpose.msk.msrb.mxu2 %vm598_vm14, %v4165_v40 }
0x163f   :  { %4814 = vmatpush.xpose.msk.msrb.mxu2 %vm598_vm14, %v4164_v48 }
0x1640   :  { %v5144_v61 = vpop.eup %5143 }
0x1641   :  { %v4163_v0 = vmul.f32 %v5144_v61, %v5136_v7 }
0x1643   :  { %4815 = vmatpush.xpose.msk.msrb.mxu2 %vm598_vm14, %v4163_v0 }
0x1644   :  { %v3747_v1 = vpop.permute.xlu0 %3746 }
0x1645   :  { %v3790_v33 = vsel %vm354_vm0, %v7075_v57, %v3747_v1 }
0x1646   :  { %4816 = vmatmul.msk.f32.vlgmr.msrb.gmra.mxu2 %vm598_vm14, %v3870_v21 }
0x164c   :  { %v3749_v8 = vpop.permute.xlu0 %3748 }
0x164d   :  { %v3791_v56 = vsel %vm354_vm0, %v7078_v3, %v3749_v8 }
0x164e   :  { %4817 = vmatmul.msk.f32.gmra.mxu2 %vm598_vm14, %v3873_v39 }
0x1651   :  { %v3763_v59 = vpop.permute.xlu1 %3762 }
0x1652   :  { %v3794_v63 = vsel %vm1291_vm7, %v3790_v33, %v3763_v59 }
0x1653   :  { %v3798_v47 = vsel %vm1891_vm8, %v3794_v63, %v3779_v19 }
0x1654   :  { %v3781_v13 = vpop.permute.xlu0 %3780  ;;  %v4208_v18 = vsel %vm598_vm14, %v3798_v47, 0.0 }
0x1655   :  { %4209 = vadd.xlane.f32.xlu1 %v4208_v18 }
0x1659   :  { %v3765_v38 = vpop.permute.xlu1 %3764 }
0x165a   :  { %v3795_v16 = vsel %vm1291_vm7, %v3791_v56, %v3765_v38 }
0x165b   :  { %v3799_v37 = vsel %vm1891_vm8, %v3795_v16, %v3781_v13 }
0x165c   :  { %v4211_v57 = vsel %vm598_vm14, %v3799_v37, 0.0  ;;  %v3767_v5 = vpop.permute.xlu0 %3766 }
0x165d   :  { %4212 = vadd.xlane.f32.xlu1 %v4211_v57 }
0x1661   :  { %v3751_v46 = vpop.permute.xlu1 %3750 }
0x1662   :  { %v3792_v51 = vsel %vm354_vm0, %v7080_v4, %v3751_v46 }
0x1663   :  { %v3796_v25 = vsel %vm1291_vm7, %v3792_v51, %v3767_v5 }
0x1664   :  { %v3753_v54 = vpop.permute.xlu0 %3752 }
0x1665   :  { %v3793_v52 = vsel %vm354_vm0, %v7082_v6, %v3753_v54 }
0x1669   :  { %v3783_v9 = vpop.permute.xlu1 %3782 }
0x166a   :  { %v3800_v26 = vsel %vm1891_vm8, %v3796_v25, %v3783_v9  ;;  %v4423_v25 = vld [vmem:[#allocation27 + $0x18] sm:$0xff] }
0x166b   :  { %v4214_v3 = vsel %vm598_vm14, %v3800_v26, 0.0  ;;  %4452 = vmatpush.msrb.mxu0 %v4423_v25 }
0x166c   :  { %4215 = vadd.xlane.f32.xlu1 %v4214_v3  ;;  %v3785_v35 = vpop.permute.xlu0 %3784 }
0x1671   :  { %v3769_v23 = vpop.permute.xlu1 %3768 }
0x1672   :  { %v3797_v10 = vsel %vm1291_vm7, %v3793_v52, %v3769_v23 }
0x1673   :  { %v3801_v2 = vsel %vm1891_vm8, %v3797_v10, %v3785_v35  ;;  %v4422_v35 = vld [vmem:[#allocation27 + $0x10] sm:$0xff] }
0x1674   :  { %v4217_v4 = vsel %vm598_vm14, %v3801_v2, 0.0  ;;  %4453 = vmatpush.msrb.mxu0 %v4422_v35 }
0x1675   :  { %4218 = vadd.xlane.f32.xlu1 %v4217_v4 }
0x1697   :  { %v4312_v45 = vpop.xlane.xlu0 %4311 }
0x1698   :  { %v4322_v53 = vmul.f32 %v4312_v45, %v6522_v11 }
0x169a   :  { %v7191_v20 = vsub.f32 %v7112_v29, %v4322_v53 }
0x169c   :  { %v4330_v61 = vmul.f32 %v7191_v20, %v7191_v20 }
0x169e   :  { %v4334_v29 = vsel %vm598_vm14, %v4330_v61, 0.0 }
0x169f   :  { %v4315_v22 = vpop.xlane.xlu0 %4314 }
0x16a0   :  { %v4323_v34 = vmul.f32 %v4315_v22, %v6522_v11  ;;  %v4421_v22 = vld [vmem:[#allocation27 + $0x8] sm:$0xff] }
0x16a1   :  { %4454 = vmatpush.msrb.mxu0 %v4421_v22 }
0x16a2   :  { %v7186_v43 = vsub.f32 %v7114_v24, %v4323_v34  ;;  %v4420_v34 = vld [vmem:[#allocation27] sm:$0xff] }
0x16a3   :  { %4455 = vmatpush.msrb.mxu0 %v4420_v34 }
0x16a4   :  { %v4331_v40 = vmul.f32 %v7186_v43, %v7186_v43 }
0x16a6   :  { %v4337_v27 = vsel %vm598_vm14, %v4331_v40, 0.0 }
0x16c8   :  { %v4210_v42 = vpop.xlane.xlu1 %4209 }
0x16c9   :  { %v4220_v41 = vmul.f32 %v4210_v42, %v6522_v11  ;;  %v4202_v32 = vpop.f32.mrf.mxu2 }
0x16ca   :  { %v4316_v6 = vsel %vm598_vm14, %v4202_v32, 0.0 }
0x16cb   :  { %v7179_v7 = vsub.f32 %v3798_v47, %v4220_v41  ;;  %4317 = vadd.xlane.f32.xlu0 %v4316_v6 }
0x16cd   :  { %v4228_v62 = vmul.f32 %v7179_v7, %v7179_v7 }
0x16cf   :  { %v4232_v49 = vsel %vm598_vm14, %v4228_v62, 0.0 }
0x16d0   :  { %4233 = vadd.xlane.f32.xlu1 %v4232_v49  ;;  %v4213_v12 = vpop.xlane.xlu1 %4212 }
0x16d1   :  { %v4221_v50 = vmul.f32 %v4213_v12, %v6522_v11  ;;  %v4205_v60 = vpop.f32.mrf.mxu2 }
0x16d2   :  { %v4319_v55 = vsel %vm598_vm14, %v4205_v60, 0.0 }
0x16d3   :  { %v7193_v14 = vsub.f32 %v3799_v37, %v4221_v50  ;;  %4320 = vadd.xlane.f32.xlu0 %v4319_v55 }
0x16d5   :  { %v4229_v24 = vmul.f32 %v7193_v14, %v7193_v14 }
0x16d7   :  { %v4235_v48 = vsel %vm598_vm14, %v4229_v24, 0.0 }
0x16d8   :  { %4338 = vadd.xlane.f32.xlu1 %v4337_v27  ;;  %4236 = vadd.xlane.f32.xlu2 %v4235_v48 }
0x16db   :  { %4335 = vadd.xlane.f32.xlu0 %v4334_v29  ;;  %v4697_v29 = vld [vmem:[%s7334_s17 + $0x4] sm:$0xf] }
0x16df   :  { %v4216_v0 = vpop.xlane.xlu1 %4215 }
0x16e0   :  { %v4222_v21 = vmul.f32 %v4216_v0, %v6522_v11 }
0x16e2   :  { %v7206_v1 = vsub.f32 %v3800_v26, %v4222_v21 }
0x16e4   :  { %v4230_v8 = vmul.f32 %v7206_v1, %v7206_v1 }
0x16e6   :  { %v4238_v39 = vsel %vm598_vm14, %v4230_v8, 0.0 }
0x16e7   :  { %4239 = vadd.xlane.f32.xlu0 %v4238_v39 }
0x16e8   :  { %v4219_v33 = vpop.xlane.xlu1 %4218 }
0x16e9   :  { %v4223_v59 = vmul.f32 %v4219_v33, %v6522_v11 }
0x16eb   :  { %v7212_v19 = vsub.f32 %v3801_v2, %v4223_v59 }
0x16ed   :  { %v4231_v63 = vmul.f32 %v7212_v19, %v7212_v19 }
0x16ef   :  { %v4241_v47 = vsel %vm598_vm14, %v4231_v63, 0.0 }
0x16f0   :  { %4242 = vadd.xlane.f32.xlu0 %v4241_v47 }
0x173e   :  { %v4318_v13 = vpop.xlane.xlu0 %4317 }
0x173f   :  { %v4324_v18 = vmul.f32 %v4318_v13, %v6522_v11  ;;  %v7237_v13 = vperm.slane %v4697_v29, 0 }
0x1741   :  { %v7218_v56 = vsub.f32 %v4202_v32, %v4324_v18 }
0x1743   :  { %v4234_v38 = vpop.xlane.xlu1 %4233  ;;  %v4332_v37 = vmul.f32 %v7218_v56, %v7218_v56 }
0x1744   :  { %v4244_v16 = vmul.f32 %v4234_v38, %v6522_v11 }
0x1745   :  { %v4340_v5 = vsel %vm598_vm14, %v4332_v37, 0.0 }
0x1746   :  { %v4248_v57 = vadd.f32 1e-05, %v4244_v16  ;;  %v4321_v46 = vpop.xlane.xlu0 %4320  ;;  %4341 = vadd.xlane.f32.xlu1 %v4340_v5 }
0x1747   :  { %v4325_v51 = vmul.f32 %v4321_v46, %v6522_v11 }
0x1748   :  { %5145 = vrsqrt.f32 %v4248_v57  ;;  %vm4258_vm6 = vweird.f32 %v4248_v57 }
0x1749   :  { %v7225_v54 = vsub.f32 %v4205_v60, %v4325_v51  ;;  %v4301_v51 = vperm.slane %v4697_v29, 1 }
0x174b   :  { %v4237_v9 = vpop.xlane.xlu2 %4236  ;;  %v4339_v26 = vpop.xlane.xlu1 %4338  ;;  %v4333_v23 = vmul.f32 %v7225_v54, %v7225_v54 }
0x174c   :  { %v4245_v3 = vmul.f32 %v4237_v9, %v6522_v11  ;;  %v4347_v52 = vmul.f32 %v4339_v26, %v6522_v11 }
0x174d   :  { %v4343_v45 = vsel %vm598_vm14, %v4333_v23, 0.0 }
0x174e   :  { %v5146_v10 = vpop.eup %5145  ;;  %v4249_v2 = vadd.f32 1e-05, %v4245_v3  ;;  %v4351_v4 = vadd.f32 1e-05, %v4347_v52  ;;  %v4336_v41 = vpop.xlane.xlu0 %4335  ;;  %4344 = vadd.xlane.f32.xlu1 %v4343_v45 }
0x174f   :  { %v4253_v42 = vmul.f32 %v5146_v10, %v4248_v57  ;;  %v4346_v32 = vmul.f32 %v4336_v41, %v6522_v11  ;;  %vm4259_vm8 = vweird.f32 %v5146_v10 }
0x1750   :  { %5147 = vrsqrt.f32 %v4249_v2  ;;  %vm4260_vm9 = vmor %vm4258_vm6, %vm4259_vm8  ;;  %vm4268_vm11 = vweird.f32 %v4249_v2  ;;  %vm4370_vm3 = vweird.f32 %v4351_v4 }
0x1751   :  { %v4254_v6 = vmul.f32 %v5146_v10, %v4253_v42  ;;  %5149 = vrsqrt.f32 %v4351_v4  ;;  %v4350_v62 = vadd.f32 1e-05, %v4346_v32 }
0x1753   :  { %v4255_v53 = vmul.f32 0.5, %v4254_v6  ;;  %5151 = vrsqrt.f32 %v4350_v62  ;;  %vm4360_vm1 = vweird.f32 %v4350_v62 }
0x1755   :  { %v4256_v49 = vsub.f32 1.5, %v4255_v53 }
0x1756   :  { %v5148_v12 = vpop.eup %5147 }
0x1757   :  { %v5150_v50 = vpop.eup %5149  ;;  %v4263_v60 = vmul.f32 %v5148_v12, %v4249_v2  ;;  %v4257_v55 = vmul.f32 %v5146_v10, %v4256_v49  ;;  %vm4269_vm10 = vweird.f32 %v5148_v12 }
0x1758   :  { %v4365_v40 = vmul.f32 %v5150_v50, %v4351_v4  ;;  %vm4371_vm12 = vweird.f32 %v5150_v50  ;;  %vm4270_vm13 = vmor %vm4268_vm11, %vm4269_vm10 }
0x1759   :  { %v4264_v24 = vmul.f32 %v5148_v12, %v4263_v60  ;;  %v5152_v27 = vpop.eup %5151  ;;  %v4261_v39 = vsel %vm4260_vm9, %v5146_v10, %v4257_v55  ;;  %vm4372_vm4 = vmor %vm4370_vm3, %vm4371_vm12 }
0x175a   :  { %v4366_v48 = vmul.f32 %v5150_v50, %v4365_v40  ;;  %v4240_v61 = vpop.xlane.xlu0 %4239  ;;  %v4355_v21 = vmul.f32 %v5152_v27, %v4350_v62  ;;  %v4292_v38 = vmul.f32 %v4261_v39, %v7179_v7  ;;  %vm4361_vm15 = vweird.f32 %v5152_v27 }
0x175b   :  { %v4265_v0 = vmul.f32 0.5, %v4264_v24  ;;  %v4246_v8 = vmul.f32 %v4240_v61, %v6522_v11  ;;  %v7242_v7 = vperm.slane %v4697_v29, 2  ;;  %vm4362_vm2 = vmor %vm4360_vm1, %vm4361_vm15 }
0x175c   :  { %v4367_v33 = vmul.f32 0.5, %v4366_v48  ;;  %v4356_v63 = vmul.f32 %v5152_v27, %v4355_v21  ;;  %v4297_v9 = vmul.f32 %v7237_v13, %v4292_v38 }
0x175d   :  { %v4266_v59 = vsub.f32 1.5, %v4265_v0  ;;  %v4250_v47 = vadd.f32 1e-05, %v4246_v8 }
0x175e   :  { %v4368_v18 = vsub.f32 1.5, %v4367_v33  ;;  %v4357_v37 = vmul.f32 0.5, %v4356_v63  ;;  %v4302_v42 = vadd.f32 %v4301_v51, %v4297_v9 }
0x175f   :  { %v4267_v16 = vmul.f32 %v5148_v12, %v4266_v59  ;;  %5153 = vrsqrt.f32 %v4250_v47  ;;  %vm4278_vm8 = vweird.f32 %v4250_v47 }
0x1760   :  { %v4369_v57 = vmul.f32 %v5150_v50, %v4368_v18  ;;  %v4358_v46 = vsub.f32 1.5, %v4357_v37  ;;  %v4306_v53 = vmul.f32 0.5, %v4302_v42 }
0x1761   :  { %v4271_v5 = vsel %vm4270_vm13, %v5148_v12, %v4267_v16 }
0x1762   :  { %v4373_v25 = vsel %vm4372_vm4, %v5150_v50, %v4369_v57  ;;  %v4293_v26 = vmul.f32 %v4271_v5, %v7193_v14  ;;  %v4359_v3 = vmul.f32 %v5152_v27, %v4358_v46  ;;  %v7248_v14 = vperm.slane %v4697_v29, 3 }
0x1763   :  { %v4243_v52 = vpop.xlane.xlu0 %4242  ;;  %v4395_v23 = vmul.f32 %v4373_v25, %v7186_v43 }
0x1764   :  { %v4247_v35 = vmul.f32 %v4243_v52, %v6522_v11  ;;  %v4363_v2 = vsel %vm4362_vm2, %v5152_v27, %v4359_v3  ;;  %v4298_v41 = vmul.f32 %v7237_v13, %v4293_v26 }
0x1765   :  { %v5154_v10 = vpop.eup %5153  ;;  %v4394_v4 = vmul.f32 %v4363_v2, %v7191_v20  ;;  %v4400_v32 = vmul.f32 %v7242_v7, %v4395_v23 }
0x1766   :  { %v4273_v45 = vmul.f32 %v5154_v10, %v4250_v47  ;;  %v4251_v22 = vadd.f32 1e-05, %v4247_v35  ;;  %vm4279_vm5 = vweird.f32 %v5154_v10  ;;  %v4303_v12 = vadd.f32 %v4301_v51, %v4298_v41 }
0x1767   :  { %v4399_v34 = vmul.f32 %v7242_v7, %v4394_v4  ;;  %v4405_v50 = vadd.f32 %v7248_v14, %v4400_v32  ;;  %vm4280_vm6 = vmor %vm4278_vm8, %vm4279_vm5 }
0x1768   :  { %v4274_v6 = vmul.f32 %v5154_v10, %v4273_v45  ;;  %5155 = vrsqrt.f32 %v4251_v22  ;;  %v4307_v61 = vmul.f32 0.5, %v4303_v12  ;;  %vm4288_vm10 = vweird.f32 %v4251_v22 }
0x1769   :  { %v4404_v43 = vadd.f32 %v7248_v14, %v4399_v34  ;;  %v4409_v29 = vmul.f32 0.5, %v4405_v50 }
0x176a   :  { %v4275_v62 = vmul.f32 0.5, %v4274_v6 }
0x176b   :  { %v4408_v49 = vmul.f32 0.5, %v4404_v43  ;;  %v4413_v33 = vadd.f32 %v4409_v29, %v4307_v61 }
0x176c   :  { %v4276_v20 = vsub.f32 1.5, %v4275_v62 }
0x176d   :  { %v4412_v55 = vadd.f32 %v4408_v49, %v4306_v53  ;;  %v4417_v18 = vadd.f32 %v4413_v33, %v6609_v58 }
0x176e   :  { %v5156_v60 = vpop.eup %5155  ;;  %v4277_v40 = vmul.f32 %v5154_v10, %v4276_v20 }
0x176f   :  { %v4283_v24 = vmul.f32 %v5156_v60, %v4251_v22  ;;  %v4416_v48 = vadd.f32 %v4412_v55, %v6606_v44  ;;  %vm4289_vm9 = vweird.f32 %v5156_v60 }
0x1770   :  { %v4281_v27 = vsel %vm4280_vm6, %v5154_v10, %v4277_v40  ;;  %vm4290_vm11 = vmor %vm4288_vm10, %vm4289_vm9 }
0x1771   :  { %v4294_v0 = vmul.f32 %v4281_v27, %v7206_v1  ;;  %v4284_v21 = vmul.f32 %v5156_v60, %v4283_v24  ;;  %4818 = vmatmul.msk.f32.vlgmr.msrb.gmra.mxu0 %vm598_vm14, %v4416_v48  ;;  %v4471_v24 = vld [vmem:[#allocation28 + $0x10] sm:$0xf] }
0x1773   :  { %v4299_v8 = vmul.f32 %v7237_v13, %v4294_v0  ;;  %v4285_v39 = vmul.f32 0.5, %v4284_v21 }
0x1775   :  { %v4286_v59 = vsub.f32 1.5, %v4285_v39  ;;  %v4304_v63 = vadd.f32 %v4301_v51, %v4299_v8 }
0x1777   :  { %v4287_v47 = vmul.f32 %v5156_v60, %v4286_v59  ;;  %v4308_v41 = vmul.f32 0.5, %v4304_v63 }
0x1779   :  { %v4291_v44 = vsel %vm4290_vm11, %v5156_v60, %v4287_v47  ;;  %4819 = vmatmul.msk.f32.gmra.mxu0 %vm598_vm14, %v4417_v18 }
0x177a   :  { %v4295_v38 = vmul.f32 %v4291_v44, %v7212_v19 }
0x177c   :  { %v4300_v1 = vmul.f32 %v7237_v13, %v4295_v38 }
0x177e   :  { %v4305_v16 = vadd.f32 %v4301_v51, %v4300_v1 }
0x1780   :  { %v4309_v49 = vmul.f32 0.5, %v4305_v16 }
0x17b9   :  { %v4342_v37 = vpop.xlane.xlu1 %4341 }
0x17ba   :  { %v4348_v57 = vmul.f32 %v4342_v37, %v6522_v11 }
0x17bc   :  { %v4352_v5 = vadd.f32 1e-05, %v4348_v57 }
0x17be   :  { %5157 = vrsqrt.f32 %v4352_v5  ;;  %vm4380_vm13 = vweird.f32 %v4352_v5 }
0x17c1   :  { %v4345_v46 = vpop.xlane.xlu1 %4344 }
0x17c2   :  { %v4349_v25 = vmul.f32 %v4345_v46, %v6522_v11 }
0x17c4   :  { %v5158_v9 = vpop.eup %5157  ;;  %v4353_v26 = vadd.f32 1e-05, %v4349_v25 }
0x17c5   :  { %v4375_v3 = vmul.f32 %v5158_v9, %v4352_v5  ;;  %vm4381_vm12 = vweird.f32 %v5158_v9 }
0x17c6   :  { %5159 = vrsqrt.f32 %v4353_v26  ;;  %vm4382_vm3 = vmor %vm4380_vm13, %vm4381_vm12  ;;  %vm4390_vm15 = vweird.f32 %v4353_v26 }
0x17c7   :  { %v4376_v58 = vmul.f32 %v5158_v9, %v4375_v3 }
0x17c9   :  { %v4377_v52 = vmul.f32 0.5, %v4376_v58 }
0x17cb   :  { %v4378_v19 = vsub.f32 1.5, %v4377_v52 }
0x17cc   :  { %v5160_v23 = vpop.eup %5159 }
0x17cd   :  { %v4379_v35 = vmul.f32 %v5158_v9, %v4378_v19  ;;  %v4385_v13 = vmul.f32 %v5160_v23, %v4353_v26  ;;  %vm4391_vm4 = vweird.f32 %v5160_v23 }
0x17ce   :  { %vm4392_vm1 = vmor %vm4390_vm15, %vm4391_vm4 }
0x17cf   :  { %v4383_v51 = vsel %vm4382_vm3, %v5158_v9, %v4379_v35  ;;  %v4386_v10 = vmul.f32 %v5160_v23, %v4385_v13 }
0x17d0   :  { %v4396_v2 = vmul.f32 %v4383_v51, %v7218_v56 }
0x17d1   :  { %v4387_v4 = vmul.f32 0.5, %v4386_v10 }
0x17d2   :  { %v4401_v11 = vmul.f32 %v7242_v7, %v4396_v2 }
0x17d3   :  { %v4388_v45 = vsub.f32 1.5, %v4387_v4 }
0x17d4   :  { %v4406_v22 = vadd.f32 %v7248_v14, %v4401_v11 }
0x17d5   :  { %v4389_v42 = vmul.f32 %v5160_v23, %v4388_v45 }
0x17d6   :  { %v4410_v32 = vmul.f32 0.5, %v4406_v22 }
0x17d7   :  { %v4393_v34 = vsel %vm4392_vm1, %v5160_v23, %v4389_v42 }
0x17d8   :  { %v4397_v6 = vmul.f32 %v4393_v34, %v7225_v54  ;;  %v4414_v43 = vadd.f32 %v4410_v32, %v4308_v41  ;;  %v4908_v54 = vld [vmem:[%s7338_s21] ss:$0 sm:$0xff] }
0x17da   :  { %v4402_v62 = vmul.f32 %v7242_v7, %v4397_v6  ;;  %v4418_v56 = vadd.f32 %v4414_v43, %v6630_v36  ;;  %v4469_v36 = vld [vmem:[#allocation28] sm:$0xff] }
0x17dc   :  { %4820 = vmatmul.msk.f32.gmra.mxu0 %vm598_vm14, %v4418_v56  ;;  %v4407_v53 = vadd.f32 %v7248_v14, %v4402_v62  ;;  %v4470_v14 = vld [vmem:[#allocation28 + $0x8] sm:$0xff] }
0x17de   :  { %v4411_v20 = vmul.f32 0.5, %v4407_v53 }
0x17e0   :  { %v4415_v12 = vadd.f32 %v4411_v20, %v4309_v49 }
0x17e2   :  { %v4419_v50 = vadd.f32 %v4415_v12, %v6639_v28 }
0x17e4   :  { %4821 = vmatmul.msk.f32.gmra.mxu0 %vm598_vm14, %v4419_v50  ;;  %vm4515_vm14 = vcmask 60416  }
0x17ee   :  { %v4457_v60 = vpop.f32.mrf.mxu0 }
0x17ef   :  { %v4458_v40 = vadd.f32 %v4908_v54, %v4457_v60 }
0x17f6   :  { %v4460_v55 = vpop.f32.mrf.mxu0 }
0x17f7   :  { %v4461_v7 = vadd.f32 %v4908_v54, %v4460_v55 }
0x17f9   :  { %4495 = vmatpush.msra.mxu3 %v4461_v7 }
0x17fb   :  { %4496 = vmatpush.msra.mxu3 %v4458_v40 }
0x17fc   :  { %4822 = vmatmul.msk.f32.vlgmr.msra.gmra.mxu3 %vm1291_vm7, %v4469_v36 }
0x1804   :  { %4823 = vmatmul.msk.f32.gmra.mxu3 %vm1291_vm7, %v4470_v14 }
0x180c   :  { %4824 = vmatmul.msk.f32.gmra.mxu3 %vm1291_vm7, %v4471_v24 }
0x1859   :  { %v4463_v28 = vpop.f32.mrf.mxu0 }
0x185a   :  { %v4464_v61 = vadd.f32 %v4908_v54, %v4463_v28 }
0x1861   :  { %v4466_v27 = vpop.f32.mrf.mxu0 }
0x1862   :  { %v4467_v48 = vadd.f32 %v4908_v54, %v4466_v27 }
0x1864   :  { %4531 = vmatpush.msra.mxu2 %v4467_v48 }
0x1866   :  { %4532 = vmatpush.msra.mxu2 %v4464_v61 }
0x1867   :  { %4825 = vmatmul.msk.f32.vlgmr.msra.gmra.mxu2 %vm1291_vm7, %v4469_v36 }
0x186f   :  { %4826 = vmatmul.msk.f32.gmra.mxu2 %vm1291_vm7, %v4470_v14 }
0x1877   :  { %4827 = vmatmul.msk.f32.gmra.mxu2 %vm1291_vm7, %v4471_v24 }
0x187f   :  { %v4498_v29 = vpop.f32.mrf.mxu3 }
0x1880   :  { %v4507_v0 = vmul.f32 %v4498_v29, %v5948_v15 }
0x1882   :  { %v4510_v21 = vadd.f32 %v4507_v0, %v5920_v30 }
0x1884   :  { %4513 = vst.msk [vmem:[%s7360_s29] sm:$0xff] %vm354_vm0, %v4510_v21 }
0x1887   :  { %v4501_v8 = vpop.f32.mrf.mxu3 }
0x1888   :  { %v4508_v39 = vmul.f32 %v4501_v8, %v5948_v15 }
0x188a   :  { %v4511_v33 = vadd.f32 %v4508_v39, %v5920_v30 }
0x188c   :  { %4514 = vst.msk [vmem:[%s7360_s29 + $0x8] sm:$0xff] %vm354_vm0, %v4511_v33 }
0x188f   :  { %v4504_v59 = vpop.f32.mrf.mxu3 }
0x1890   :  { %v4509_v63 = vmul.f32 %v4504_v59, %v5948_v15 }
0x1892   :  { %v4512_v47 = vadd.f32 %v4509_v63, %v5920_v30 }
0x1894   :  { %4516 = vst.msk [vmem:[%s7360_s29 + $0x10] sm:$0xf] %vm4515_vm14, %v4512_v47 }
0x18ea   :  { %v4534_v18 = vpop.f32.mrf.mxu2 }
0x18eb   :  { %v4543_v44 = vmul.f32 %v4534_v18, %v5951_v17 }
0x18ed   :  { %v4546_v38 = vadd.f32 %v4543_v44, %v5922_v31 }
0x18ef   :  { %4828 = vst.msk [vmem:[%s7360_s29 + $0x18] sm:$0xff] %vm354_vm0, %v4546_v38 }
0x18f2   :  { %v4537_v1 = vpop.f32.mrf.mxu2 }
0x18f3   :  { %v4544_v15 = vmul.f32 %v4537_v1, %v5951_v17 }
0x18f5   :  { %v4547_v16 = vadd.f32 %v4544_v15, %v5922_v31 }
0x18f7   :  { %4829 = vst.msk [vmem:[%s7360_s29 + $0x20] sm:$0xff] %vm354_vm0, %v4547_v16 }
0x18fa   :  { %v4540_v30 = vpop.f32.mrf.mxu2 }
0x18fb   :  { %v4545_v37 = vmul.f32 %v4540_v30, %v5951_v17 }
0x18fd   :  { %v4548_v57 = vadd.f32 %v4545_v37, %v5922_v31 }
0x18ff   :  { %4830 = vst.msk [vmem:[%s7360_s29 + $0x28] sm:$0xf] %vm4515_vm14, %v4548_v57 }
0x1900   :  { %4557 = vsyncpa [#allocation3], 1 }
0x1901   :  { %4558 = vsyncpa [#allocation5], 1 }
0x1902   :  { %4559 = vsyncpa [#allocation8], 1 }
0x1903   :  { %4560 = vsyncpa [#allocation11], 1 }
0x1904   :  { %4561 = vsyncpa [#allocation14], 1 }
0x1905   :  { %4562 = vsyncpa [#allocation17], 1 }
0x1906   :  { %4563 = vsyncpa [#allocation20], 1 }
0x1907   :  { %4564 = vsyncpa [#allocation23], 1 }
0x1908   :  { %4565 = vsyncpa [#allocation26], 1 }
0x1909   :  { %4566 = vsyncpa [#allocation29], 1 }

</bundles_post_ra>
